<compile_context>
chip_gen: v6e
topology: v6e:2x2x1
jax: 0.10.0
libtpu: 0.0.40
codegen_flags: <defaults>
</compile_context>

<pallas_src>
import functools

import jax
import jax.numpy as jnp
from jax.experimental import pallas as pl
from jax.experimental.pallas import tpu as pltpu


_C = 128                          # lane-dense channel padding used everywhere
_VMEM_LIMIT = 32 * 1024 * 1024    # working sets are <2 MiB; safe on v5e/v6e/v7x


def _cparams(*sem):
    return pltpu.CompilerParams(dimension_semantics=sem,
                                vmem_limit_bytes=_VMEM_LIMIT)


# ---------------------------------------------------------------------------
# One-time parameter preparation (perf review item #1): pad / reshape / cast
# every weight and BN vector into the exact layout the kernels consume, so the
# per-forward trace contains no parameter pads/casts at all.
# ---------------------------------------------------------------------------
def prepare_params(p, *, final_hw, C=_C):
    f32, bf16 = jnp.float32, jnp.bfloat16

    def vec(v, k=C):
        v = v.astype(f32)
        return jnp.pad(v, (0, k - v.shape[0])).reshape(1, k)

    def mat(w, rows=C, cols=C):
        w = w.astype(f32)
        w = jnp.pad(w, ((0, rows - w.shape[0]), (0, cols - w.shape[1])))
        return w.astype(bf16)

    prep = {}

    # stem: conv0 (7x7 s2, via im2col matmul) + norm0 epilogue
    w0 = p["conv0"].reshape(-1, p["conv0"].shape[-1])          # [147, 16]
    k0 = w0.shape[0]
    prep["w0"] = mat(w0, rows=k0, cols=C)                      # [147, 128] bf16
    prep["id_s0"] = jnp.ones((1, k0), f32)                     # identity prologue
    prep["id_b0"] = jnp.zeros((1, k0), f32)
    s0, b0 = p["n0"]
    prep["s0"], prep["b0"] = vec(s0), vec(b0)

    # dense layers: 3x3 weight columns pre-shifted to the layer's channel
    # offset so the DenseNet concat becomes a plain add in the kernel.
    def prep_layer(lp):
        s1, b1 = lp["n1"]
        s2, b2 = lp["n2"]
        c_in = s1.shape[0]                         # == channel offset of growth
        w1 = lp["w1"].reshape(c_in, -1)            # [c_in, bn_size*growth]
        w2 = lp["w2"]                              # [3, 3, bn_size*growth, growth]
        cb, g = w2.shape[2], w2.shape[3]
        w2p = jnp.zeros((9, C, C), f32)
        w2p = w2p.at[:, :cb, c_in:c_in + g].set(w2.reshape(9, cb, g).astype(f32))
        return {"s1": vec(s1), "b1": vec(b1), "w1": mat(w1),
                "s2": vec(s2), "b2": vec(b2), "w2": w2p.astype(bf16)}

    prep["block1"] = [prep_layer(lp) for lp in p["block1"]]
    prep["block2"] = [prep_layer(lp) for lp in p["block2"]]

    # transition: BN prologue + 1x1 conv (identity epilogue)
    st, bt = p["trans1"]["n"]
    wt = p["trans1"]["w"].reshape(st.shape[0], -1)
    prep["t_s"], prep["t_b"] = vec(st), vec(bt)
    prep["t_w"] = mat(wt)
    prep["id_so"] = jnp.ones((1, C), f32)
    prep["id_bo"] = jnp.zeros((1, C), f32)

    # head: norm5 + ReLU + GAP + classifier  (1/HW folded into the weight)
    s5, b5 = p["n5"]
    prep["s5"] = vec(s5).reshape(1, 1, C)
    prep["b5"] = vec(b5).reshape(1, 1, C)
    prep["cls_w"] = mat(p["cls_w"] * (1.0 / final_hw))
    prep["cls_b"] = vec(p["cls_b"])
    return prep


# --------------------------------------------------------- fused matmul -----
# out = [relu](( [relu](a * sa + ba) @ b ) * so + bo)   -- single K block.
def _fused_mm_kernel(a_ref, b_ref, sa_ref, ba_ref, so_ref, bo_ref, o_ref,
                     *, in_relu, out_relu):
    a = a_ref[...].astype(jnp.float32) * sa_ref[...] + ba_ref[...]
    if in_relu:
        a = jnp.maximum(a, 0.0)
    acc = jnp.dot(a.astype(jnp.bfloat16), b_ref[...],
                  preferred_element_type=jnp.float32)
    acc = acc * so_ref[...] + bo_ref[...]
    if out_relu:
        acc = jnp.maximum(acc, 0.0)
    o_ref[...] = acc.astype(o_ref.dtype)


def fused_matmul(a, b, sa, ba, so, bo, *, in_relu, out_relu, split_m=1,
                 out_dtype=jnp.bfloat16):
    """a: [M, K]; b/sa/ba/so/bo are pre-padded & pre-cast (prepare_params)."""
    M, K = a.shape
    Kb, Nout = b.shape
    assert K == Kb and M % split_m == 0
    tm = M // split_m
    assert tm % 8 == 0
    return pl.pallas_call(
        functools.partial(_fused_mm_kernel, in_relu=in_relu, out_relu=out_relu),
        out_shape=jax.ShapeDtypeStruct((M, Nout), out_dtype),
        grid_spec=pltpu.PrefetchScalarGridSpec(
            num_scalar_prefetch=0,
            grid=(split_m,),
            in_specs=[pl.BlockSpec((tm, K), lambda i: (i, 0)),
                      pl.BlockSpec((K, Nout), lambda i: (0, 0)),
                      pl.BlockSpec((1, K), lambda i: (0, 0)),
                      pl.BlockSpec((1, K), lambda i: (0, 0)),
                      pl.BlockSpec((1, Nout), lambda i: (0, 0)),
                      pl.BlockSpec((1, Nout), lambda i: (0, 0))],
            out_specs=pl.BlockSpec((tm, Nout), lambda i: (i, 0))),
        compiler_params=_cparams("parallel"),
    )(a, b, sa, ba, so, bo)


# --------------------------------------------------- stem conv via im2col ---
# TODO(synk): a direct Pallas 7x7 kernel would drop the 49x im2col duplication,
# but with Cin=3 each tap would waste >97% of the MXU K lanes, so im2col
# (K=147, one small copy once per forward) is kept for this single layer.
def conv0_stem(x, p):
    N, H, W, Cin = x.shape
    KH = KW = 7
    stride, pad = 2, 3
    OH = (H + 2 * pad - KH) // stride + 1
    OW = (W + 2 * pad - KW) // stride + 1
    x_p = jnp.pad(x, ((0, 0), (pad, pad), (pad, pad), (0, 0)))
    cols = [x_p[:, kh:kh + stride * OH:stride, kw:kw + stride * OW:stride, :]
            for kh in range(KH) for kw in range(KW)]
    patches = jnp.concatenate(cols, axis=-1).reshape(N * OH * OW, KH * KW * Cin)
    out = fused_matmul(patches, p["w0"], p["id_s0"], p["id_b0"],
                       p["s0"], p["b0"], in_relu=False, out_relu=True,
                       split_m=2)                      # 2-way M split: stem only
    return out.reshape(N, OH, OW, -1)                  # [N, 16, 16, 128] bf16


# ---------------------------------------------------- fused dense layer -----
# One kernel per DenseNet layer: BN1+ReLU -> 1x1 conv -> BN2+ReLU -> 3x3 conv
# -> concat.  The bottleneck never leaves VMEM; concat is a plain add because
# the 3x3 weight columns were pre-shifted to this layer's channel offset and
# the feature map's padded-channel tail is maintained at exactly zero.
def _dense_layer_kernel(feat_ref, s1_ref, b1_ref, w1_ref, s2_ref, b2_ref,
                        w2_ref, o_ref, zpad_ref, *, H, W, WOFF):
    N = feat_ref.shape[0]
    C = feat_ref.shape[-1]
    M = N * H * W

    feat = feat_ref[...].reshape(M, C).astype(jnp.float32)
    y = jnp.maximum(feat * s1_ref[...] + b1_ref[...], 0.0)
    z = jnp.dot(y.astype(jnp.bfloat16), w1_ref[...],
                preferred_element_type=jnp.float32)
    z = jnp.maximum(z * s2_ref[...] + b2_ref[...], 0.0)     # [M, 128] bottleneck

    # Zero-padded copy of the bottleneck in VMEM for the 3x3 taps; the store
    # uses a sublane-aligned column offset (WOFF), only the tap loads are
    # offset by +/-1.
    zpad_ref[...] = jnp.zeros(zpad_ref.shape, zpad_ref.dtype)
    zpad_ref[:, 1:1 + H, WOFF:WOFF + W, :] = z.reshape(N, H, W, C)

    # 3x3 / stride-1 / pad-1 conv: 9 in-register tap matmuls, f32 accumulation.
    # TODO(synk): packing the 9 taps along K (one [M, 9*Cin] operand) would cut
    # MXU pushes ~4.5x; kept as tap matmuls since the whole layer is already a
    # single VMEM-resident kernel and 16-lane-wide lane concat is fragile.
    acc = jnp.zeros((M, C), jnp.float32)
    for kh in range(3):
        for kw in range(3):
            t = zpad_ref[:, kh:kh + H, WOFF - 1 + kw:WOFF - 1 + kw + W, :]
            t = t.reshape(M, C).astype(jnp.bfloat16)
            acc = acc + jnp.dot(t, w2_ref[kh * 3 + kw],
                                preferred_element_type=jnp.float32)

    o_ref[...] = (feat + acc).reshape(N, H, W, C).astype(o_ref.dtype)


def dense_layer(h, lp):
    N, H, W, C = h.shape
    WOFF = 8
    return pl.pallas_call(
        functools.partial(_dense_layer_kernel, H=H, W=W, WOFF=WOFF),
        out_shape=jax.ShapeDtypeStruct((N, H, W, C), h.dtype),
        grid_spec=pltpu.PrefetchScalarGridSpec(
            num_scalar_prefetch=0,
            grid=(1,),
            in_specs=[pl.BlockSpec((N, H, W, C), lambda i: (0, 0, 0, 0)),
                      pl.BlockSpec((1, C), lambda i: (0, 0)),
                      pl.BlockSpec((1, C), lambda i: (0, 0)),
                      pl.BlockSpec((C, C), lambda i: (0, 0)),
                      pl.BlockSpec((1, C), lambda i: (0, 0)),
                      pl.BlockSpec((1, C), lambda i: (0, 0)),
                      pl.BlockSpec((9, C, C), lambda i: (0, 0, 0))],
            out_specs=pl.BlockSpec((N, H, W, C), lambda i: (0, 0, 0, 0)),
            scratch_shapes=[pltpu.VMEM((N, H + 2, W + 2 * WOFF, C),
                                       jnp.float32)]),
        input_output_aliases={0: 0},           # update the feature map in place
        compiler_params=_cparams("arbitrary"),
    )(h, lp["s1"], lp["b1"], lp["w1"], lp["s2"], lp["b2"], lp["w2"])


# ------------------------------------------------------------ pooling -------
# Stride-2 is folded into the kernels: a free wrapper reshape merges column
# pairs into the lane dim (lane-dense, 256 lanes), row pairs are split with a
# free major-dim reshape inside the kernel.  Whole batch per grid step.
def _maxpool_kernel(x_ref, o_ref, *, OH, OW, C):
    N = x_ref.shape[0]
    a = x_ref[:, :, 0:OW, 0:C]            # padded cols 2*ow
    b = x_ref[:, :, 0:OW, C:2 * C]        # padded cols 2*ow+1
    c = x_ref[:, :, 1:OW + 1, 0:C]        # padded cols 2*ow+2
    colmax = jnp.maximum(jnp.maximum(a, b), c)          # [N, Hp, OW, C]
    r = None
    for kh in range(3):
        u = colmax[:, kh:kh + 2 * OH, :, :].reshape(N, OH, 2, OW, C)[:, :, 0]
        r = u if r is None else jnp.maximum(r, u)
    o_ref[...] = r


def maxpool_3x3_s2_p1(h):
    N, H, W, C = h.shape
    OH, OW = H // 2, W // 2
    x_p = jnp.pad(h, ((0, 0), (1, 1), (1, 1), (0, 0)),
                  constant_values=-jnp.inf)
    x_r = x_p.reshape(N, H + 2, (W + 2) // 2, 2 * C)     # free reshape
    return pl.pallas_call(
        functools.partial(_maxpool_kernel, OH=OH, OW=OW, C=C),
        out_shape=jax.ShapeDtypeStruct((N, OH, OW, C), h.dtype),
        grid_spec=pltpu.PrefetchScalarGridSpec(
            num_scalar_prefetch=0,
            grid=(1,),
            in_specs=[pl.BlockSpec((N, H + 2, (W + 2) // 2, 2 * C),
                                   lambda i: (0, 0, 0, 0))],
            out_specs=pl.BlockSpec((N, OH, OW, C), lambda i: (0, 0, 0, 0))),
        compiler_params=_cparams("arbitrary"),
    )(x_r)


def _avgpool_kernel(x_ref, o_ref, *, OH, OW, C):
    N = x_ref.shape[0]
    s = (x_ref[:, :, :, 0:C].astype(jnp.float32)
         + x_ref[:, :, :, C:2 * C].astype(jnp.float32))   # [N, 2*OH, OW, C]
    t = s.reshape(N, OH, 2, OW, C)
    o_ref[...] = ((t[:, :, 0] + t[:, :, 1]) * 0.25).astype(o_ref.dtype)


def avgpool_2x2_s2(h):
    N, H, W, C = h.shape
    OH, OW = H // 2, W // 2
    x_r = h.reshape(N, H, W // 2, 2 * C)                  # free reshape
    return pl.pallas_call(
        functools.partial(_avgpool_kernel, OH=OH, OW=OW, C=C),
        out_shape=jax.ShapeDtypeStruct((N, OH, OW, C), h.dtype),
        grid_spec=pltpu.PrefetchScalarGridSpec(
            num_scalar_prefetch=0,
            grid=(1,),
            in_specs=[pl.BlockSpec((N, H, W // 2, 2 * C),
                                   lambda i: (0, 0, 0, 0))],
            out_specs=pl.BlockSpec((N, OH, OW, C), lambda i: (0, 0, 0, 0))),
        compiler_params=_cparams("arbitrary"),
    )(x_r)


# ---------------------------- fused norm5 + ReLU + GAP + classifier head ----
def _head_kernel(x_ref, s_ref, b_ref, w_ref, bias_ref, o_ref):
    y = jnp.maximum(x_ref[...].astype(jnp.float32) * s_ref[...] + b_ref[...],
                    0.0)                                   # [N, HW, C]
    pooled = jnp.sum(y, axis=1)                            # 1/HW folded into w
    o_ref[...] = (jnp.dot(pooled.astype(jnp.bfloat16), w_ref[...],
                          preferred_element_type=jnp.float32) + bias_ref[...])


def head(h, p, num_classes):
    N, H, W, C = h.shape
    x_r = h.reshape(N, H * W, C)
    out = pl.pallas_call(
        _head_kernel,
        out_shape=jax.ShapeDtypeStruct((N, C), jnp.float32),
        grid_spec=pltpu.PrefetchScalarGridSpec(
            num_scalar_prefetch=0,
            grid=(1,),
            in_specs=[pl.BlockSpec((N, H * W, C), lambda i: (0, 0, 0)),
                      pl.BlockSpec((1, 1, C), lambda i: (0, 0, 0)),
                      pl.BlockSpec((1, 1, C), lambda i: (0, 0, 0)),
                      pl.BlockSpec((C, C), lambda i: (0, 0)),
                      pl.BlockSpec((1, C), lambda i: (0, 0))],
            out_specs=pl.BlockSpec((N, C), lambda i: (0, 0))),
        compiler_params=_cparams("arbitrary"),
    )(x_r, p["s5"], p["b5"], p["cls_w"], p["cls_b"])
    return out[:, :num_classes]


# --------------------------------------------------------------- DenseNet ---
def transition(h, p):
    N, H, W, C = h.shape
    z = fused_matmul(h.reshape(N * H * W, C), p["t_w"], p["t_s"], p["t_b"],
                     p["id_so"], p["id_bo"], in_relu=True, out_relu=False,
                     split_m=1)
    return avgpool_2x2_s2(z.reshape(N, H, W, C))


def densenet_forward(x_nchw, p, *, num_classes):
    x = jnp.transpose(x_nchw, (0, 2, 3, 1)).astype(jnp.float32)  # NCHW -> NHWC
    h = conv0_stem(x, p)                      # conv0 + BN0 + ReLU   [N,16,16,128]
    h = maxpool_3x3_s2_p1(h)                  #                      [N, 8, 8,128]
    for lp in p["block1"]:
        h = dense_layer(h, lp)
    h = transition(h, p)                      #                      [N, 4, 4,128]
    for lp in p["block2"]:
        h = dense_layer(h, lp)
    return head(h, p, num_classes)            # norm5+ReLU+GAP+Linear


# ------------------------------------------------------ parameter creation --
def _bn_params(key, c, eps=1e-5):
    k1, k2, k3, k4 = jax.random.split(key, 4)
    gamma = 1.0 + 0.1 * jax.random.normal(k1, (c,), jnp.float32)
    beta = 0.1 * jax.random.normal(k2, (c,), jnp.float32)
    mean = 0.1 * jax.random.normal(k3, (c,), jnp.float32)
    var = 0.5 + jax.random.uniform(k4, (c,), jnp.float32)
    scale = gamma / jnp.sqrt(var + eps)
    bias = beta - mean * scale
    return scale, bias


def _conv_w(key, kh, kw, cin, cout):
    fan_in = kh * kw * cin
    return (jax.random.normal(key, (kh, kw, cin, cout), jnp.float32)
            * (2.0 / fan_in) ** 0.5)


def init_params(key, *, num_init=16, growth=8, bn_size=2,
                block_config=(2, 2), num_classes=10):
    keys = iter(jax.random.split(key, 128))

    def make_layer(c_in):
        return {
            "n1": _bn_params(next(keys), c_in),
            "w1": _conv_w(next(keys), 1, 1, c_in, bn_size * growth),
            "n2": _bn_params(next(keys), bn_size * growth),
            "w2": _conv_w(next(keys), 3, 3, bn_size * growth, growth),
        }

    p = {"conv0": _conv_w(next(keys), 7, 7, 3, num_init),
         "n0": _bn_params(next(keys), num_init)}
    c = num_init
    block1 = []
    for _ in range(block_config[0]):
        block1.append(make_layer(c))
        c += growth
    p["block1"] = block1
    p["trans1"] = {"n": _bn_params(next(keys), c),
                   "w": _conv_w(next(keys), 1, 1, c, c // 2)}
    c = c // 2
    block2 = []
    for _ in range(block_config[1]):
        block2.append(make_layer(c))
        c += growth
    p["block2"] = block2
    p["n5"] = _bn_params(next(keys), c)
    p["cls_w"] = 0.1 * jax.random.normal(next(keys), (c, num_classes),
                                         jnp.float32)
    p["cls_b"] = 0.1 * jax.random.normal(next(keys), (num_classes,),
                                         jnp.float32)
    return p


if __name__ == "__main__":
    root = jax.random.PRNGKey(0)
    k_in, k_param = jax.random.split(root)
    num_classes = 10
    params = init_params(k_param, num_classes=num_classes)
    x = jax.random.normal(k_in, (2, 3, 32, 32), dtype=jnp.float32)  # NCHW

    # 32x32 -> conv0 /2 -> pool0 /2 -> transition /2  => 4x4 feature map.
    final_hw = (x.shape[2] // 8) * (x.shape[3] // 8)
    prep = prepare_params(params, final_hw=final_hw)   # runs once, outside jit

    fwd = jax.jit(functools.partial(densenet_forward, num_classes=num_classes))
    logits = jax.block_until_ready(fwd(x, prep))

    assert logits.shape == (2, num_classes), logits.shape
    assert bool(jnp.all(jnp.isfinite(logits)))
    print("KERNEL_OK")
</pallas_src>

<mosaic_0001>
module attributes {stable_mosaic.version = 11 : i64} {
  func.func @_fused_mm_kernel(%arg0: i32, %arg1: memref<256x147xf32, #tpu.memory_space<vmem>>, %arg2: memref<147x128xbf16, #tpu.memory_space<vmem>>, %arg3: memref<1x147xf32, #tpu.memory_space<vmem>>, %arg4: memref<1x147xf32, #tpu.memory_space<vmem>>, %arg5: memref<1x128xf32, #tpu.memory_space<vmem>>, %arg6: memref<1x128xf32, #tpu.memory_space<vmem>>, %arg7: memref<256x128xbf16, #tpu.memory_space<vmem>>) attributes {dimension_semantics = [#tpu.dimension_semantics<parallel>], iteration_bounds = array<i64: 2>, scalar_prefetch = 0 : i64, scratch_operands = 0 : i64, tpu.core_type = #tpu.core_type<tc>, window_params = [{transform_indices = @transform_0, window_bounds = array<i64: 256, 147>}, {pipeline_mode = #tpu.pipeline_mode<synchronous>, transform_indices = @transform_1, window_bounds = array<i64: 147, 128>}, {pipeline_mode = #tpu.pipeline_mode<synchronous>, transform_indices = @transform_2, window_bounds = array<i64: 1, 147>}, {pipeline_mode = #tpu.pipeline_mode<synchronous>, transform_indices = @transform_3, window_bounds = array<i64: 1, 147>}, {pipeline_mode = #tpu.pipeline_mode<synchronous>, transform_indices = @transform_4, window_bounds = array<i64: 1, 128>}, {pipeline_mode = #tpu.pipeline_mode<synchronous>, transform_indices = @transform_5, window_bounds = array<i64: 1, 128>}, {transform_indices = @transform_6, window_bounds = array<i64: 256, 128>}]} {
    %c0 = arith.constant 0 : index
    %c0_0 = arith.constant 0 : index
    %0 = vector.load %arg1[%c0, %c0_0] : memref<256x147xf32, #tpu.memory_space<vmem>>, vector<256x147xf32>
    %c0_1 = arith.constant 0 : index
    %c0_2 = arith.constant 0 : index
    %1 = vector.load %arg3[%c0_1, %c0_2] : memref<1x147xf32, #tpu.memory_space<vmem>>, vector<1x147xf32>
    %2 = vector.broadcast %1 : vector<1x147xf32> to vector<256x147xf32>
    %3 = arith.mulf %0, %2 : vector<256x147xf32>
    %c0_3 = arith.constant 0 : index
    %c0_4 = arith.constant 0 : index
    %4 = vector.load %arg4[%c0_3, %c0_4] : memref<1x147xf32, #tpu.memory_space<vmem>>, vector<1x147xf32>
    %5 = vector.broadcast %4 : vector<1x147xf32> to vector<256x147xf32>
    %6 = arith.addf %3, %5 : vector<256x147xf32>
    %7 = arith.truncf %6 : vector<256x147xf32> to vector<256x147xbf16>
    %c0_5 = arith.constant 0 : index
    %c0_6 = arith.constant 0 : index
    %8 = vector.load %arg2[%c0_5, %c0_6] : memref<147x128xbf16, #tpu.memory_space<vmem>>, vector<147x128xbf16>
    %cst = arith.constant dense<0.000000e+00> : vector<256x128xf32>
    %9 = tpu.matmul %7, %8, %cst {dimension_numbers = #tpu.dot_dimension_numbers<[1], [0], [0], [1], [0, 0, 1, 1], [], []>} : vector<256x147xbf16>, vector<147x128xbf16>, vector<256x128xf32> -> vector<256x128xf32>
    %c0_7 = arith.constant 0 : index
    %c0_8 = arith.constant 0 : index
    %10 = vector.load %arg5[%c0_7, %c0_8] : memref<1x128xf32, #tpu.memory_space<vmem>>, vector<1x128xf32>
    %11 = vector.broadcast %10 : vector<1x128xf32> to vector<256x128xf32>
    %12 = arith.mulf %9, %11 : vector<256x128xf32>
    %c0_9 = arith.constant 0 : index
    %c0_10 = arith.constant 0 : index
    %13 = vector.load %arg6[%c0_9, %c0_10] : memref<1x128xf32, #tpu.memory_space<vmem>>, vector<1x128xf32>
    %14 = vector.broadcast %13 : vector<1x128xf32> to vector<256x128xf32>
    %15 = arith.addf %12, %14 : vector<256x128xf32>
    %cst_11 = arith.constant 0.000000e+00 : f32
    %16 = vector.broadcast %cst_11 : f32 to vector<256x128xf32>
    %17 = arith.maximumf %15, %16 : vector<256x128xf32>
    %18 = arith.truncf %17 : vector<256x128xf32> to vector<256x128xbf16>
    %c0_12 = arith.constant 0 : index
    %c0_13 = arith.constant 0 : index
    %19 = vector.load %arg7[%c0_12, %c0_13] : memref<256x128xbf16, #tpu.memory_space<vmem>>, vector<256x128xbf16>
    tpu.vector_store %arg7[%c0_12, %c0_13], %18 {strides = array<i32>} : memref<256x128xbf16, #tpu.memory_space<vmem>>, vector<256x128xbf16>,
    return
  }
  func.func @transform_0(%arg0: i32) -> (i32, i32) {
    %c0_i32 = arith.constant 0 : i32
    %c0_i32_0 = arith.constant 0 : i32
    return %arg0, %c0_i32 : i32, i32
  }
  func.func @transform_1(%arg0: i32) -> (i32, i32) {
    %c0_i32 = arith.constant 0 : i32
    %c0_i32_0 = arith.constant 0 : i32
    %c0_i32_1 = arith.constant 0 : i32
    return %c0_i32, %c0_i32_0 : i32, i32
  }
  func.func @transform_2(%arg0: i32) -> (i32, i32) {
    %c0_i32 = arith.constant 0 : i32
    %c0_i32_0 = arith.constant 0 : i32
    %c0_i32_1 = arith.constant 0 : i32
    return %c0_i32, %c0_i32_0 : i32, i32
  }
  func.func @transform_3(%arg0: i32) -> (i32, i32) {
    %c0_i32 = arith.constant 0 : i32
    %c0_i32_0 = arith.constant 0 : i32
    %c0_i32_1 = arith.constant 0 : i32
    return %c0_i32, %c0_i32_0 : i32, i32
  }
  func.func @transform_4(%arg0: i32) -> (i32, i32) {
    %c0_i32 = arith.constant 0 : i32
    %c0_i32_0 = arith.constant 0 : i32
    %c0_i32_1 = arith.constant 0 : i32
    return %c0_i32, %c0_i32_0 : i32, i32
  }
  func.func @transform_5(%arg0: i32) -> (i32, i32) {
    %c0_i32 = arith.constant 0 : i32
    %c0_i32_0 = arith.constant 0 : i32
    %c0_i32_1 = arith.constant 0 : i32
    return %c0_i32, %c0_i32_0 : i32, i32
  }
  func.func @transform_6(%arg0: i32) -> (i32, i32) {
    %c0_i32 = arith.constant 0 : i32
    %c0_i32_0 = arith.constant 0 : i32
    return %arg0, %c0_i32 : i32, i32
  }
}

module attributes {stable_mosaic.version = 11 : i64} {
  func.func @_maxpool_kernel(%arg0: i32, %arg1: memref<2x18x9x256xbf16, #tpu.memory_space<vmem>>, %arg2: memref<2x8x8x128xbf16, #tpu.memory_space<vmem>>) attributes {dimension_semantics = [#tpu.dimension_semantics<arbitrary>], iteration_bounds = array<i64: 1>, scalar_prefetch = 0 : i64, scratch_operands = 0 : i64, tpu.core_type = #tpu.core_type<tc>, window_params = [{pipeline_mode = #tpu.pipeline_mode<synchronous>, transform_indices = @transform_0, window_bounds = array<i64: 2, 18, 9, 256>}, {pipeline_mode = #tpu.pipeline_mode<synchronous>, transform_indices = @transform_1, window_bounds = array<i64: 2, 8, 8, 128>}]} {
    %c0 = arith.constant 0 : index
    %c0_0 = arith.constant 0 : index
    %c0_1 = arith.constant 0 : index
    %c0_2 = arith.constant 0 : index
    %0 = vector.load %arg1[%c0, %c0_0, %c0_1, %c0_2] : memref<2x18x9x256xbf16, #tpu.memory_space<vmem>>, vector<2x18x8x128xbf16>
    %c0_3 = arith.constant 0 : index
    %c0_4 = arith.constant 0 : index
    %c0_5 = arith.constant 0 : index
    %c128 = arith.constant 128 : index
    %1 = vector.load %arg1[%c0_3, %c0_4, %c0_5, %c128] : memref<2x18x9x256xbf16, #tpu.memory_space<vmem>>, vector<2x18x8x128xbf16>
    %c0_6 = arith.constant 0 : index
    %c0_7 = arith.constant 0 : index
    %c1 = arith.constant 1 : index
    %c0_8 = arith.constant 0 : index
    %2 = vector.load %arg1[%c0_6, %c0_7, %c1, %c0_8] : memref<2x18x9x256xbf16, #tpu.memory_space<vmem>>, vector<2x18x8x128xbf16>
    %3 = arith.maximumf %0, %1 : vector<2x18x8x128xbf16>
    %4 = arith.maximumf %3, %2 : vector<2x18x8x128xbf16>
    %5 = vector.extract_strided_slice %4 {offsets = [0, 0, 0, 0], sizes = [2, 16, 8, 128], strides = [1, 1, 1, 1]} : vector<2x18x8x128xbf16> to vector<2x16x8x128xbf16>
    %6 = vector.shape_cast %5 : vector<2x16x8x128xbf16> to vector<2x8x2x8x128xbf16>
    %7 = vector.extract_strided_slice %6 {offsets = [0, 0, 0, 0, 0], sizes = [2, 8, 1, 8, 128], strides = [1, 1, 1, 1, 1]} : vector<2x8x2x8x128xbf16> to vector<2x8x1x8x128xbf16>
    %8 = vector.shape_cast %7 : vector<2x8x1x8x128xbf16> to vector<2x8x8x128xbf16>
    %9 = vector.extract_strided_slice %4 {offsets = [0, 1, 0, 0], sizes = [2, 16, 8, 128], strides = [1, 1, 1, 1]} : vector<2x18x8x128xbf16> to vector<2x16x8x128xbf16>
    %10 = vector.shape_cast %9 : vector<2x16x8x128xbf16> to vector<2x8x2x8x128xbf16>
    %11 = vector.extract_strided_slice %10 {offsets = [0, 0, 0, 0, 0], sizes = [2, 8, 1, 8, 128], strides = [1, 1, 1, 1, 1]} : vector<2x8x2x8x128xbf16> to vector<2x8x1x8x128xbf16>
    %12 = vector.shape_cast %11 : vector<2x8x1x8x128xbf16> to vector<2x8x8x128xbf16>
    %13 = arith.maximumf %8, %12 : vector<2x8x8x128xbf16>
    %14 = vector.extract_strided_slice %4 {offsets = [0, 2, 0, 0], sizes = [2, 16, 8, 128], strides = [1, 1, 1, 1]} : vector<2x18x8x128xbf16> to vector<2x16x8x128xbf16>
    %15 = vector.shape_cast %14 : vector<2x16x8x128xbf16> to vector<2x8x2x8x128xbf16>
    %16 = vector.extract_strided_slice %15 {offsets = [0, 0, 0, 0, 0], sizes = [2, 8, 1, 8, 128], strides = [1, 1, 1, 1, 1]} : vector<2x8x2x8x128xbf16> to vector<2x8x1x8x128xbf16>
    %17 = vector.shape_cast %16 : vector<2x8x1x8x128xbf16> to vector<2x8x8x128xbf16>
    %18 = arith.maximumf %13, %17 : vector<2x8x8x128xbf16>
    %c0_9 = arith.constant 0 : index
    %c0_10 = arith.constant 0 : index
    %c0_11 = arith.constant 0 : index
    %c0_12 = arith.constant 0 : index
    %19 = vector.load %arg2[%c0_9, %c0_10, %c0_11, %c0_12] : memref<2x8x8x128xbf16, #tpu.memory_space<vmem>>, vector<2x8x8x128xbf16>
    tpu.vector_store %arg2[%c0_9, %c0_10, %c0_11, %c0_12], %18 {strides = array<i32>} : memref<2x8x8x128xbf16, #tpu.memory_space<vmem>>, vector<2x8x8x128xbf16>,
    return
  }
  func.func @transform_0(%arg0: i32) -> (i32, i32, i32, i32) {
    %c0_i32 = arith.constant 0 : i32
    %c0_i32_0 = arith.constant 0 : i32
    %c0_i32_1 = arith.constant 0 : i32
    %c0_i32_2 = arith.constant 0 : i32
    %c0_i32_3 = arith.constant 0 : i32
    return %c0_i32, %c0_i32_0, %c0_i32_1, %c0_i32_2 : i32, i32, i32, i32
  }
  func.func @transform_1(%arg0: i32) -> (i32, i32, i32, i32) {
    %c0_i32 = arith.constant 0 : i32
    %c0_i32_0 = arith.constant 0 : i32
    %c0_i32_1 = arith.constant 0 : i32
    %c0_i32_2 = arith.constant 0 : i32
    %c0_i32_3 = arith.constant 0 : i32
    return %c0_i32, %c0_i32_0, %c0_i32_1, %c0_i32_2 : i32, i32, i32, i32
  }
}

module attributes {stable_mosaic.version = 11 : i64} {
  func.func @_dense_layer_kernel(%arg0: i32, %arg1: memref<2x8x8x128xbf16, #tpu.memory_space<vmem>>, %arg2: memref<1x128xf32, #tpu.memory_space<vmem>>, %arg3: memref<1x128xf32, #tpu.memory_space<vmem>>, %arg4: memref<128x128xbf16, #tpu.memory_space<vmem>>, %arg5: memref<1x128xf32, #tpu.memory_space<vmem>>, %arg6: memref<1x128xf32, #tpu.memory_space<vmem>>, %arg7: memref<9x128x128xbf16, #tpu.memory_space<vmem>>, %arg8: memref<2x8x8x128xbf16, #tpu.memory_space<vmem>>, %arg9: memref<2x10x24x128xf32, #tpu.memory_space<vmem>>) attributes {dimension_semantics = [#tpu.dimension_semantics<arbitrary>], iteration_bounds = array<i64: 1>, scalar_prefetch = 0 : i64, scratch_operands = 1 : i64, tpu.core_type = #tpu.core_type<tc>, window_params = [{pipeline_mode = #tpu.pipeline_mode<synchronous>, transform_indices = @transform_0, window_bounds = array<i64: 2, 8, 8, 128>}, {pipeline_mode = #tpu.pipeline_mode<synchronous>, transform_indices = @transform_1, window_bounds = array<i64: 1, 128>}, {pipeline_mode = #tpu.pipeline_mode<synchronous>, transform_indices = @transform_2, window_bounds = array<i64: 1, 128>}, {pipeline_mode = #tpu.pipeline_mode<synchronous>, transform_indices = @transform_3, window_bounds = array<i64: 128, 128>}, {pipeline_mode = #tpu.pipeline_mode<synchronous>, transform_indices = @transform_4, window_bounds = array<i64: 1, 128>}, {pipeline_mode = #tpu.pipeline_mode<synchronous>, transform_indices = @transform_5, window_bounds = array<i64: 1, 128>}, {pipeline_mode = #tpu.pipeline_mode<synchronous>, transform_indices = @transform_6, window_bounds = array<i64: 9, 128, 128>}, {pipeline_mode = #tpu.pipeline_mode<synchronous>, transform_indices = @transform_7, window_bounds = array<i64: 2, 8, 8, 128>}]} {
    %c0 = arith.constant 0 : index
    %c0_0 = arith.constant 0 : index
    %c0_1 = arith.constant 0 : index
    %c0_2 = arith.constant 0 : index
    %0 = vector.load %arg1[%c0, %c0_0, %c0_1, %c0_2] : memref<2x8x8x128xbf16, #tpu.memory_space<vmem>>, vector<2x8x8x128xbf16>
    %1 = vector.shape_cast %0 : vector<2x8x8x128xbf16> to vector<128x128xbf16>
    %2 = arith.extf %1 : vector<128x128xbf16> to vector<128x128xf32>
    %c0_3 = arith.constant 0 : index
    %c0_4 = arith.constant 0 : index
    %3 = vector.load %arg2[%c0_3, %c0_4] : memref<1x128xf32, #tpu.memory_space<vmem>>, vector<1x128xf32>
    %4 = vector.broadcast %3 : vector<1x128xf32> to vector<128x128xf32>
    %5 = arith.mulf %2, %4 : vector<128x128xf32>
    %c0_5 = arith.constant 0 : index
    %c0_6 = arith.constant 0 : index
    %6 = vector.load %arg3[%c0_5, %c0_6] : memref<1x128xf32, #tpu.memory_space<vmem>>, vector<1x128xf32>
    %7 = vector.broadcast %6 : vector<1x128xf32> to vector<128x128xf32>
    %8 = arith.addf %5, %7 : vector<128x128xf32>
    %cst = arith.constant 0.000000e+00 : f32
    %9 = vector.broadcast %cst : f32 to vector<128x128xf32>
    %10 = arith.maximumf %8, %9 : vector<128x128xf32>
    %11 = arith.truncf %10 : vector<128x128xf32> to vector<128x128xbf16>
    %c0_7 = arith.constant 0 : index
    %c0_8 = arith.constant 0 : index
    %12 = vector.load %arg4[%c0_7, %c0_8] : memref<128x128xbf16, #tpu.memory_space<vmem>>, vector<128x128xbf16>
    %cst_9 = arith.constant dense<0.000000e+00> : vector<128x128xf32>
    %13 = tpu.matmul %11, %12, %cst_9 {dimension_numbers = #tpu.dot_dimension_numbers<[1], [0], [0], [1], [0, 0, 1, 1], [], []>} : vector<128x128xbf16>, vector<128x128xbf16>, vector<128x128xf32> -> vector<128x128xf32>
    %c0_10 = arith.constant 0 : index
    %c0_11 = arith.constant 0 : index
    %14 = vector.load %arg5[%c0_10, %c0_11] : memref<1x128xf32, #tpu.memory_space<vmem>>, vector<1x128xf32>
    %15 = vector.broadcast %14 : vector<1x128xf32> to vector<128x128xf32>
    %16 = arith.mulf %13, %15 : vector<128x128xf32>
    %c0_12 = arith.constant 0 : index
    %c0_13 = arith.constant 0 : index
    %17 = vector.load %arg6[%c0_12, %c0_13] : memref<1x128xf32, #tpu.memory_space<vmem>>, vector<1x128xf32>
    %18 = vector.broadcast %17 : vector<1x128xf32> to vector<128x128xf32>
    %19 = arith.addf %16, %18 : vector<128x128xf32>
    %cst_14 = arith.constant 0.000000e+00 : f32
    %20 = vector.broadcast %cst_14 : f32 to vector<128x128xf32>
    %21 = arith.maximumf %19, %20 : vector<128x128xf32>
    %cst_15 = arith.constant 0.000000e+00 : f32
    %22 = vector.broadcast %cst_15 : f32 to vector<2x10x24x128xf32>
    %c0_16 = arith.constant 0 : index
    %c0_17 = arith.constant 0 : index
    %c0_18 = arith.constant 0 : index
    %c0_19 = arith.constant 0 : index
    %23 = vector.load %arg9[%c0_16, %c0_17, %c0_18, %c0_19] : memref<2x10x24x128xf32, #tpu.memory_space<vmem>>, vector<2x10x24x128xf32>
    tpu.vector_store %arg9[%c0_16, %c0_17, %c0_18, %c0_19], %22 {strides = array<i32>} : memref<2x10x24x128xf32, #tpu.memory_space<vmem>>, vector<2x10x24x128xf32>,
    %24 = vector.shape_cast %21 : vector<128x128xf32> to vector<2x8x8x128xf32>
    %c0_20 = arith.constant 0 : index
    %c1 = arith.constant 1 : index
    %c8 = arith.constant 8 : index
    %c0_21 = arith.constant 0 : index
    %25 = vector.load %arg9[%c0_20, %c1, %c8, %c0_21] : memref<2x10x24x128xf32, #tpu.memory_space<vmem>>, vector<2x8x8x128xf32>
    tpu.vector_store %arg9[%c0_20, %c1, %c8, %c0_21], %24 {strides = array<i32>} : memref<2x10x24x128xf32, #tpu.memory_space<vmem>>, vector<2x8x8x128xf32>,
    %cst_22 = arith.constant 0.000000e+00 : f32
    %26 = vector.broadcast %cst_22 : f32 to vector<128x128xf32>
    %c0_23 = arith.constant 0 : index
    %c0_24 = arith.constant 0 : index
    %c7 = arith.constant 7 : index
    %c0_25 = arith.constant 0 : index
    %27 = vector.load %arg9[%c0_23, %c0_24, %c7, %c0_25] : memref<2x10x24x128xf32, #tpu.memory_space<vmem>>, vector<2x8x8x128xf32>
    %28 = vector.shape_cast %27 : vector<2x8x8x128xf32> to vector<128x128xf32>
    %29 = arith.truncf %28 : vector<128x128xf32> to vector<128x128xbf16>
    %c0_26 = arith.constant 0 : index
    %c0_27 = arith.constant 0 : index
    %c0_28 = arith.constant 0 : index
    %30 = vector.load %arg7[%c0_26, %c0_27, %c0_28] : memref<9x128x128xbf16, #tpu.memory_space<vmem>>, vector<1x128x128xbf16>
    %31 = vector.shape_cast %30 : vector<1x128x128xbf16> to vector<128x128xbf16>
    %cst_29 = arith.constant dense<0.000000e+00> : vector<128x128xf32>
    %32 = tpu.matmul %29, %31, %cst_29 {dimension_numbers = #tpu.dot_dimension_numbers<[1], [0], [0], [1], [0, 0, 1, 1], [], []>} : vector<128x128xbf16>, vector<128x128xbf16>, vector<128x128xf32> -> vector<128x128xf32>
    %33 = arith.addf %26, %32 : vector<128x128xf32>
    %c0_30 = arith.constant 0 : index
    %c0_31 = arith.constant 0 : index
    %c8_32 = arith.constant 8 : index
    %c0_33 = arith.constant 0 : index
    %34 = vector.load %arg9[%c0_30, %c0_31, %c8_32, %c0_33] : memref<2x10x24x128xf32, #tpu.memory_space<vmem>>, vector<2x8x8x128xf32>
    %35 = vector.shape_cast %34 : vector<2x8x8x128xf32> to vector<128x128xf32>
    %36 = arith.truncf %35 : vector<128x128xf32> to vector<128x128xbf16>
    %c1_34 = arith.constant 1 : index
    %c0_35 = arith.constant 0 : index
    %c0_36 = arith.constant 0 : index
    %37 = vector.load %arg7[%c1_34, %c0_35, %c0_36] : memref<9x128x128xbf16, #tpu.memory_space<vmem>>, vector<1x128x128xbf16>
    %38 = vector.shape_cast %37 : vector<1x128x128xbf16> to vector<128x128xbf16>
    %cst_37 = arith.constant dense<0.000000e+00> : vector<128x128xf32>
    %39 = tpu.matmul %36, %38, %cst_37 {dimension_numbers = #tpu.dot_dimension_numbers<[1], [0], [0], [1], [0, 0, 1, 1], [], []>} : vector<128x128xbf16>, vector<128x128xbf16>, vector<128x128xf32> -> vector<128x128xf32>
    %40 = arith.addf %33, %39 : vector<128x128xf32>
    %c0_38 = arith.constant 0 : index
    %c0_39 = arith.constant 0 : index
    %c9 = arith.constant 9 : index
    %c0_40 = arith.constant 0 : index
    %41 = vector.load %arg9[%c0_38, %c0_39, %c9, %c0_40] : memref<2x10x24x128xf32, #tpu.memory_space<vmem>>, vector<2x8x8x128xf32>
    %42 = vector.shape_cast %41 : vector<2x8x8x128xf32> to vector<128x128xf32>
    %43 = arith.truncf %42 : vector<128x128xf32> to vector<128x128xbf16>
    %c2 = arith.constant 2 : index
    %c0_41 = arith.constant 0 : index
    %c0_42 = arith.constant 0 : index
    %44 = vector.load %arg7[%c2, %c0_41, %c0_42] : memref<9x128x128xbf16, #tpu.memory_space<vmem>>, vector<1x128x128xbf16>
    %45 = vector.shape_cast %44 : vector<1x128x128xbf16> to vector<128x128xbf16>
    %cst_43 = arith.constant dense<0.000000e+00> : vector<128x128xf32>
    %46 = tpu.matmul %43, %45, %cst_43 {dimension_numbers = #tpu.dot_dimension_numbers<[1], [0], [0], [1], [0, 0, 1, 1], [], []>} : vector<128x128xbf16>, vector<128x128xbf16>, vector<128x128xf32> -> vector<128x128xf32>
    %47 = arith.addf %40, %46 : vector<128x128xf32>
    %c0_44 = arith.constant 0 : index
    %c1_45 = arith.constant 1 : index
    %c7_46 = arith.constant 7 : index
    %c0_47 = arith.constant 0 : index
    %48 = vector.load %arg9[%c0_44, %c1_45, %c7_46, %c0_47] : memref<2x10x24x128xf32, #tpu.memory_space<vmem>>, vector<2x8x8x128xf32>
    %49 = vector.shape_cast %48 : vector<2x8x8x128xf32> to vector<128x128xf32>
    %50 = arith.truncf %49 : vector<128x128xf32> to vector<128x128xbf16>
    %c3 = arith.constant 3 : index
    %c0_48 = arith.constant 0 : index
    %c0_49 = arith.constant 0 : index
    %51 = vector.load %arg7[%c3, %c0_48, %c0_49] : memref<9x128x128xbf16, #tpu.memory_space<vmem>>, vector<1x128x128xbf16>
    %52 = vector.shape_cast %51 : vector<1x128x128xbf16> to vector<128x128xbf16>
    %cst_50 = arith.constant dense<0.000000e+00> : vector<128x128xf32>
    %53 = tpu.matmul %50, %52, %cst_50 {dimension_numbers = #tpu.dot_dimension_numbers<[1], [0], [0], [1], [0, 0, 1, 1], [], []>} : vector<128x128xbf16>, vector<128x128xbf16>, vector<128x128xf32> -> vector<128x128xf32>
    %54 = arith.addf %47, %53 : vector<128x128xf32>
    %c0_51 = arith.constant 0 : index
    %c1_52 = arith.constant 1 : index
    %c8_53 = arith.constant 8 : index
    %c0_54 = arith.constant 0 : index
    %55 = vector.load %arg9[%c0_51, %c1_52, %c8_53, %c0_54] : memref<2x10x24x128xf32, #tpu.memory_space<vmem>>, vector<2x8x8x128xf32>
    %56 = vector.shape_cast %55 : vector<2x8x8x128xf32> to vector<128x128xf32>
    %57 = arith.truncf %56 : vector<128x128xf32> to vector<128x128xbf16>
    %c4 = arith.constant 4 : index
    %c0_55 = arith.constant 0 : index
    %c0_56 = arith.constant 0 : index
    %58 = vector.load %arg7[%c4, %c0_55, %c0_56] : memref<9x128x128xbf16, #tpu.memory_space<vmem>>, vector<1x128x128xbf16>
    %59 = vector.shape_cast %58 : vector<1x128x128xbf16> to vector<128x128xbf16>
    %cst_57 = arith.constant dense<0.000000e+00> : vector<128x128xf32>
    %60 = tpu.matmul %57, %59, %cst_57 {dimension_numbers = #tpu.dot_dimension_numbers<[1], [0], [0], [1], [0, 0, 1, 1], [], []>} : vector<128x128xbf16>, vector<128x128xbf16>, vector<128x128xf32> -> vector<128x128xf32>
    %61 = arith.addf %54, %60 : vector<128x128xf32>
    %c0_58 = arith.constant 0 : index
    %c1_59 = arith.constant 1 : index
    %c9_60 = arith.constant 9 : index
    %c0_61 = arith.constant 0 : index
    %62 = vector.load %arg9[%c0_58, %c1_59, %c9_60, %c0_61] : memref<2x10x24x128xf32, #tpu.memory_space<vmem>>, vector<2x8x8x128xf32>
    %63 = vector.shape_cast %62 : vector<2x8x8x128xf32> to vector<128x128xf32>
    %64 = arith.truncf %63 : vector<128x128xf32> to vector<128x128xbf16>
    %c5 = arith.constant 5 : index
    %c0_62 = arith.constant 0 : index
    %c0_63 = arith.constant 0 : index
    %65 = vector.load %arg7[%c5, %c0_62, %c0_63] : memref<9x128x128xbf16, #tpu.memory_space<vmem>>, vector<1x128x128xbf16>
    %66 = vector.shape_cast %65 : vector<1x128x128xbf16> to vector<128x128xbf16>
    %cst_64 = arith.constant dense<0.000000e+00> : vector<128x128xf32>
    %67 = tpu.matmul %64, %66, %cst_64 {dimension_numbers = #tpu.dot_dimension_numbers<[1], [0], [0], [1], [0, 0, 1, 1], [], []>} : vector<128x128xbf16>, vector<128x128xbf16>, vector<128x128xf32> -> vector<128x128xf32>
    %68 = arith.addf %61, %67 : vector<128x128xf32>
    %c0_65 = arith.constant 0 : index
    %c2_66 = arith.constant 2 : index
    %c7_67 = arith.constant 7 : index
    %c0_68 = arith.constant 0 : index
    %69 = vector.load %arg9[%c0_65, %c2_66, %c7_67, %c0_68] : memref<2x10x24x128xf32, #tpu.memory_space<vmem>>, vector<2x8x8x128xf32>
    %70 = vector.shape_cast %69 : vector<2x8x8x128xf32> to vector<128x128xf32>
    %71 = arith.truncf %70 : vector<128x128xf32> to vector<128x128xbf16>
    %c6 = arith.constant 6 : index
    %c0_69 = arith.constant 0 : index
    %c0_70 = arith.constant 0 : index
    %72 = vector.load %arg7[%c6, %c0_69, %c0_70] : memref<9x128x128xbf16, #tpu.memory_space<vmem>>, vector<1x128x128xbf16>
    %73 = vector.shape_cast %72 : vector<1x128x128xbf16> to vector<128x128xbf16>
    %cst_71 = arith.constant dense<0.000000e+00> : vector<128x128xf32>
    %74 = tpu.matmul %71, %73, %cst_71 {dimension_numbers = #tpu.dot_dimension_numbers<[1], [0], [0], [1], [0, 0, 1, 1], [], []>} : vector<128x128xbf16>, vector<128x128xbf16>, vector<128x128xf32> -> vector<128x128xf32>
    %75 = arith.addf %68, %74 : vector<128x128xf32>
    %c0_72 = arith.constant 0 : index
    %c2_73 = arith.constant 2 : index
    %c8_74 = arith.constant 8 : index
    %c0_75 = arith.constant 0 : index
    %76 = vector.load %arg9[%c0_72, %c2_73, %c8_74, %c0_75] : memref<2x10x24x128xf32, #tpu.memory_space<vmem>>, vector<2x8x8x128xf32>
    %77 = vector.shape_cast %76 : vector<2x8x8x128xf32> to vector<128x128xf32>
    %78 = arith.truncf %77 : vector<128x128xf32> to vector<128x128xbf16>
    %c7_76 = arith.constant 7 : index
    %c0_77 = arith.constant 0 : index
    %c0_78 = arith.constant 0 : index
    %79 = vector.load %arg7[%c7_76, %c0_77, %c0_78] : memref<9x128x128xbf16, #tpu.memory_space<vmem>>, vector<1x128x128xbf16>
    %80 = vector.shape_cast %79 : vector<1x128x128xbf16> to vector<128x128xbf16>
    %cst_79 = arith.constant dense<0.000000e+00> : vector<128x128xf32>
    %81 = tpu.matmul %78, %80, %cst_79 {dimension_numbers = #tpu.dot_dimension_numbers<[1], [0], [0], [1], [0, 0, 1, 1], [], []>} : vector<128x128xbf16>, vector<128x128xbf16>, vector<128x128xf32> -> vector<128x128xf32>
    %82 = arith.addf %75, %81 : vector<128x128xf32>
    %c0_80 = arith.constant 0 : index
    %c2_81 = arith.constant 2 : index
    %c9_82 = arith.constant 9 : index
    %c0_83 = arith.constant 0 : index
    %83 = vector.load %arg9[%c0_80, %c2_81, %c9_82, %c0_83] : memref<2x10x24x128xf32, #tpu.memory_space<vmem>>, vector<2x8x8x128xf32>
    %84 = vector.shape_cast %83 : vector<2x8x8x128xf32> to vector<128x128xf32>
    %85 = arith.truncf %84 : vector<128x128xf32> to vector<128x128xbf16>
    %c8_84 = arith.constant 8 : index
    %c0_85 = arith.constant 0 : index
    %c0_86 = arith.constant 0 : index
    %86 = vector.load %arg7[%c8_84, %c0_85, %c0_86] : memref<9x128x128xbf16, #tpu.memory_space<vmem>>, vector<1x128x128xbf16>
    %87 = vector.shape_cast %86 : vector<1x128x128xbf16> to vector<128x128xbf16>
    %cst_87 = arith.constant dense<0.000000e+00> : vector<128x128xf32>
    %88 = tpu.matmul %85, %87, %cst_87 {dimension_numbers = #tpu.dot_dimension_numbers<[1], [0], [0], [1], [0, 0, 1, 1], [], []>} : vector<128x128xbf16>, vector<128x128xbf16>, vector<128x128xf32> -> vector<128x128xf32>
    %89 = arith.addf %82, %88 : vector<128x128xf32>
    %90 = arith.addf %2, %89 : vector<128x128xf32>
    %91 = vector.shape_cast %90 : vector<128x128xf32> to vector<2x8x8x128xf32>
    %92 = arith.truncf %91 : vector<2x8x8x128xf32> to vector<2x8x8x128xbf16>
    %c0_88 = arith.constant 0 : index
    %c0_89 = arith.constant 0 : index
    %c0_90 = arith.constant 0 : index
    %c0_91 = arith.constant 0 : index
    %93 = vector.load %arg8[%c0_88, %c0_89, %c0_90, %c0_91] : memref<2x8x8x128xbf16, #tpu.memory_space<vmem>>, vector<2x8x8x128xbf16>
    tpu.vector_store %arg8[%c0_88, %c0_89, %c0_90, %c0_91], %92 {strides = array<i32>} : memref<2x8x8x128xbf16, #tpu.memory_space<vmem>>, vector<2x8x8x128xbf16>,
    return
  }
  func.func @transform_0(%arg0: i32) -> (i32, i32, i32, i32) {
    %c0_i32 = arith.constant 0 : i32
    %c0_i32_0 = arith.constant 0 : i32
    %c0_i32_1 = arith.constant 0 : i32
    %c0_i32_2 = arith.constant 0 : i32
    %c0_i32_3 = arith.constant 0 : i32
    return %c0_i32, %c0_i32_0, %c0_i32_1, %c0_i32_2 : i32, i32, i32, i32
  }
  func.func @transform_1(%arg0: i32) -> (i32, i32) {
    %c0_i32 = arith.constant 0 : i32
    %c0_i32_0 = arith.constant 0 : i32
    %c0_i32_1 = arith.constant 0 : i32
    return %c0_i32, %c0_i32_0 : i32, i32
  }
  func.func @transform_2(%arg0: i32) -> (i32, i32) {
    %c0_i32 = arith.constant 0 : i32
    %c0_i32_0 = arith.constant 0 : i32
    %c0_i32_1 = arith.constant 0 : i32
    return %c0_i32, %c0_i32_0 : i32, i32
  }
  func.func @transform_3(%arg0: i32) -> (i32, i32) {
    %c0_i32 = arith.constant 0 : i32
    %c0_i32_0 = arith.constant 0 : i32
    %c0_i32_1 = arith.constant 0 : i32
    return %c0_i32, %c0_i32_0 : i32, i32
  }
  func.func @transform_4(%arg0: i32) -> (i32, i32) {
    %c0_i32 = arith.constant 0 : i32
    %c0_i32_0 = arith.constant 0 : i32
    %c0_i32_1 = arith.constant 0 : i32
    return %c0_i32, %c0_i32_0 : i32, i32
  }
  func.func @transform_5(%arg0: i32) -> (i32, i32) {
    %c0_i32 = arith.constant 0 : i32
    %c0_i32_0 = arith.constant 0 : i32
    %c0_i32_1 = arith.constant 0 : i32
    return %c0_i32, %c0_i32_0 : i32, i32
  }
  func.func @transform_6(%arg0: i32) -> (i32, i32, i32) {
    %c0_i32 = arith.constant 0 : i32
    %c0_i32_0 = arith.constant 0 : i32
    %c0_i32_1 = arith.constant 0 : i32
    %c0_i32_2 = arith.constant 0 : i32
    return %c0_i32, %c0_i32_0, %c0_i32_1 : i32, i32, i32
  }
  func.func @transform_7(%arg0: i32) -> (i32, i32, i32, i32) {
    %c0_i32 = arith.constant 0 : i32
    %c0_i32_0 = arith.constant 0 : i32
    %c0_i32_1 = arith.constant 0 : i32
    %c0_i32_2 = arith.constant 0 : i32
    %c0_i32_3 = arith.constant 0 : i32
    return %c0_i32, %c0_i32_0, %c0_i32_1, %c0_i32_2 : i32, i32, i32, i32
  }
}

module attributes {stable_mosaic.version = 11 : i64} {
  func.func @_fused_mm_kernel(%arg0: i32, %arg1: memref<128x128xbf16, #tpu.memory_space<vmem>>, %arg2: memref<128x128xbf16, #tpu.memory_space<vmem>>, %arg3: memref<1x128xf32, #tpu.memory_space<vmem>>, %arg4: memref<1x128xf32, #tpu.memory_space<vmem>>, %arg5: memref<1x128xf32, #tpu.memory_space<vmem>>, %arg6: memref<1x128xf32, #tpu.memory_space<vmem>>, %arg7: memref<128x128xbf16, #tpu.memory_space<vmem>>) attributes {dimension_semantics = [#tpu.dimension_semantics<parallel>], iteration_bounds = array<i64: 1>, scalar_prefetch = 0 : i64, scratch_operands = 0 : i64, tpu.core_type = #tpu.core_type<tc>, window_params = [{transform_indices = @transform_0, window_bounds = array<i64: 128, 128>}, {pipeline_mode = #tpu.pipeline_mode<synchronous>, transform_indices = @transform_1, window_bounds = array<i64: 128, 128>}, {pipeline_mode = #tpu.pipeline_mode<synchronous>, transform_indices = @transform_2, window_bounds = array<i64: 1, 128>}, {pipeline_mode = #tpu.pipeline_mode<synchronous>, transform_indices = @transform_3, window_bounds = array<i64: 1, 128>}, {pipeline_mode = #tpu.pipeline_mode<synchronous>, transform_indices = @transform_4, window_bounds = array<i64: 1, 128>}, {pipeline_mode = #tpu.pipeline_mode<synchronous>, transform_indices = @transform_5, window_bounds = array<i64: 1, 128>}, {transform_indices = @transform_6, window_bounds = array<i64: 128, 128>}]} {
    %c0 = arith.constant 0 : index
    %c0_0 = arith.constant 0 : index
    %0 = vector.load %arg1[%c0, %c0_0] : memref<128x128xbf16, #tpu.memory_space<vmem>>, vector<128x128xbf16>
    %1 = arith.extf %0 : vector<128x128xbf16> to vector<128x128xf32>
    %c0_1 = arith.constant 0 : index
    %c0_2 = arith.constant 0 : index
    %2 = vector.load %arg3[%c0_1, %c0_2] : memref<1x128xf32, #tpu.memory_space<vmem>>, vector<1x128xf32>
    %3 = vector.broadcast %2 : vector<1x128xf32> to vector<128x128xf32>
    %4 = arith.mulf %1, %3 : vector<128x128xf32>
    %c0_3 = arith.constant 0 : index
    %c0_4 = arith.constant 0 : index
    %5 = vector.load %arg4[%c0_3, %c0_4] : memref<1x128xf32, #tpu.memory_space<vmem>>, vector<1x128xf32>
    %6 = vector.broadcast %5 : vector<1x128xf32> to vector<128x128xf32>
    %7 = arith.addf %4, %6 : vector<128x128xf32>
    %cst = arith.constant 0.000000e+00 : f32
    %8 = vector.broadcast %cst : f32 to vector<128x128xf32>
    %9 = arith.maximumf %7, %8 : vector<128x128xf32>
    %10 = arith.truncf %9 : vector<128x128xf32> to vector<128x128xbf16>
    %c0_5 = arith.constant 0 : index
    %c0_6 = arith.constant 0 : index
    %11 = vector.load %arg2[%c0_5, %c0_6] : memref<128x128xbf16, #tpu.memory_space<vmem>>, vector<128x128xbf16>
    %cst_7 = arith.constant dense<0.000000e+00> : vector<128x128xf32>
    %12 = tpu.matmul %10, %11, %cst_7 {dimension_numbers = #tpu.dot_dimension_numbers<[1], [0], [0], [1], [0, 0, 1, 1], [], []>} : vector<128x128xbf16>, vector<128x128xbf16>, vector<128x128xf32> -> vector<128x128xf32>
    %c0_8 = arith.constant 0 : index
    %c0_9 = arith.constant 0 : index
    %13 = vector.load %arg5[%c0_8, %c0_9] : memref<1x128xf32, #tpu.memory_space<vmem>>, vector<1x128xf32>
    %14 = vector.broadcast %13 : vector<1x128xf32> to vector<128x128xf32>
    %15 = arith.mulf %12, %14 : vector<128x128xf32>
    %c0_10 = arith.constant 0 : index
    %c0_11 = arith.constant 0 : index
    %16 = vector.load %arg6[%c0_10, %c0_11] : memref<1x128xf32, #tpu.memory_space<vmem>>, vector<1x128xf32>
    %17 = vector.broadcast %16 : vector<1x128xf32> to vector<128x128xf32>
    %18 = arith.addf %15, %17 : vector<128x128xf32>
    %19 = arith.truncf %18 : vector<128x128xf32> to vector<128x128xbf16>
    %c0_12 = arith.constant 0 : index
    %c0_13 = arith.constant 0 : index
    %20 = vector.load %arg7[%c0_12, %c0_13] : memref<128x128xbf16, #tpu.memory_space<vmem>>, vector<128x128xbf16>
    tpu.vector_store %arg7[%c0_12, %c0_13], %19 {strides = array<i32>} : memref<128x128xbf16, #tpu.memory_space<vmem>>, vector<128x128xbf16>,
    return
  }
  func.func @transform_0(%arg0: i32) -> (i32, i32) {
    %c0_i32 = arith.constant 0 : i32
    %c0_i32_0 = arith.constant 0 : i32
    return %arg0, %c0_i32 : i32, i32
  }
  func.func @transform_1(%arg0: i32) -> (i32, i32) {
    %c0_i32 = arith.constant 0 : i32
    %c0_i32_0 = arith.constant 0 : i32
    %c0_i32_1 = arith.constant 0 : i32
    return %c0_i32, %c0_i32_0 : i32, i32
  }
  func.func @transform_2(%arg0: i32) -> (i32, i32) {
    %c0_i32 = arith.constant 0 : i32
    %c0_i32_0 = arith.constant 0 : i32
    %c0_i32_1 = arith.constant 0 : i32
    return %c0_i32, %c0_i32_0 : i32, i32
  }
  func.func @transform_3(%arg0: i32) -> (i32, i32) {
    %c0_i32 = arith.constant 0 : i32
    %c0_i32_0 = arith.constant 0 : i32
    %c0_i32_1 = arith.constant 0 : i32
    return %c0_i32, %c0_i32_0 : i32, i32
  }
  func.func @transform_4(%arg0: i32) -> (i32, i32) {
    %c0_i32 = arith.constant 0 : i32
    %c0_i32_0 = arith.constant 0 : i32
    %c0_i32_1 = arith.constant 0 : i32
    return %c0_i32, %c0_i32_0 : i32, i32
  }
  func.func @transform_5(%arg0: i32) -> (i32, i32) {
    %c0_i32 = arith.constant 0 : i32
    %c0_i32_0 = arith.constant 0 : i32
    %c0_i32_1 = arith.constant 0 : i32
    return %c0_i32, %c0_i32_0 : i32, i32
  }
  func.func @transform_6(%arg0: i32) -> (i32, i32) {
    %c0_i32 = arith.constant 0 : i32
    %c0_i32_0 = arith.constant 0 : i32
    return %arg0, %c0_i32 : i32, i32
  }
}

module attributes {stable_mosaic.version = 11 : i64} {
  func.func @_avgpool_kernel(%arg0: i32, %arg1: memref<2x8x4x256xbf16, #tpu.memory_space<vmem>>, %arg2: memref<2x4x4x128xbf16, #tpu.memory_space<vmem>>) attributes {dimension_semantics = [#tpu.dimension_semantics<arbitrary>], iteration_bounds = array<i64: 1>, scalar_prefetch = 0 : i64, scratch_operands = 0 : i64, tpu.core_type = #tpu.core_type<tc>, window_params = [{pipeline_mode = #tpu.pipeline_mode<synchronous>, transform_indices = @transform_0, window_bounds = array<i64: 2, 8, 4, 256>}, {pipeline_mode = #tpu.pipeline_mode<synchronous>, transform_indices = @transform_1, window_bounds = array<i64: 2, 4, 4, 128>}]} {
    %c0 = arith.constant 0 : index
    %c0_0 = arith.constant 0 : index
    %c0_1 = arith.constant 0 : index
    %c0_2 = arith.constant 0 : index
    %0 = vector.load %arg1[%c0, %c0_0, %c0_1, %c0_2] : memref<2x8x4x256xbf16, #tpu.memory_space<vmem>>, vector<2x8x4x128xbf16>
    %1 = arith.extf %0 : vector<2x8x4x128xbf16> to vector<2x8x4x128xf32>
    %c0_3 = arith.constant 0 : index
    %c0_4 = arith.constant 0 : index
    %c0_5 = arith.constant 0 : index
    %c128 = arith.constant 128 : index
    %2 = vector.load %arg1[%c0_3, %c0_4, %c0_5, %c128] : memref<2x8x4x256xbf16, #tpu.memory_space<vmem>>, vector<2x8x4x128xbf16>
    %3 = arith.extf %2 : vector<2x8x4x128xbf16> to vector<2x8x4x128xf32>
    %4 = arith.addf %1, %3 : vector<2x8x4x128xf32>
    %5 = vector.shape_cast %4 : vector<2x8x4x128xf32> to vector<2x4x2x4x128xf32>
    %6 = vector.extract_strided_slice %5 {offsets = [0, 0, 0, 0, 0], sizes = [2, 4, 1, 4, 128], strides = [1, 1, 1, 1, 1]} : vector<2x4x2x4x128xf32> to vector<2x4x1x4x128xf32>
    %7 = vector.shape_cast %6 : vector<2x4x1x4x128xf32> to vector<2x4x4x128xf32>
    %8 = vector.extract_strided_slice %5 {offsets = [0, 0, 1, 0, 0], sizes = [2, 4, 1, 4, 128], strides = [1, 1, 1, 1, 1]} : vector<2x4x2x4x128xf32> to vector<2x4x1x4x128xf32>
    %9 = vector.shape_cast %8 : vector<2x4x1x4x128xf32> to vector<2x4x4x128xf32>
    %10 = arith.addf %7, %9 : vector<2x4x4x128xf32>
    %cst = arith.constant 2.500000e-01 : f32
    %11 = vector.broadcast %cst : f32 to vector<2x4x4x128xf32>
    %12 = arith.mulf %10, %11 : vector<2x4x4x128xf32>
    %13 = arith.truncf %12 : vector<2x4x4x128xf32> to vector<2x4x4x128xbf16>
    %c0_6 = arith.constant 0 : index
    %c0_7 = arith.constant 0 : index
    %c0_8 = arith.constant 0 : index
    %c0_9 = arith.constant 0 : index
    %14 = vector.load %arg2[%c0_6, %c0_7, %c0_8, %c0_9] : memref<2x4x4x128xbf16, #tpu.memory_space<vmem>>, vector<2x4x4x128xbf16>
    tpu.vector_store %arg2[%c0_6, %c0_7, %c0_8, %c0_9], %13 {strides = array<i32>} : memref<2x4x4x128xbf16, #tpu.memory_space<vmem>>, vector<2x4x4x128xbf16>,
    return
  }
  func.func @transform_0(%arg0: i32) -> (i32, i32, i32, i32) {
    %c0_i32 = arith.constant 0 : i32
    %c0_i32_0 = arith.constant 0 : i32
    %c0_i32_1 = arith.constant 0 : i32
    %c0_i32_2 = arith.constant 0 : i32
    %c0_i32_3 = arith.constant 0 : i32
    return %c0_i32, %c0_i32_0, %c0_i32_1, %c0_i32_2 : i32, i32, i32, i32
  }
  func.func @transform_1(%arg0: i32) -> (i32, i32, i32, i32) {
    %c0_i32 = arith.constant 0 : i32
    %c0_i32_0 = arith.constant 0 : i32
    %c0_i32_1 = arith.constant 0 : i32
    %c0_i32_2 = arith.constant 0 : i32
    %c0_i32_3 = arith.constant 0 : i32
    return %c0_i32, %c0_i32_0, %c0_i32_1, %c0_i32_2 : i32, i32, i32, i32
  }
}

module attributes {stable_mosaic.version = 11 : i64} {
  func.func @_dense_layer_kernel(%arg0: i32, %arg1: memref<2x4x4x128xbf16, #tpu.memory_space<vmem>>, %arg2: memref<1x128xf32, #tpu.memory_space<vmem>>, %arg3: memref<1x128xf32, #tpu.memory_space<vmem>>, %arg4: memref<128x128xbf16, #tpu.memory_space<vmem>>, %arg5: memref<1x128xf32, #tpu.memory_space<vmem>>, %arg6: memref<1x128xf32, #tpu.memory_space<vmem>>, %arg7: memref<9x128x128xbf16, #tpu.memory_space<vmem>>, %arg8: memref<2x4x4x128xbf16, #tpu.memory_space<vmem>>, %arg9: memref<2x6x20x128xf32, #tpu.memory_space<vmem>>) attributes {dimension_semantics = [#tpu.dimension_semantics<arbitrary>], iteration_bounds = array<i64: 1>, scalar_prefetch = 0 : i64, scratch_operands = 1 : i64, tpu.core_type = #tpu.core_type<tc>, window_params = [{pipeline_mode = #tpu.pipeline_mode<synchronous>, transform_indices = @transform_0, window_bounds = array<i64: 2, 4, 4, 128>}, {pipeline_mode = #tpu.pipeline_mode<synchronous>, transform_indices = @transform_1, window_bounds = array<i64: 1, 128>}, {pipeline_mode = #tpu.pipeline_mode<synchronous>, transform_indices = @transform_2, window_bounds = array<i64: 1, 128>}, {pipeline_mode = #tpu.pipeline_mode<synchronous>, transform_indices = @transform_3, window_bounds = array<i64: 128, 128>}, {pipeline_mode = #tpu.pipeline_mode<synchronous>, transform_indices = @transform_4, window_bounds = array<i64: 1, 128>}, {pipeline_mode = #tpu.pipeline_mode<synchronous>, transform_indices = @transform_5, window_bounds = array<i64: 1, 128>}, {pipeline_mode = #tpu.pipeline_mode<synchronous>, transform_indices = @transform_6, window_bounds = array<i64: 9, 128, 128>}, {pipeline_mode = #tpu.pipeline_mode<synchronous>, transform_indices = @transform_7, window_bounds = array<i64: 2, 4, 4, 128>}]} {
    %c0 = arith.constant 0 : index
    %c0_0 = arith.constant 0 : index
    %c0_1 = arith.constant 0 : index
    %c0_2 = arith.constant 0 : index
    %0 = vector.load %arg1[%c0, %c0_0, %c0_1, %c0_2] : memref<2x4x4x128xbf16, #tpu.memory_space<vmem>>, vector<2x4x4x128xbf16>
    %1 = vector.shape_cast %0 : vector<2x4x4x128xbf16> to vector<32x128xbf16>
    %2 = arith.extf %1 : vector<32x128xbf16> to vector<32x128xf32>
    %c0_3 = arith.constant 0 : index
    %c0_4 = arith.constant 0 : index
    %3 = vector.load %arg2[%c0_3, %c0_4] : memref<1x128xf32, #tpu.memory_space<vmem>>, vector<1x128xf32>
    %4 = vector.broadcast %3 : vector<1x128xf32> to vector<32x128xf32>
    %5 = arith.mulf %2, %4 : vector<32x128xf32>
    %c0_5 = arith.constant 0 : index
    %c0_6 = arith.constant 0 : index
    %6 = vector.load %arg3[%c0_5, %c0_6] : memref<1x128xf32, #tpu.memory_space<vmem>>, vector<1x128xf32>
    %7 = vector.broadcast %6 : vector<1x128xf32> to vector<32x128xf32>
    %8 = arith.addf %5, %7 : vector<32x128xf32>
    %cst = arith.constant 0.000000e+00 : f32
    %9 = vector.broadcast %cst : f32 to vector<32x128xf32>
    %10 = arith.maximumf %8, %9 : vector<32x128xf32>
    %11 = arith.truncf %10 : vector<32x128xf32> to vector<32x128xbf16>
    %c0_7 = arith.constant 0 : index
    %c0_8 = arith.constant 0 : index
    %12 = vector.load %arg4[%c0_7, %c0_8] : memref<128x128xbf16, #tpu.memory_space<vmem>>, vector<128x128xbf16>
    %cst_9 = arith.constant dense<0.000000e+00> : vector<32x128xf32>
    %13 = tpu.matmul %11, %12, %cst_9 {dimension_numbers = #tpu.dot_dimension_numbers<[1], [0], [0], [1], [0, 0, 1, 1], [], []>} : vector<32x128xbf16>, vector<128x128xbf16>, vector<32x128xf32> -> vector<32x128xf32>
    %c0_10 = arith.constant 0 : index
    %c0_11 = arith.constant 0 : index
    %14 = vector.load %arg5[%c0_10, %c0_11] : memref<1x128xf32, #tpu.memory_space<vmem>>, vector<1x128xf32>
    %15 = vector.broadcast %14 : vector<1x128xf32> to vector<32x128xf32>
    %16 = arith.mulf %13, %15 : vector<32x128xf32>
    %c0_12 = arith.constant 0 : index
    %c0_13 = arith.constant 0 : index
    %17 = vector.load %arg6[%c0_12, %c0_13] : memref<1x128xf32, #tpu.memory_space<vmem>>, vector<1x128xf32>
    %18 = vector.broadcast %17 : vector<1x128xf32> to vector<32x128xf32>
    %19 = arith.addf %16, %18 : vector<32x128xf32>
    %cst_14 = arith.constant 0.000000e+00 : f32
    %20 = vector.broadcast %cst_14 : f32 to vector<32x128xf32>
    %21 = arith.maximumf %19, %20 : vector<32x128xf32>
    %cst_15 = arith.constant 0.000000e+00 : f32
    %22 = vector.broadcast %cst_15 : f32 to vector<2x6x20x128xf32>
    %c0_16 = arith.constant 0 : index
    %c0_17 = arith.constant 0 : index
    %c0_18 = arith.constant 0 : index
    %c0_19 = arith.constant 0 : index
    %23 = vector.load %arg9[%c0_16, %c0_17, %c0_18, %c0_19] : memref<2x6x20x128xf32, #tpu.memory_space<vmem>>, vector<2x6x20x128xf32>
    tpu.vector_store %arg9[%c0_16, %c0_17, %c0_18, %c0_19], %22 {strides = array<i32>} : memref<2x6x20x128xf32, #tpu.memory_space<vmem>>, vector<2x6x20x128xf32>,
    %24 = vector.shape_cast %21 : vector<32x128xf32> to vector<2x4x4x128xf32>
    %c0_20 = arith.constant 0 : index
    %c1 = arith.constant 1 : index
    %c8 = arith.constant 8 : index
    %c0_21 = arith.constant 0 : index
    %25 = vector.load %arg9[%c0_20, %c1, %c8, %c0_21] : memref<2x6x20x128xf32, #tpu.memory_space<vmem>>, vector<2x4x4x128xf32>
    tpu.vector_store %arg9[%c0_20, %c1, %c8, %c0_21], %24 {strides = array<i32>} : memref<2x6x20x128xf32, #tpu.memory_space<vmem>>, vector<2x4x4x128xf32>,
    %cst_22 = arith.constant 0.000000e+00 : f32
    %26 = vector.broadcast %cst_22 : f32 to vector<32x128xf32>
    %c0_23 = arith.constant 0 : index
    %c0_24 = arith.constant 0 : index
    %c7 = arith.constant 7 : index
    %c0_25 = arith.constant 0 : index
    %27 = vector.load %arg9[%c0_23, %c0_24, %c7, %c0_25] : memref<2x6x20x128xf32, #tpu.memory_space<vmem>>, vector<2x4x4x128xf32>
    %28 = vector.shape_cast %27 : vector<2x4x4x128xf32> to vector<32x128xf32>
    %29 = arith.truncf %28 : vector<32x128xf32> to vector<32x128xbf16>
    %c0_26 = arith.constant 0 : index
    %c0_27 = arith.constant 0 : index
    %c0_28 = arith.constant 0 : index
    %30 = vector.load %arg7[%c0_26, %c0_27, %c0_28] : memref<9x128x128xbf16, #tpu.memory_space<vmem>>, vector<1x128x128xbf16>
    %31 = vector.shape_cast %30 : vector<1x128x128xbf16> to vector<128x128xbf16>
    %cst_29 = arith.constant dense<0.000000e+00> : vector<32x128xf32>
    %32 = tpu.matmul %29, %31, %cst_29 {dimension_numbers = #tpu.dot_dimension_numbers<[1], [0], [0], [1], [0, 0, 1, 1], [], []>} : vector<32x128xbf16>, vector<128x128xbf16>, vector<32x128xf32> -> vector<32x128xf32>
    %33 = arith.addf %26, %32 : vector<32x128xf32>
    %c0_30 = arith.constant 0 : index
    %c0_31 = arith.constant 0 : index
    %c8_32 = arith.constant 8 : index
    %c0_33 = arith.constant 0 : index
    %34 = vector.load %arg9[%c0_30, %c0_31, %c8_32, %c0_33] : memref<2x6x20x128xf32, #tpu.memory_space<vmem>>, vector<2x4x4x128xf32>
    %35 = vector.shape_cast %34 : vector<2x4x4x128xf32> to vector<32x128xf32>
    %36 = arith.truncf %35 : vector<32x128xf32> to vector<32x128xbf16>
    %c1_34 = arith.constant 1 : index
    %c0_35 = arith.constant 0 : index
    %c0_36 = arith.constant 0 : index
    %37 = vector.load %arg7[%c1_34, %c0_35, %c0_36] : memref<9x128x128xbf16, #tpu.memory_space<vmem>>, vector<1x128x128xbf16>
    %38 = vector.shape_cast %37 : vector<1x128x128xbf16> to vector<128x128xbf16>
    %cst_37 = arith.constant dense<0.000000e+00> : vector<32x128xf32>
    %39 = tpu.matmul %36, %38, %cst_37 {dimension_numbers = #tpu.dot_dimension_numbers<[1], [0], [0], [1], [0, 0, 1, 1], [], []>} : vector<32x128xbf16>, vector<128x128xbf16>, vector<32x128xf32> -> vector<32x128xf32>
    %40 = arith.addf %33, %39 : vector<32x128xf32>
    %c0_38 = arith.constant 0 : index
    %c0_39 = arith.constant 0 : index
    %c9 = arith.constant 9 : index
    %c0_40 = arith.constant 0 : index
    %41 = vector.load %arg9[%c0_38, %c0_39, %c9, %c0_40] : memref<2x6x20x128xf32, #tpu.memory_space<vmem>>, vector<2x4x4x128xf32>
    %42 = vector.shape_cast %41 : vector<2x4x4x128xf32> to vector<32x128xf32>
    %43 = arith.truncf %42 : vector<32x128xf32> to vector<32x128xbf16>
    %c2 = arith.constant 2 : index
    %c0_41 = arith.constant 0 : index
    %c0_42 = arith.constant 0 : index
    %44 = vector.load %arg7[%c2, %c0_41, %c0_42] : memref<9x128x128xbf16, #tpu.memory_space<vmem>>, vector<1x128x128xbf16>
    %45 = vector.shape_cast %44 : vector<1x128x128xbf16> to vector<128x128xbf16>
    %cst_43 = arith.constant dense<0.000000e+00> : vector<32x128xf32>
    %46 = tpu.matmul %43, %45, %cst_43 {dimension_numbers = #tpu.dot_dimension_numbers<[1], [0], [0], [1], [0, 0, 1, 1], [], []>} : vector<32x128xbf16>, vector<128x128xbf16>, vector<32x128xf32> -> vector<32x128xf32>
    %47 = arith.addf %40, %46 : vector<32x128xf32>
    %c0_44 = arith.constant 0 : index
    %c1_45 = arith.constant 1 : index
    %c7_46 = arith.constant 7 : index
    %c0_47 = arith.constant 0 : index
    %48 = vector.load %arg9[%c0_44, %c1_45, %c7_46, %c0_47] : memref<2x6x20x128xf32, #tpu.memory_space<vmem>>, vector<2x4x4x128xf32>
    %49 = vector.shape_cast %48 : vector<2x4x4x128xf32> to vector<32x128xf32>
    %50 = arith.truncf %49 : vector<32x128xf32> to vector<32x128xbf16>
    %c3 = arith.constant 3 : index
    %c0_48 = arith.constant 0 : index
    %c0_49 = arith.constant 0 : index
    %51 = vector.load %arg7[%c3, %c0_48, %c0_49] : memref<9x128x128xbf16, #tpu.memory_space<vmem>>, vector<1x128x128xbf16>
    %52 = vector.shape_cast %51 : vector<1x128x128xbf16> to vector<128x128xbf16>
    %cst_50 = arith.constant dense<0.000000e+00> : vector<32x128xf32>
    %53 = tpu.matmul %50, %52, %cst_50 {dimension_numbers = #tpu.dot_dimension_numbers<[1], [0], [0], [1], [0, 0, 1, 1], [], []>} : vector<32x128xbf16>, vector<128x128xbf16>, vector<32x128xf32> -> vector<32x128xf32>
    %54 = arith.addf %47, %53 : vector<32x128xf32>
    %c0_51 = arith.constant 0 : index
    %c1_52 = arith.constant 1 : index
    %c8_53 = arith.constant 8 : index
    %c0_54 = arith.constant 0 : index
    %55 = vector.load %arg9[%c0_51, %c1_52, %c8_53, %c0_54] : memref<2x6x20x128xf32, #tpu.memory_space<vmem>>, vector<2x4x4x128xf32>
    %56 = vector.shape_cast %55 : vector<2x4x4x128xf32> to vector<32x128xf32>
    %57 = arith.truncf %56 : vector<32x128xf32> to vector<32x128xbf16>
    %c4 = arith.constant 4 : index
    %c0_55 = arith.constant 0 : index
    %c0_56 = arith.constant 0 : index
    %58 = vector.load %arg7[%c4, %c0_55, %c0_56] : memref<9x128x128xbf16, #tpu.memory_space<vmem>>, vector<1x128x128xbf16>
    %59 = vector.shape_cast %58 : vector<1x128x128xbf16> to vector<128x128xbf16>
    %cst_57 = arith.constant dense<0.000000e+00> : vector<32x128xf32>
    %60 = tpu.matmul %57, %59, %cst_57 {dimension_numbers = #tpu.dot_dimension_numbers<[1], [0], [0], [1], [0, 0, 1, 1], [], []>} : vector<32x128xbf16>, vector<128x128xbf16>, vector<32x128xf32> -> vector<32x128xf32>
    %61 = arith.addf %54, %60 : vector<32x128xf32>
    %c0_58 = arith.constant 0 : index
    %c1_59 = arith.constant 1 : index
    %c9_60 = arith.constant 9 : index
    %c0_61 = arith.constant 0 : index
    %62 = vector.load %arg9[%c0_58, %c1_59, %c9_60, %c0_61] : memref<2x6x20x128xf32, #tpu.memory_space<vmem>>, vector<2x4x4x128xf32>
    %63 = vector.shape_cast %62 : vector<2x4x4x128xf32> to vector<32x128xf32>
    %64 = arith.truncf %63 : vector<32x128xf32> to vector<32x128xbf16>
    %c5 = arith.constant 5 : index
    %c0_62 = arith.constant 0 : index
    %c0_63 = arith.constant 0 : index
    %65 = vector.load %arg7[%c5, %c0_62, %c0_63] : memref<9x128x128xbf16, #tpu.memory_space<vmem>>, vector<1x128x128xbf16>
    %66 = vector.shape_cast %65 : vector<1x128x128xbf16> to vector<128x128xbf16>
    %cst_64 = arith.constant dense<0.000000e+00> : vector<32x128xf32>
    %67 = tpu.matmul %64, %66, %cst_64 {dimension_numbers = #tpu.dot_dimension_numbers<[1], [0], [0], [1], [0, 0, 1, 1], [], []>} : vector<32x128xbf16>, vector<128x128xbf16>, vector<32x128xf32> -> vector<32x128xf32>
    %68 = arith.addf %61, %67 : vector<32x128xf32>
    %c0_65 = arith.constant 0 : index
    %c2_66 = arith.constant 2 : index
    %c7_67 = arith.constant 7 : index
    %c0_68 = arith.constant 0 : index
    %69 = vector.load %arg9[%c0_65, %c2_66, %c7_67, %c0_68] : memref<2x6x20x128xf32, #tpu.memory_space<vmem>>, vector<2x4x4x128xf32>
    %70 = vector.shape_cast %69 : vector<2x4x4x128xf32> to vector<32x128xf32>
    %71 = arith.truncf %70 : vector<32x128xf32> to vector<32x128xbf16>
    %c6 = arith.constant 6 : index
    %c0_69 = arith.constant 0 : index
    %c0_70 = arith.constant 0 : index
    %72 = vector.load %arg7[%c6, %c0_69, %c0_70] : memref<9x128x128xbf16, #tpu.memory_space<vmem>>, vector<1x128x128xbf16>
    %73 = vector.shape_cast %72 : vector<1x128x128xbf16> to vector<128x128xbf16>
    %cst_71 = arith.constant dense<0.000000e+00> : vector<32x128xf32>
    %74 = tpu.matmul %71, %73, %cst_71 {dimension_numbers = #tpu.dot_dimension_numbers<[1], [0], [0], [1], [0, 0, 1, 1], [], []>} : vector<32x128xbf16>, vector<128x128xbf16>, vector<32x128xf32> -> vector<32x128xf32>
    %75 = arith.addf %68, %74 : vector<32x128xf32>
    %c0_72 = arith.constant 0 : index
    %c2_73 = arith.constant 2 : index
    %c8_74 = arith.constant 8 : index
    %c0_75 = arith.constant 0 : index
    %76 = vector.load %arg9[%c0_72, %c2_73, %c8_74, %c0_75] : memref<2x6x20x128xf32, #tpu.memory_space<vmem>>, vector<2x4x4x128xf32>
    %77 = vector.shape_cast %76 : vector<2x4x4x128xf32> to vector<32x128xf32>
    %78 = arith.truncf %77 : vector<32x128xf32> to vector<32x128xbf16>
    %c7_76 = arith.constant 7 : index
    %c0_77 = arith.constant 0 : index
    %c0_78 = arith.constant 0 : index
    %79 = vector.load %arg7[%c7_76, %c0_77, %c0_78] : memref<9x128x128xbf16, #tpu.memory_space<vmem>>, vector<1x128x128xbf16>
    %80 = vector.shape_cast %79 : vector<1x128x128xbf16> to vector<128x128xbf16>
    %cst_79 = arith.constant dense<0.000000e+00> : vector<32x128xf32>
    %81 = tpu.matmul %78, %80, %cst_79 {dimension_numbers = #tpu.dot_dimension_numbers<[1], [0], [0], [1], [0, 0, 1, 1], [], []>} : vector<32x128xbf16>, vector<128x128xbf16>, vector<32x128xf32> -> vector<32x128xf32>
    %82 = arith.addf %75, %81 : vector<32x128xf32>
    %c0_80 = arith.constant 0 : index
    %c2_81 = arith.constant 2 : index
    %c9_82 = arith.constant 9 : index
    %c0_83 = arith.constant 0 : index
    %83 = vector.load %arg9[%c0_80, %c2_81, %c9_82, %c0_83] : memref<2x6x20x128xf32, #tpu.memory_space<vmem>>, vector<2x4x4x128xf32>
    %84 = vector.shape_cast %83 : vector<2x4x4x128xf32> to vector<32x128xf32>
    %85 = arith.truncf %84 : vector<32x128xf32> to vector<32x128xbf16>
    %c8_84 = arith.constant 8 : index
    %c0_85 = arith.constant 0 : index
    %c0_86 = arith.constant 0 : index
    %86 = vector.load %arg7[%c8_84, %c0_85, %c0_86] : memref<9x128x128xbf16, #tpu.memory_space<vmem>>, vector<1x128x128xbf16>
    %87 = vector.shape_cast %86 : vector<1x128x128xbf16> to vector<128x128xbf16>
    %cst_87 = arith.constant dense<0.000000e+00> : vector<32x128xf32>
    %88 = tpu.matmul %85, %87, %cst_87 {dimension_numbers = #tpu.dot_dimension_numbers<[1], [0], [0], [1], [0, 0, 1, 1], [], []>} : vector<32x128xbf16>, vector<128x128xbf16>, vector<32x128xf32> -> vector<32x128xf32>
    %89 = arith.addf %82, %88 : vector<32x128xf32>
    %90 = arith.addf %2, %89 : vector<32x128xf32>
    %91 = vector.shape_cast %90 : vector<32x128xf32> to vector<2x4x4x128xf32>
    %92 = arith.truncf %91 : vector<2x4x4x128xf32> to vector<2x4x4x128xbf16>
    %c0_88 = arith.constant 0 : index
    %c0_89 = arith.constant 0 : index
    %c0_90 = arith.constant 0 : index
    %c0_91 = arith.constant 0 : index
    %93 = vector.load %arg8[%c0_88, %c0_89, %c0_90, %c0_91] : memref<2x4x4x128xbf16, #tpu.memory_space<vmem>>, vector<2x4x4x128xbf16>
    tpu.vector_store %arg8[%c0_88, %c0_89, %c0_90, %c0_91], %92 {strides = array<i32>} : memref<2x4x4x128xbf16, #tpu.memory_space<vmem>>, vector<2x4x4x128xbf16>,
    return
  }
  func.func @transform_0(%arg0: i32) -> (i32, i32, i32, i32) {
    %c0_i32 = arith.constant 0 : i32
    %c0_i32_0 = arith.constant 0 : i32
    %c0_i32_1 = arith.constant 0 : i32
    %c0_i32_2 = arith.constant 0 : i32
    %c0_i32_3 = arith.constant 0 : i32
    return %c0_i32, %c0_i32_0, %c0_i32_1, %c0_i32_2 : i32, i32, i32, i32
  }
  func.func @transform_1(%arg0: i32) -> (i32, i32) {
    %c0_i32 = arith.constant 0 : i32
    %c0_i32_0 = arith.constant 0 : i32
    %c0_i32_1 = arith.constant 0 : i32
    return %c0_i32, %c0_i32_0 : i32, i32
  }
  func.func @transform_2(%arg0: i32) -> (i32, i32) {
    %c0_i32 = arith.constant 0 : i32
    %c0_i32_0 = arith.constant 0 : i32
    %c0_i32_1 = arith.constant 0 : i32
    return %c0_i32, %c0_i32_0 : i32, i32
  }
  func.func @transform_3(%arg0: i32) -> (i32, i32) {
    %c0_i32 = arith.constant 0 : i32
    %c0_i32_0 = arith.constant 0 : i32
    %c0_i32_1 = arith.constant 0 : i32
    return %c0_i32, %c0_i32_0 : i32, i32
  }
  func.func @transform_4(%arg0: i32) -> (i32, i32) {
    %c0_i32 = arith.constant 0 : i32
    %c0_i32_0 = arith.constant 0 : i32
    %c0_i32_1 = arith.constant 0 : i32
    return %c0_i32, %c0_i32_0 : i32, i32
  }
  func.func @transform_5(%arg0: i32) -> (i32, i32) {
    %c0_i32 = arith.constant 0 : i32
    %c0_i32_0 = arith.constant 0 : i32
    %c0_i32_1 = arith.constant 0 : i32
    return %c0_i32, %c0_i32_0 : i32, i32
  }
  func.func @transform_6(%arg0: i32) -> (i32, i32, i32) {
    %c0_i32 = arith.constant 0 : i32
    %c0_i32_0 = arith.constant 0 : i32
    %c0_i32_1 = arith.constant 0 : i32
    %c0_i32_2 = arith.constant 0 : i32
    return %c0_i32, %c0_i32_0, %c0_i32_1 : i32, i32, i32
  }
  func.func @transform_7(%arg0: i32) -> (i32, i32, i32, i32) {
    %c0_i32 = arith.constant 0 : i32
    %c0_i32_0 = arith.constant 0 : i32
    %c0_i32_1 = arith.constant 0 : i32
    %c0_i32_2 = arith.constant 0 : i32
    %c0_i32_3 = arith.constant 0 : i32
    return %c0_i32, %c0_i32_0, %c0_i32_1, %c0_i32_2 : i32, i32, i32, i32
  }
}

module attributes {stable_mosaic.version = 11 : i64} {
  func.func @_head_kernel(%arg0: i32, %arg1: memref<2x16x128xbf16, #tpu.memory_space<vmem>>, %arg2: memref<1x1x128xf32, #tpu.memory_space<vmem>>, %arg3: memref<1x1x128xf32, #tpu.memory_space<vmem>>, %arg4: memref<128x128xbf16, #tpu.memory_space<vmem>>, %arg5: memref<1x128xf32, #tpu.memory_space<vmem>>, %arg6: memref<2x128xf32, #tpu.memory_space<vmem>>) attributes {dimension_semantics = [#tpu.dimension_semantics<arbitrary>], iteration_bounds = array<i64: 1>, scalar_prefetch = 0 : i64, scratch_operands = 0 : i64, tpu.core_type = #tpu.core_type<tc>, window_params = [{pipeline_mode = #tpu.pipeline_mode<synchronous>, transform_indices = @transform_0, window_bounds = array<i64: 2, 16, 128>}, {pipeline_mode = #tpu.pipeline_mode<synchronous>, transform_indices = @transform_1, window_bounds = array<i64: 1, 1, 128>}, {pipeline_mode = #tpu.pipeline_mode<synchronous>, transform_indices = @transform_2, window_bounds = array<i64: 1, 1, 128>}, {pipeline_mode = #tpu.pipeline_mode<synchronous>, transform_indices = @transform_3, window_bounds = array<i64: 128, 128>}, {pipeline_mode = #tpu.pipeline_mode<synchronous>, transform_indices = @transform_4, window_bounds = array<i64: 1, 128>}, {pipeline_mode = #tpu.pipeline_mode<synchronous>, transform_indices = @transform_5, window_bounds = array<i64: 2, 128>}]} {
    %c0 = arith.constant 0 : index
    %c0_0 = arith.constant 0 : index
    %c0_1 = arith.constant 0 : index
    %0 = vector.load %arg1[%c0, %c0_0, %c0_1] : memref<2x16x128xbf16, #tpu.memory_space<vmem>>, vector<2x16x128xbf16>
    %1 = arith.extf %0 : vector<2x16x128xbf16> to vector<2x16x128xf32>
    %c0_2 = arith.constant 0 : index
    %c0_3 = arith.constant 0 : index
    %c0_4 = arith.constant 0 : index
    %2 = vector.load %arg2[%c0_2, %c0_3, %c0_4] : memref<1x1x128xf32, #tpu.memory_space<vmem>>, vector<1x1x128xf32>
    %3 = vector.broadcast %2 : vector<1x1x128xf32> to vector<2x16x128xf32>
    %4 = arith.mulf %1, %3 : vector<2x16x128xf32>
    %c0_5 = arith.constant 0 : index
    %c0_6 = arith.constant 0 : index
    %c0_7 = arith.constant 0 : index
    %5 = vector.load %arg3[%c0_5, %c0_6, %c0_7] : memref<1x1x128xf32, #tpu.memory_space<vmem>>, vector<1x1x128xf32>
    %6 = vector.broadcast %5 : vector<1x1x128xf32> to vector<2x16x128xf32>
    %7 = arith.addf %4, %6 : vector<2x16x128xf32>
    %cst = arith.constant 0.000000e+00 : f32
    %8 = vector.broadcast %cst : f32 to vector<2x16x128xf32>
    %9 = arith.maximumf %7, %8 : vector<2x16x128xf32>
    %cst_8 = arith.constant dense<0.000000e+00> : vector<2x128xf32>
    %10 = vector.multi_reduction <add>, %9, %cst_8 [1] : vector<2x16x128xf32> to vector<2x128xf32>
    %11 = arith.truncf %10 : vector<2x128xf32> to vector<2x128xbf16>
    %c0_9 = arith.constant 0 : index
    %c0_10 = arith.constant 0 : index
    %12 = vector.load %arg4[%c0_9, %c0_10] : memref<128x128xbf16, #tpu.memory_space<vmem>>, vector<128x128xbf16>
    %cst_11 = arith.constant dense<0.000000e+00> : vector<2x128xf32>
    %13 = tpu.matmul %11, %12, %cst_11 {dimension_numbers = #tpu.dot_dimension_numbers<[1], [0], [0], [1], [0, 0, 1, 1], [], []>} : vector<2x128xbf16>, vector<128x128xbf16>, vector<2x128xf32> -> vector<2x128xf32>
    %c0_12 = arith.constant 0 : index
    %c0_13 = arith.constant 0 : index
    %14 = vector.load %arg5[%c0_12, %c0_13] : memref<1x128xf32, #tpu.memory_space<vmem>>, vector<1x128xf32>
    %15 = vector.broadcast %14 : vector<1x128xf32> to vector<2x128xf32>
    %16 = arith.addf %13, %15 : vector<2x128xf32>
    %c0_14 = arith.constant 0 : index
    %c0_15 = arith.constant 0 : index
    %17 = vector.load %arg6[%c0_14, %c0_15] : memref<2x128xf32, #tpu.memory_space<vmem>>, vector<2x128xf32>
    tpu.vector_store %arg6[%c0_14, %c0_15], %16 {strides = array<i32>} : memref<2x128xf32, #tpu.memory_space<vmem>>, vector<2x128xf32>,
    return
  }
  func.func @transform_0(%arg0: i32) -> (i32, i32, i32) {
    %c0_i32 = arith.constant 0 : i32
    %c0_i32_0 = arith.constant 0 : i32
    %c0_i32_1 = arith.constant 0 : i32
    %c0_i32_2 = arith.constant 0 : i32
    return %c0_i32, %c0_i32_0, %c0_i32_1 : i32, i32, i32
  }
  func.func @transform_1(%arg0: i32) -> (i32, i32, i32) {
    %c0_i32 = arith.constant 0 : i32
    %c0_i32_0 = arith.constant 0 : i32
    %c0_i32_1 = arith.constant 0 : i32
    %c0_i32_2 = arith.constant 0 : i32
    return %c0_i32, %c0_i32_0, %c0_i32_1 : i32, i32, i32
  }
  func.func @transform_2(%arg0: i32) -> (i32, i32, i32) {
    %c0_i32 = arith.constant 0 : i32
    %c0_i32_0 = arith.constant 0 : i32
    %c0_i32_1 = arith.constant 0 : i32
    %c0_i32_2 = arith.constant 0 : i32
    return %c0_i32, %c0_i32_0, %c0_i32_1 : i32, i32, i32
  }
  func.func @transform_3(%arg0: i32) -> (i32, i32) {
    %c0_i32 = arith.constant 0 : i32
    %c0_i32_0 = arith.constant 0 : i32
    %c0_i32_1 = arith.constant 0 : i32
    return %c0_i32, %c0_i32_0 : i32, i32
  }
  func.func @transform_4(%arg0: i32) -> (i32, i32) {
    %c0_i32 = arith.constant 0 : i32
    %c0_i32_0 = arith.constant 0 : i32
    %c0_i32_1 = arith.constant 0 : i32
    return %c0_i32, %c0_i32_0 : i32, i32
  }
  func.func @transform_5(%arg0: i32) -> (i32, i32) {
    %c0_i32 = arith.constant 0 : i32
    %c0_i32_0 = arith.constant 0 : i32
    %c0_i32_1 = arith.constant 0 : i32
    return %c0_i32, %c0_i32_0 : i32, i32
  }
}

</mosaic_0001>

<bundles_post_ra>
// kernel: densenet_forward.10
= control target key start
LH: loop header
LB: loop body
LE: loop exit
PB: predicated region body
PF: predicated region fallthrough
CT: control target
= control target key end

     0   :  { %vm144_vm0 = vsmask.f32 3328  ;;  %vm145_vm1 = vsmask.f32 7440  ;;  %s1906_s0 = inlined_call_operand.vmem [shape: bf16[2,18,9,256], index: 0, kind: input, shape index: {}]   ;;  %s1907_s1 = inlined_call_operand.vmem [shape: bf16[2,8,8,128], index: 1, kind: output, shape index: {}]  }
   0x1   :  { %v811_v0 = vld [vmem:[%s1906_s0 + $0x4] sm:$0xf]  ;;  %v816_v1 = vld [vmem:[%s1906_s0 + $0x14] sm:$0xf]  ;;  %v841_v6 = vld [vmem:[%s1906_s0] sm:$0xf] }
   0x2   :  { %v821_v2 = vld [vmem:[%s1906_s0 + $0x24] sm:$0xf]  ;;  %v826_v3 = vld [vmem:[%s1906_s0 + $0x34] sm:$0xf]  ;;  %v846_v7 = vld [vmem:[%s1906_s0 + $0x10] sm:$0xf] }
   0x3   :  { %1995 = vst [vmem:[#allocation2_spill] sm:$0xff] %v826_v3  ;;  %v831_v4 = vld [vmem:[%s1906_s0 + $0x44] sm:$0xf]  ;;  %v836_v5 = vld [vmem:[%s1906_s0 + $0x54] sm:$0xf]  ;;  %vm1245_vm2 = vmor %vm144_vm0, %vm145_vm1 }
   0x4   :  { %1996 = vst [vmem:[#allocation3_spill] sm:$0xff] %v831_v4  ;;  %1997 = vst [vmem:[#allocation4_spill] sm:$0xff] %v836_v5  ;;  %v851_v8 = vld [vmem:[%s1906_s0 + $0x64] sm:$0xf]  ;;  %v856_v9 = vld [vmem:[%s1906_s0 + $0x74] sm:$0xf] }
   0x5   :  { %1998 = vst [vmem:[#allocation5_spill] sm:$0xff] %v851_v8  ;;  %1999 = vst [vmem:[#allocation6_spill] sm:$0xff] %v856_v9  ;;  %v861_v10 = vld [vmem:[%s1906_s0 + $0x84] sm:$0xf]  ;;  %v866_v11 = vld [vmem:[%s1906_s0 + $0x94] sm:$0xf] }
   0x6   :  { %2000 = vst [vmem:[#allocation7_spill] sm:$0xff] %v861_v10  ;;  %2001 = vst [vmem:[#allocation8_spill] sm:$0xff] %v866_v11  ;;  %v871_v12 = vld [vmem:[%s1906_s0 + $0x20] sm:$0xf]  ;;  %v876_v13 = vld [vmem:[%s1906_s0 + $0x30] sm:$0xf] }
   0x7   :  { %2002 = vst [vmem:[#allocation9_spill] sm:$0xff] %v876_v13  ;;  %v881_v14 = vld [vmem:[%s1906_s0 + $0x40] sm:$0xf]  ;;  %v886_v15 = vld [vmem:[%s1906_s0 + $0x50] sm:$0xf]  ;;  %v190_v11 = vshrl.u32 %v876_v13, 16 }
   0x8   :  { %2003 = vst [vmem:[#allocation10_spill] sm:$0xff] %v881_v14  ;;  %2004 = vst [vmem:[#allocation11_spill] sm:$0xff] %v886_v15  ;;  %v891_v16 = vld [vmem:[%s1906_s0 + $0xa4] sm:$0xf]  ;;  %v896_v17 = vld [vmem:[%s1906_s0 + $0xb4] sm:$0xf] }
   0x9   :  { %2005 = vst [vmem:[#allocation12_spill] sm:$0xff] %v891_v16  ;;  %2006 = vst [vmem:[#allocation13_spill] sm:$0xff] %v896_v17  ;;  %v901_v18 = vld [vmem:[%s1906_s0 + $0xc4] sm:$0xf]  ;;  %v906_v19 = vld [vmem:[%s1906_s0 + $0x60] sm:$0xf] }
   0xa   :  { %2007 = vst [vmem:[#allocation14_spill] sm:$0xff] %v901_v18  ;;  %2008 = vst [vmem:[#allocation15_spill] sm:$0xff] %v906_v19  ;;  %v911_v20 = vld [vmem:[%s1906_s0 + $0x70] sm:$0xf]  ;;  %v916_v21 = vld [vmem:[%s1906_s0 + $0x80] sm:$0xf] }
   0xb   :  { %2009 = vst [vmem:[#allocation16_spill] sm:$0xff] %v911_v20  ;;  %2010 = vst [vmem:[#allocation17_spill] sm:$0xff] %v916_v21  ;;  %v921_v22 = vld [vmem:[%s1906_s0 + $0x90] sm:$0xf]  ;;  %v926_v23 = vld [vmem:[%s1906_s0 + $0xd4] sm:$0xf] }
   0xc   :  { %2011 = vst [vmem:[#allocation18_spill] sm:$0xff] %v921_v22  ;;  %2012 = vst [vmem:[#allocation19_spill] sm:$0xff] %v926_v23  ;;  %v931_v24 = vld [vmem:[%s1906_s0 + $0xe4] sm:$0xf]  ;;  %v936_v25 = vld [vmem:[%s1906_s0 + $0xf4] sm:$0xf] }
   0xd   :  { %2013 = vst [vmem:[#allocation20_spill] sm:$0xff] %v931_v24  ;;  %2014 = vst [vmem:[#allocation21_spill] sm:$0xff] %v936_v25  ;;  %v941_v26 = vld [vmem:[%s1906_s0 + $0xa0] sm:$0xf]  ;;  %v946_v27 = vld [vmem:[%s1906_s0 + $0xb0] sm:$0xf] }
   0xe   :  { %2015 = vst [vmem:[#allocation22_spill] sm:$0xff] %v941_v26  ;;  %2016 = vst [vmem:[#allocation23_spill] sm:$0xff] %v946_v27  ;;  %v951_v28 = vld [vmem:[%s1906_s0 + $0xc0] sm:$0xf]  ;;  %v956_v29 = vld [vmem:[%s1906_s0 + $0xd0] sm:$0xf] }
   0xf   :  { %2017 = vst [vmem:[#allocation24_spill] sm:$0xff] %v951_v28  ;;  %2018 = vst [vmem:[#allocation25_spill] sm:$0xff] %v956_v29  ;;  %v961_v30 = vld [vmem:[%s1906_s0 + $0x104] sm:$0xf]  ;;  %v971_v32 = vld [vmem:[%s1906_s0 + $0x134] sm:$0xf] }
  0x10   :  { %2019 = vst [vmem:[#allocation26_spill] sm:$0xff] %v961_v30  ;;  %v966_v31 = vld [vmem:[%s1906_s0 + $0x124] sm:$0xf]  ;;  %2021 = vst [vmem:[#allocation28_spill] sm:$0xff] %v971_v32  ;;  %v980_v35 = vld [vmem:[%s1906_s0 + $0xe0] sm:$0xf] }
  0x11   :  { %2020 = vst [vmem:[#allocation27_spill] sm:$0xff] %v966_v31  ;;  %2022 = vst [vmem:[#allocation29_spill] sm:$0xff] %v980_v35  ;;  %v985_v36 = vld [vmem:[%s1906_s0 + $0xf0] sm:$0xf]  ;;  %v990_v37 = vld [vmem:[%s1906_s0 + $0x100] sm:$0xf] }
  0x12   :  { %2023 = vst [vmem:[#allocation30_spill] sm:$0xff] %v985_v36  ;;  %2024 = vst [vmem:[#allocation31_spill] sm:$0xff] %v990_v37  ;;  %v995_v38 = vld [vmem:[%s1906_s0 + $0x120] sm:$0xf]  ;;  %v1000_v39 = vld [vmem:[%s1906_s0 + $0x144] sm:$0xf] }
  0x13   :  { %2025 = vst [vmem:[#allocation32_spill] sm:$0xff] %v995_v38  ;;  %2026 = vst [vmem:[#allocation33_spill] sm:$0xff] %v1000_v39  ;;  %v1005_v40 = vld [vmem:[%s1906_s0 + $0x154] sm:$0xf]  ;;  %v1010_v41 = vld [vmem:[%s1906_s0 + $0x164] sm:$0xf] }
  0x14   :  { %2027 = vst [vmem:[#allocation34_spill] sm:$0xff] %v1005_v40  ;;  %2028 = vst [vmem:[#allocation35_spill] sm:$0xff] %v1010_v41  ;;  %v1023_v46 = vld [vmem:[%s1906_s0 + $0x130] sm:$0xf]  ;;  %v1028_v47 = vld [vmem:[%s1906_s0 + $0x140] sm:$0xf] }
  0x15   :  { %2029 = vst [vmem:[#allocation36_spill] sm:$0xff] %v1023_v46  ;;  %2030 = vst [vmem:[#allocation37_spill] sm:$0xff] %v1028_v47  ;;  %v1033_v48 = vld [vmem:[%s1906_s0 + $0x150] sm:$0xf]  ;;  %v1038_v49 = vld [vmem:[%s1906_s0 + $0x160] sm:$0xf] }
  0x16   :  { %2031 = vst [vmem:[#allocation38_spill] sm:$0xff] %v1033_v48  ;;  %2032 = vst [vmem:[#allocation39_spill] sm:$0xff] %v1038_v49  ;;  %v1043_v50 = vld [vmem:[%s1906_s0 + $0x174] sm:$0xf]  ;;  %v1048_v51 = vld [vmem:[%s1906_s0 + $0x184] sm:$0xf] }
  0x17   :  { %2033 = vst [vmem:[#allocation40_spill] sm:$0xff] %v1043_v50  ;;  %2034 = vst [vmem:[#allocation41_spill] sm:$0xff] %v1048_v51  ;;  %v1053_v52 = vld [vmem:[%s1906_s0 + $0x194] sm:$0xf]  ;;  %v1066_v57 = vld [vmem:[%s1906_s0 + $0x170] sm:$0xf] }
  0x18   :  { %2035 = vst [vmem:[#allocation42_spill] sm:$0xff] %v1053_v52  ;;  %2036 = vst [vmem:[#allocation43_spill] sm:$0xff] %v1066_v57  ;;  %v1071_v58 = vld [vmem:[%s1906_s0 + $0x180] sm:$0xf]  ;;  %v1076_v59 = vld [vmem:[%s1906_s0 + $0x190] sm:$0xf] }
  0x19   :  { %2037 = vst [vmem:[#allocation44_spill] sm:$0xff] %v1071_v58  ;;  %2038 = vst [vmem:[#allocation45_spill] sm:$0xff] %v1076_v59  ;;  %v1081_v60 = vld [vmem:[%s1906_s0 + $0x1a0] sm:$0xf]  ;;  %v1086_v61 = vld [vmem:[%s1906_s0 + $0x1a4] sm:$0xf] }
  0x1a   :  { %2039 = vst [vmem:[#allocation46_spill] sm:$0xff] %v1081_v60  ;;  %2040 = vst [vmem:[#allocation47_spill] sm:$0xff] %v1086_v61  ;;  %v1091_v62 = vld [vmem:[%s1906_s0 + $0x1b4] sm:$0xf]  ;;  %v1096_v63 = vld [vmem:[%s1906_s0 + $0x1c4] sm:$0xf] }
  0x1b   :  { %2041 = vst [vmem:[#allocation48_spill] sm:$0xff] %v1091_v62  ;;  %2042 = vst [vmem:[#allocation49_spill] sm:$0xff] %v1096_v63  ;;  %v1109_v45 = vld [vmem:[%s1906_s0 + $0x1b0] sm:$0xf]  ;;  %v1114_v56 = vld [vmem:[%s1906_s0 + $0x1c0] sm:$0xf] }
  0x1c   :  { %2043 = vst [vmem:[#allocation50_spill] sm:$0xff] %v1109_v45  ;;  %2044 = vst [vmem:[#allocation51_spill] sm:$0xff] %v1114_v56  ;;  %v1119_v55 = vld [vmem:[%s1906_s0 + $0x1d0] sm:$0xf]  ;;  %v1124_v53 = vld [vmem:[%s1906_s0 + $0x1e0] sm:$0xf] }
  0x1d   :  { %2045 = vst [vmem:[#allocation52_spill] sm:$0xff] %v1119_v55  ;;  %2046 = vst [vmem:[#allocation53_spill] sm:$0xff] %v1124_v53  ;;  %v1129_v54 = vld [vmem:[%s1906_s0 + $0x1d4] sm:$0xf]  ;;  %v1134_v44 = vld [vmem:[%s1906_s0 + $0x1e4] sm:$0xf] }
  0x1e   :  { %2047 = vst [vmem:[#allocation54_spill] sm:$0xff] %v1129_v54  ;;  %2048 = vst [vmem:[#allocation55_spill] sm:$0xff] %v1134_v44  ;;  %v1139_v43 = vld [vmem:[%s1906_s0 + $0x1f4] sm:$0xf]  ;;  %v1152_v18 = vld [vmem:[%s1906_s0 + $0x204] sm:$0xf] }
  0x1f   :  { %2049 = vst [vmem:[#allocation56_spill] sm:$0xff] %v1139_v43  ;;  %2050 = vst [vmem:[#allocation57_spill] sm:$0xff] %v1152_v18  ;;  %v1157_v17 = vld [vmem:[%s1906_s0 + $0x214] sm:$0xf]  ;;  %v1162_v34 = vld [vmem:[%s1906_s0 + $0x224] sm:$0xf] }
  0x20   :  { %2051 = vst [vmem:[#allocation58_spill] sm:$0xff] %v1157_v17  ;;  %2052 = vst [vmem:[#allocation59_spill] sm:$0xff] %v1162_v34  ;;  %v1175_v30 = vld [vmem:[%s1906_s0 + $0x1f0] sm:$0xf]  ;;  %v1180_v25 = vld [vmem:[%s1906_s0 + $0x200] sm:$0xf] }
  0x21   :  { %2053 = vst [vmem:[#allocation60_spill] sm:$0xff] %v1175_v30  ;;  %2054 = vst [vmem:[#allocation61_spill] sm:$0xff] %v1180_v25  ;;  %v76_v23 = vld [vmem:[%s1906_s0 + $0x8] sm:$0x1]  ;;  %v1196_v40 = vld [vmem:[%s1906_s0 + $0x210] sm:$0xf] }
  0x22   :  { %v1201_v39 = vld [vmem:[%s1906_s0 + $0x220] sm:$0xf]  ;;  %v77_v31 = vld [vmem:[%s1906_s0 + $0x18] sm:$0x1]  ;;  %v148_v41 = vshrl.u32 %v841_v6, 16  ;;  %v151_v63 = vshll.u32 %v841_v6, 16 }
  0x23   :  { %v157_v42 = vshll.u32 %v76_v23, 16  ;;  %v162_v54 = vshrl.u32 %v846_v7, 16  ;;  %v78_v52 = vld [vmem:[%s1906_s0 + $0x28] sm:$0x1]  ;;  %v165_v61 = vshll.u32 %v846_v7, 16  ;;  %v171_v51 = vshll.u32 %v77_v31, 16 }
  0x24   :  { %v176_v18 = vshrl.u32 %v871_v12, 16  ;;  %v179_v50 = vshll.u32 %v871_v12, 16  ;;  %v79_v33 = vld [vmem:[%s1906_s0 + $0x38] sm:$0x1]  ;;  %v150_v34 = vrot.slane %v148_v41, 4  ;;  %v153_v17 = vrot.slane %v151_v63, 5 }
  0x25   :  { %v1234_v23 = vrot.slane %v157_v42, 5  ;;  %v164_v43 = vrot.slane %v162_v54, 4  ;;  %v167_v44 = vrot.slane %v165_v61, 5  ;;  %v1236_v62 = vrot.slane %v171_v51, 5  ;;  %v80_v9 = vld [vmem:[%s1906_s0 + $0x48] sm:$0x1] }
  0x26   :  { %v178_v32 = vrot.slane %v176_v18, 4  ;;  %v181_v24 = vrot.slane %v179_v50, 5  ;;  %v154_v16 = vor.u32 %v153_v17, %v150_v34  ;;  %v185_v31 = vshll.u32 %v78_v52, 16  ;;  %v81_v61 = vld [vmem:[%s1906_s0 + $0x58] sm:$0x1] }
  0x27   :  { %v193_v10 = vshll.u32 %v876_v13, 16  ;;  %v168_v42 = vor.u32 %v167_v44, %v164_v43  ;;  %v199_v18 = vshll.u32 %v79_v33, 16  ;;  %v204_v17 = vshrl.u32 %v881_v14, 16  ;;  %v82_v33 = vld [vmem:[%s1906_s0 + $0x68] sm:$0x1] }
  0x28   :  { %v182_v51 = vor.u32 %v181_v24, %v178_v32  ;;  %v1250_v34 = vrot.slane %v154_v16, 4  ;;  %v1252_v50 = vrot.slane %v185_v31, 5  ;;  %v192_v52 = vrot.slane %v190_v11, 4 }
  0x29   :  { %v195_v54 = vrot.slane %v193_v10, 5  ;;  %v1257_v63 = vrot.slane %v168_v42, 4  ;;  %v1261_v5 = vrot.slane %v199_v18, 5  ;;  %v206_v24 = vrot.slane %v204_v17, 4 }
  0x2a   :  { %v1259_v8 = vrot.slane %v182_v51, 4  ;;  %v207_v11 = vshll.u32 %v881_v14, 16  ;;  %v213_v10 = vshll.u32 %v80_v9, 16  ;;  %v218_v31 = vshrl.u32 %v886_v15, 16 }
  0x2b   :  { %v196_v32 = vor.u32 %v195_v54, %v192_v52  ;;  %v221_v42 = vshll.u32 %v886_v15, 16  ;;  %v227_v17 = vshll.u32 %v81_v61, 16  ;;  %v83_v52 = vld [vmem:[%s1906_s0 + $0x78] sm:$0x1]  ;;  %v232_v16 = vshrl.u32 %v906_v19, 16 }
  0x2c   :  { %v209_v9 = vrot.slane %v207_v11, 5  ;;  %v1283_v18 = vrot.slane %v213_v10, 5  ;;  %v220_v54 = vrot.slane %v218_v31, 4  ;;  %v235_v44 = vshll.u32 %v906_v19, 16  ;;  %v84_v31 = vld [vmem:[%s1906_s0 + $0x88] sm:$0x1] }
  0x2d   :  { %v1281_v51 = vrot.slane %v196_v32, 4  ;;  %v223_v43 = vrot.slane %v221_v42, 5  ;;  %v1294_v11 = vrot.slane %v227_v17, 5  ;;  %v241_v10 = vshll.u32 %v82_v33, 16 }
  0x2e   :  { %v210_v15 = vor.u32 %v209_v9, %v206_v24  ;;  %v234_v14 = vrot.slane %v232_v16, 4  ;;  %v237_v4 = vrot.slane %v235_v44, 5  ;;  %v246_v13 = vshrl.u32 %v911_v20, 16 }
  0x2f   :  { %2057 = vst [vmem:[#allocation62_spill] sm:$0xff] %v1294_v11  ;;  %v224_v61 = vor.u32 %v223_v43, %v220_v54  ;;  %v1302_v19 = vrot.slane %v241_v10, 5  ;;  %v249_v3 = vshll.u32 %v911_v20, 16  ;;  %v255_v32 = vshll.u32 %v83_v52, 16  ;;  %v85_v43 = vld [vmem:[%s1906_s0 + $0x98] sm:$0x1] }
  0x30   :  { %v1300_v42 = vrot.slane %v210_v15, 4  ;;  %v238_v9 = vor.u32 %v237_v4, %v234_v14  ;;  %v248_v33 = vrot.slane %v246_v13, 4  ;;  %v260_v16 = vshrl.u32 %v916_v21, 16  ;;  %v86_v10 = vld [vmem:[%s1906_s0 + $0xa8] sm:$0x1] }
  0x31   :  { %2058 = vst [vmem:[#allocation63_spill] sm:$0xff] %v1302_v19  ;;  %v1305_v24 = vrot.slane %v224_v61, 4  ;;  %v251_v44 = vrot.slane %v249_v3, 5  ;;  %v1315_v17 = vrot.slane %v255_v32, 5  ;;  %v263_v52 = vshll.u32 %v916_v21, 16 }
  0x32   :  { %v1322_v13 = vrot.slane %v238_v9, 4  ;;  %v262_v14 = vrot.slane %v260_v16, 4  ;;  %v269_v54 = vshll.u32 %v84_v31, 16  ;;  %v274_v3 = vshrl.u32 %v921_v22, 16  ;;  %v87_v16 = vld [vmem:[%s1906_s0 + $0xb8] sm:$0x1] }
  0x33   :  { %2059 = vst [vmem:[#allocation64_spill] sm:$0xff] %v1305_v24  ;;  %v252_v61 = vor.u32 %v251_v44, %v248_v33  ;;  %v265_v15 = vrot.slane %v263_v52, 5  ;;  %v277_v32 = vshll.u32 %v921_v22, 16  ;;  %v283_v9 = vshll.u32 %v85_v43, 16 }
  0x34   :  { %v1333_v4 = vrot.slane %v269_v54, 5  ;;  %v288_v31 = vshrl.u32 %v941_v26, 16  ;;  %v276_v52 = vrot.slane %v274_v3, 4  ;;  %v291_v24 = vshll.u32 %v941_v26, 16  ;;  %v90_v26 = vld [vmem:[%s1906_s0 + $0xe8] sm:$0x1] }
  0x35   :  { %v1339_v33 = vrot.slane %v252_v61, 4  ;;  %v266_v44 = vor.u32 %v265_v15, %v262_v14  ;;  %v279_v20 = vrot.slane %v277_v32, 5  ;;  %v1341_v22 = vrot.slane %v283_v9, 5  ;;  %v88_v15 = vld [vmem:[%s1906_s0 + $0xc8] sm:$0x1] }
  0x36   :  { %2060 = vst [vmem:[#allocation65_spill] sm:$0xff] %v1333_v4  ;;  %v290_v11 = vrot.slane %v288_v31, 4  ;;  %v297_v21 = vshll.u32 %v86_v10, 16  ;;  %v302_v61 = vshrl.u32 %v946_v27, 16  ;;  %v293_v14 = vrot.slane %v291_v24, 5 }
  0x37   :  { %2061 = vst [vmem:[#allocation66_spill] sm:$0xff] %v1341_v22  ;;  %v1348_v54 = vrot.slane %v266_v44, 4  ;;  %v280_v19 = vor.u32 %v279_v20, %v276_v52  ;;  %v305_v32 = vshll.u32 %v946_v27, 16  ;;  %v311_v10 = vshll.u32 %v87_v16, 16  ;;  %v89_v52 = vld [vmem:[%s1906_s0 + $0xd8] sm:$0x1] }
  0x38   :  { %v1354_v3 = vrot.slane %v297_v21, 5  ;;  %v304_v20 = vrot.slane %v302_v61, 4  ;;  %v316_v44 = vshrl.u32 %v951_v28, 16  ;;  %v294_v24 = vor.u32 %v293_v14, %v290_v11 }
  0x39   :  { %2062 = vst [vmem:[#allocation67_spill] sm:$0xff] %v1348_v54  ;;  %v1361_v31 = vrot.slane %v280_v19, 4  ;;  %v307_v21 = vrot.slane %v305_v32, 5  ;;  %v1367_v43 = vrot.slane %v311_v10, 5  ;;  %v319_v16 = vshll.u32 %v951_v28, 16 }
  0x3a   :  { %v318_v19 = vrot.slane %v316_v44, 4  ;;  %v325_v27 = vshll.u32 %v88_v15, 16  ;;  %v330_v61 = vshrl.u32 %v956_v29, 16  ;;  %v1378_v4 = vrot.slane %v294_v24, 4  ;;  %v91_v15 = vld [vmem:[%s1906_s0 + $0xf8] sm:$0x1] }
  0x3b   :  { %2063 = vst [vmem:[#allocation68_spill] sm:$0xff] %v1361_v31  ;;  %v308_v11 = vor.u32 %v307_v21, %v304_v20  ;;  %v321_v14 = vrot.slane %v319_v16, 5  ;;  %v333_v32 = vshll.u32 %v956_v29, 16  ;;  %v339_v54 = vshll.u32 %v89_v52, 16 }
  0x3c   :  { %v1381_v10 = vrot.slane %v325_v27, 5  ;;  %v332_v28 = vrot.slane %v330_v61, 4  ;;  %v344_v9 = vshrl.u32 %v980_v35, 16  ;;  %v347_v52 = vshll.u32 %v980_v35, 16  ;;  %v94_v35 = vld [vmem:[%s1906_s0 + $0x138] sm:$0x1] }
  0x3d   :  { %v1391_v24 = vrot.slane %v308_v11, 4  ;;  %v322_v20 = vor.u32 %v321_v14, %v318_v19  ;;  %v335_v21 = vrot.slane %v333_v32, 5  ;;  %v1393_v16 = vrot.slane %v339_v54, 5  ;;  %v92_v19 = vld [vmem:[%s1906_s0 + $0x108] sm:$0x1] }
  0x3e   :  { %2064 = vst [vmem:[#allocation69_spill] sm:$0xff] %v1381_v10  ;;  %v346_v27 = vrot.slane %v344_v9, 4  ;;  %v353_v61 = vshll.u32 %v90_v26, 16  ;;  %v358_v44 = vshrl.u32 %v985_v36, 16  ;;  %v349_v54 = vrot.slane %v347_v52, 5 }
  0x3f   :  { %2065 = vst [vmem:[#allocation70_spill] sm:$0xff] %v1393_v16  ;;  %v1400_v22 = vrot.slane %v322_v20, 4  ;;  %v336_v31 = vor.u32 %v335_v21, %v332_v28  ;;  %v361_v9 = vshll.u32 %v985_v36, 16  ;;  %v367_v26 = vshll.u32 %v91_v15, 16  ;;  %v93_v21 = vld [vmem:[%s1906_s0 + $0x128] sm:$0x1] }
  0x40   :  { %v1406_v11 = vrot.slane %v353_v61, 5  ;;  %v360_v28 = vrot.slane %v358_v44, 4  ;;  %v372_v20 = vshrl.u32 %v990_v37, 16  ;;  %v350_v52 = vor.u32 %v349_v54, %v346_v27 }
  0x41   :  { %2066 = vst [vmem:[#allocation71_spill] sm:$0xff] %v1400_v22  ;;  %v1413_v32 = vrot.slane %v336_v31, 4  ;;  %v363_v61 = vrot.slane %v361_v9, 5  ;;  %v1419_v29 = vrot.slane %v367_v26, 5  ;;  %v375_v15 = vshll.u32 %v990_v37, 16 }
  0x42   :  { %v374_v31 = vrot.slane %v372_v20, 4  ;;  %v381_v36 = vshll.u32 %v92_v19, 16  ;;  %v386_v44 = vshrl.u32 %v995_v38, 16  ;;  %v1430_v10 = vrot.slane %v350_v52, 4  ;;  %v95_v19 = vld [vmem:[%s1906_s0 + $0x148] sm:$0x1] }
  0x43   :  { %2067 = vst [vmem:[#allocation72_spill] sm:$0xff] %v1413_v32  ;;  %v364_v27 = vor.u32 %v363_v61, %v360_v28  ;;  %v377_v54 = vrot.slane %v375_v15, 5  ;;  %v389_v9 = vshll.u32 %v995_v38, 16  ;;  %v395_v22 = vshll.u32 %v93_v21, 16 }
  0x44   :  { %v1433_v26 = vrot.slane %v381_v36, 5  ;;  %v388_v37 = vrot.slane %v386_v44, 4  ;;  %v400_v14 = vshrl.u32 %v1023_v46, 16  ;;  %v403_v21 = vshll.u32 %v1023_v46, 16  ;;  %v98_v46 = vld [vmem:[%s1906_s0 + $0x178] sm:$0x1] }
  0x45   :  { %v1443_v52 = vrot.slane %v364_v27, 4  ;;  %v378_v28 = vor.u32 %v377_v54, %v374_v31  ;;  %v391_v61 = vrot.slane %v389_v9, 5  ;;  %v1445_v15 = vrot.slane %v395_v22, 5  ;;  %v96_v31 = vld [vmem:[%s1906_s0 + $0x158] sm:$0x1] }
  0x46   :  { %2068 = vst [vmem:[#allocation73_spill] sm:$0xff] %v1433_v26  ;;  %v402_v36 = vrot.slane %v400_v14, 4  ;;  %v409_v44 = vshll.u32 %v94_v35, 16  ;;  %v414_v20 = vshrl.u32 %v1028_v47, 16  ;;  %v405_v22 = vrot.slane %v403_v21, 5 }
  0x47   :  { %2069 = vst [vmem:[#allocation74_spill] sm:$0xff] %v1445_v15  ;;  %v1452_v16 = vrot.slane %v378_v28, 4  ;;  %v392_v32 = vor.u32 %v391_v61, %v388_v37  ;;  %v417_v14 = vshll.u32 %v1028_v47, 16  ;;  %v423_v35 = vshll.u32 %v95_v19, 16  ;;  %v97_v61 = vld [vmem:[%s1906_s0 + $0x168] sm:$0x1] }
  0x48   :  { %v1458_v27 = vrot.slane %v409_v44, 5  ;;  %v416_v37 = vrot.slane %v414_v20, 4  ;;  %v428_v28 = vshrl.u32 %v1033_v48, 16  ;;  %v406_v21 = vor.u32 %v405_v22, %v402_v36 }
  0x49   :  { %2070 = vst [vmem:[#allocation75_spill] sm:$0xff] %v1452_v16  ;;  %v1465_v9 = vrot.slane %v392_v32, 4  ;;  %v419_v44 = vrot.slane %v417_v14, 5  ;;  %v1471_v38 = vrot.slane %v423_v35, 5  ;;  %v431_v19 = vshll.u32 %v1033_v48, 16 }
  0x4a   :  { %v430_v32 = vrot.slane %v428_v28, 4  ;;  %v437_v47 = vshll.u32 %v96_v31, 16  ;;  %v442_v20 = vshrl.u32 %v1038_v49, 16  ;;  %v1482_v26 = vrot.slane %v406_v21, 4  ;;  %v99_v31 = vld [vmem:[%s1906_s0 + $0x188] sm:$0x1] }
  0x4b   :  { %2071 = vst [vmem:[#allocation76_spill] sm:$0xff] %v1465_v9  ;;  %v420_v36 = vor.u32 %v419_v44, %v416_v37  ;;  %v433_v22 = vrot.slane %v431_v19, 5  ;;  %v445_v14 = vshll.u32 %v1038_v49, 16  ;;  %v451_v16 = vshll.u32 %v97_v61, 16 }
  0x4c   :  { %v1485_v35 = vrot.slane %v437_v47, 5  ;;  %v444_v48 = vrot.slane %v442_v20, 4  ;;  %v456_v54 = vshrl.u32 %v1066_v57, 16  ;;  %v459_v61 = vshll.u32 %v1066_v57, 16  ;;  %v102_v57 = vld [vmem:[%s1906_s0 + $0x1b8] sm:$0x1] }
  0x4d   :  { %v1495_v21 = vrot.slane %v420_v36, 4  ;;  %v434_v37 = vor.u32 %v433_v22, %v430_v32  ;;  %v447_v44 = vrot.slane %v445_v14, 5  ;;  %v1497_v19 = vrot.slane %v451_v16, 5  ;;  %v100_v32 = vld [vmem:[%s1906_s0 + $0x198] sm:$0x1] }
  0x4e   :  { %2072 = vst [vmem:[#allocation77_spill] sm:$0xff] %v1485_v35  ;;  %v458_v47 = vrot.slane %v456_v54, 4  ;;  %v465_v20 = vshll.u32 %v98_v46, 16  ;;  %v470_v28 = vshrl.u32 %v1071_v58, 16  ;;  %v461_v16 = vrot.slane %v459_v61, 5 }
  0x4f   :  { %2073 = vst [vmem:[#allocation78_spill] sm:$0xff] %v1497_v19  ;;  %v1504_v15 = vrot.slane %v434_v37, 4  ;;  %v448_v9 = vor.u32 %v447_v44, %v444_v48  ;;  %v473_v54 = vshll.u32 %v1071_v58, 16  ;;  %v479_v46 = vshll.u32 %v99_v31, 16  ;;  %v101_v44 = vld [vmem:[%s1906_s0 + $0x1a8] sm:$0x1] }
  0x50   :  { %v1510_v36 = vrot.slane %v465_v20, 5  ;;  %v472_v48 = vrot.slane %v470_v28, 4  ;;  %v484_v37 = vshrl.u32 %v1076_v59, 16  ;;  %v462_v61 = vor.u32 %v461_v16, %v458_v47 }
  0x51   :  { %2074 = vst [vmem:[#allocation79_spill] sm:$0xff] %v1504_v15  ;;  %v1517_v14 = vrot.slane %v448_v9, 4  ;;  %v475_v20 = vrot.slane %v473_v54, 5  ;;  %v1523_v49 = vrot.slane %v479_v46, 5  ;;  %v487_v31 = vshll.u32 %v1076_v59, 16 }
  0x52   :  { %v486_v9 = vrot.slane %v484_v37, 4  ;;  %v493_v58 = vshll.u32 %v100_v32, 16  ;;  %v498_v28 = vshrl.u32 %v1081_v60, 16  ;;  %v1534_v35 = vrot.slane %v462_v61, 4  ;;  %v103_v32 = vld [vmem:[%s1906_s0 + $0x1c8] sm:$0x1] }
  0x53   :  { %2075 = vst [vmem:[#allocation80_spill] sm:$0xff] %v1517_v14  ;;  %v476_v47 = vor.u32 %v475_v20, %v472_v48  ;;  %v489_v16 = vrot.slane %v487_v31, 5  ;;  %v501_v54 = vshll.u32 %v1081_v60, 16  ;;  %v507_v15 = vshll.u32 %v101_v44, 16 }
  0x54   :  { %v1537_v46 = vrot.slane %v493_v58, 5  ;;  %v500_v59 = vrot.slane %v498_v28, 4  ;;  %v512_v22 = vshrl.u32 %v1109_v45, 16  ;;  %v515_v44 = vshll.u32 %v1109_v45, 16  ;;  %v106_v45 = vld [vmem:[%s1906_s0 + $0x1f8] sm:$0x1] }
  0x55   :  { %v1547_v61 = vrot.slane %v476_v47, 4  ;;  %v490_v48 = vor.u32 %v489_v16, %v486_v9  ;;  %v503_v20 = vrot.slane %v501_v54, 5  ;;  %v1549_v31 = vrot.slane %v507_v15, 5  ;;  %v104_v9 = vld [vmem:[%s1906_s0 + $0x1d8] sm:$0x1] }
  0x56   :  { %2076 = vst [vmem:[#allocation81_spill] sm:$0xff] %v1537_v46  ;;  %v514_v58 = vrot.slane %v512_v22, 4  ;;  %v521_v28 = vshll.u32 %v102_v57, 16  ;;  %v526_v37 = vshrl.u32 %v1114_v56, 16  ;;  %v517_v15 = vrot.slane %v515_v44, 5 }
  0x57   :  { %2077 = vst [vmem:[#allocation82_spill] sm:$0xff] %v1549_v31  ;;  %v1556_v19 = vrot.slane %v490_v48, 4  ;;  %v504_v14 = vor.u32 %v503_v20, %v500_v59  ;;  %v529_v22 = vshll.u32 %v1114_v56, 16  ;;  %v535_v57 = vshll.u32 %v103_v32, 16  ;;  %v105_v20 = vld [vmem:[%s1906_s0 + $0x1e8] sm:$0x1] }
  0x58   :  { %v1562_v47 = vrot.slane %v521_v28, 5  ;;  %v528_v59 = vrot.slane %v526_v37, 4  ;;  %v540_v48 = vshrl.u32 %v1119_v55, 16  ;;  %v518_v44 = vor.u32 %v517_v15, %v514_v58 }
  0x59   :  { %2078 = vst [vmem:[#allocation83_spill] sm:$0xff] %v1556_v19  ;;  %v1569_v54 = vrot.slane %v504_v14, 4  ;;  %v531_v28 = vrot.slane %v529_v22, 5  ;;  %v1575_v60 = vrot.slane %v535_v57, 5  ;;  %v543_v32 = vshll.u32 %v1119_v55, 16 }
  0x5a   :  { %2079 = vst [vmem:[#allocation84_spill] sm:$0xff] %v1562_v47  ;;  %v542_v14 = vrot.slane %v540_v48, 4  ;;  %v549_v56 = vshll.u32 %v104_v9, 16  ;;  %v554_v37 = vshrl.u32 %v1124_v53, 16  ;;  %v1586_v46 = vrot.slane %v518_v44, 4 }
  0x5b   :  { %2080 = vst [vmem:[#allocation85_spill] sm:$0xff] %v1569_v54  ;;  %2081 = vst [vmem:[#allocation86_spill] sm:$0xff] %v1575_v60  ;;  %v532_v58 = vor.u32 %v531_v28, %v528_v59  ;;  %v545_v15 = vrot.slane %v543_v32, 5  ;;  %v557_v22 = vshll.u32 %v1124_v53, 16  ;;  %v563_v19 = vshll.u32 %v105_v20, 16 }
  0x5c   :  { %2082 = vst [vmem:[#allocation87_spill] sm:$0xff] %v1586_v46  ;;  %v1589_v57 = vrot.slane %v549_v56, 5  ;;  %v556_v55 = vrot.slane %v554_v37, 4  ;;  %v568_v16 = vshrl.u32 %v1175_v30, 16  ;;  %v107_v9 = vld [vmem:[%s1906_s0 + $0x208] sm:$0x1] }
  0x5d   :  { %v1599_v44 = vrot.slane %v532_v58, 4  ;;  %v546_v59 = vor.u32 %v545_v15, %v542_v14  ;;  %v559_v28 = vrot.slane %v557_v22, 5  ;;  %v1601_v32 = vrot.slane %v563_v19, 5  ;;  %v108_v14 = vld [vmem:[%s1906_s0 + $0x218] sm:$0x1] }
  0x5e   :  { %v570_v56 = vrot.slane %v568_v16, 4  ;;  %v571_v20 = vshll.u32 %v1175_v30, 16  ;;  %v577_v37 = vshll.u32 %v106_v45, 16  ;;  %v582_v48 = vshrl.u32 %v1180_v25, 16 }
  0x5f   :  { %2083 = vst [vmem:[#allocation88_spill] sm:$0xff] %v1599_v44  ;;  %v1608_v31 = vrot.slane %v546_v59, 4  ;;  %v560_v54 = vor.u32 %v559_v28, %v556_v55  ;;  %v585_v16 = vshll.u32 %v1180_v25, 16  ;;  %v591_v45 = vshll.u32 %v107_v9, 16  ;;  %v109_v28 = vld [vmem:[%s1906_s0 + $0x228] sm:$0x1] }
  0x60   :  { %v573_v19 = vrot.slane %v571_v20, 5  ;;  %v1614_v58 = vrot.slane %v577_v37, 5  ;;  %v584_v59 = vrot.slane %v582_v48, 4  ;;  %v596_v55 = vshrl.u32 %v1196_v40, 16 }
  0x61   :  { %v552_v15 = vsel %vm1245_vm2, %v1608_v31, %v1589_v57  ;;  %v561_v22 = vrot.slane %v560_v54, 4  ;;  %v587_v20 = vrot.slane %v585_v16, 5  ;;  %v593_v37 = vrot.slane %v591_v45, 5 }
  0x62   :  { %v574_v53 = vor.u32 %v573_v19, %v570_v56  ;;  %v599_v30 = vshll.u32 %v1196_v40, 16  ;;  %v598_v25 = vrot.slane %v596_v55, 4  ;;  %v605_v60 = vshll.u32 %v108_v14, 16  ;;  %v2095_v55 = vld [vmem:[#allocation10_spill] sm:$0xff] }
  0x63   :  { %v566_v9 = vsel %vm1245_vm2, %v561_v22, %v1601_v32  ;;  %v610_v31 = vshrl.u32 %v1201_v39, 16  ;;  %v588_v57 = vor.u32 %v587_v20, %v584_v59  ;;  %v613_v44 = vshll.u32 %v1201_v39, 16  ;;  %v2098_v20 = vld [vmem:[#allocation4_spill] sm:$0xff] }
  0x64   :  { %v575_v54 = vrot.slane %v574_v53, 4  ;;  %v601_v48 = vrot.slane %v599_v30, 5  ;;  %v607_v47 = vrot.slane %v605_v60, 5  ;;  %v619_v56 = vshll.u32 %v109_v28, 16 }
  0x65   :  { %v612_v46 = vrot.slane %v610_v31, 4  ;;  %v2084_v19 = vmax.bf16 %v811_v0, %v841_v6  ;;  %v2085_v32 = vsel %vm1245_vm2, %v1250_v34, %v1234_v23  ;;  %v589_v14 = vrot.slane %v588_v57, 4  ;;  %v2099_v31 = vld [vmem:[#allocation11_spill] sm:$0xff] }
  0x66   :  { %v580_v53 = vsel %vm1245_vm2, %v575_v54, %v1614_v58  ;;  %v602_v30 = vor.u32 %v601_v48, %v598_v25  ;;  %v615_v45 = vrot.slane %v613_v44, 5  ;;  %v621_v22 = vrot.slane %v619_v56, 5  ;;  %v2090_v44 = vld [vmem:[#allocation2_spill] sm:$0xff]  ;;  %v2091_v58 = vld [vmem:[#allocation9_spill] sm:$0xff] }
  0x67   :  { %v657_v16 = vmax.bf16 %v2085_v32, %v2084_v19  ;;  %v2086_v60 = vmax.bf16 %v816_v1, %v846_v7  ;;  %v2087_v0 = vsel %vm1245_vm2, %v1257_v63, %v1236_v62  ;;  %v2088_v23 = vmax.bf16 %v821_v2, %v871_v12  ;;  %v2094_v12 = vld [vmem:[#allocation3_spill] sm:$0xff]  ;;  %v2104_v48 = vld [vmem:[#allocation5_spill] sm:$0xff] }
  0x68   :  { %v2089_v34 = vsel %vm1245_vm2, %v1259_v8, %v1252_v50  ;;  %v2092_v59 = vmax.bf16 %v2090_v44, %v2091_v58  ;;  %v2093_v1 = vsel %vm1245_vm2, %v1281_v51, %v1261_v5  ;;  %v594_v62 = vsel %vm1245_vm2, %v589_v14, %v593_v37  ;;  %v2101_v5 = vld [vmem:[#allocation64_spill] sm:$0xff]  ;;  %v2102_v51 = vld [vmem:[#allocation62_spill] sm:$0xff]  ;;  %v2107_v19 = vld [vmem:[#allocation63_spill] sm:$0xff] }
  0x69   :  { %v658_v6 = vmax.bf16 %v2087_v0, %v2086_v60  ;;  %v659_v25 = vmax.bf16 %v2089_v34, %v2088_v23  ;;  %v603_v63 = vrot.slane %v602_v30, 4  ;;  %v616_v2 = vor.u32 %v615_v45, %v612_v46  ;;  %v2105_v46 = vld [vmem:[#allocation15_spill] sm:$0xff]  ;;  %v2114_v23 = vld [vmem:[#allocation17_spill] sm:$0xff] }
  0x6a   :  { %v660_v7 = vmax.bf16 %v2093_v1, %v2092_v59  ;;  %v2096_v28 = vmax.bf16 %v2094_v12, %v2095_v55  ;;  %v2097_v8 = vsel %vm1245_vm2, %v1300_v42, %v1283_v18  ;;  %v2100_v54 = vmax.bf16 %v2098_v20, %v2099_v31  ;;  %v2109_v18 = vld [vmem:[#allocation6_spill] sm:$0xff]  ;;  %v2110_v42 = vld [vmem:[#allocation16_spill] sm:$0xff]  ;;  %v2113_v0 = vld [vmem:[#allocation7_spill] sm:$0xff] }
  0x6b   :  { %v2103_v57 = vsel %vm1245_vm2, %v2101_v5, %v2102_v51  ;;  %v2106_v56 = vmax.bf16 %v2104_v48, %v2105_v46  ;;  %v2108_v32 = vsel %vm1245_vm2, %v1322_v13, %v2107_v19  ;;  %v2111_v30 = vmax.bf16 %v2109_v18, %v2110_v42  ;;  %v2116_v44 = vld [vmem:[#allocation67_spill] sm:$0xff]  ;;  %v2117_v58 = vld [vmem:[#allocation65_spill] sm:$0xff]  ;;  %v2119_v55 = vld [vmem:[#allocation8_spill] sm:$0xff] }
  0x6c   :  { %v661_v50 = vmax.bf16 %v2097_v8, %v2096_v28  ;;  %v662_v37 = vmax.bf16 %v2103_v57, %v2100_v54  ;;  %v2112_v45 = vsel %vm1245_vm2, %v1339_v33, %v1315_v17  ;;  %v2115_v34 = vmax.bf16 %v2113_v0, %v2114_v23  ;;  %v2120_v28 = vld [vmem:[#allocation18_spill] sm:$0xff]  ;;  %v2122_v17 = vld [vmem:[#allocation68_spill] sm:$0xff]  ;;  %v2136_v42 = vld [vmem:[#allocation71_spill] sm:$0xff] }
  0x6d   :  { %v663_v14 = vmax.bf16 %v2108_v32, %v2106_v56  ;;  %v664_v60 = vmax.bf16 %v2112_v45, %v2111_v30  ;;  %v2118_v59 = vsel %vm1245_vm2, %v2116_v44, %v2117_v58  ;;  %v608_v13 = vsel %vm1245_vm2, %v603_v63, %v607_v47  ;;  %v2123_v33 = vld [vmem:[#allocation66_spill] sm:$0xff]  ;;  %v2125_v54 = vld [vmem:[#allocation12_spill] sm:$0xff]  ;;  %v2129_v47 = vld [vmem:[#allocation13_spill] sm:$0xff] }
  0x6e   :  { %v665_v1 = vmax.bf16 %v2118_v59, %v2115_v34  ;;  %v617_v12 = vrot.slane %v616_v2, 4  ;;  %v2121_v8 = vmax.bf16 %v2119_v55, %v2120_v28  ;;  %v2124_v20 = vsel %vm1245_vm2, %v2122_v17, %v2123_v33  ;;  %v2126_v5 = vld [vmem:[#allocation22_spill] sm:$0xff]  ;;  %v2130_v63 = vld [vmem:[#allocation23_spill] sm:$0xff]  ;;  %v2134_v32 = vld [vmem:[#allocation24_spill] sm:$0xff] }
  0x6f   :  { %v2127_v51 = vmax.bf16 %v2125_v54, %v2126_v5  ;;  %v2128_v57 = vsel %vm1245_vm2, %v1378_v4, %v1354_v3  ;;  %v2131_v2 = vmax.bf16 %v2129_v47, %v2130_v63  ;;  %v2132_v46 = vsel %vm1245_vm2, %v1391_v24, %v1367_v43  ;;  %v2133_v19 = vld [vmem:[#allocation14_spill] sm:$0xff]  ;;  %v2137_v30 = vld [vmem:[#allocation69_spill] sm:$0xff]  ;;  %v2139_v4 = vld [vmem:[#allocation19_spill] sm:$0xff] }
  0x70   :  { %v666_v31 = vmax.bf16 %v2124_v20, %v2121_v8  ;;  %v2135_v18 = vmax.bf16 %v2133_v19, %v2134_v32  ;;  %v2138_v45 = vsel %vm1245_vm2, %v2136_v42, %v2137_v30  ;;  %v2140_v3 = vld [vmem:[#allocation25_spill] sm:$0xff]  ;;  %v2142_v34 = vld [vmem:[#allocation72_spill] sm:$0xff]  ;;  %v2143_v44 = vld [vmem:[#allocation70_spill] sm:$0xff]  ;;  %v2148_v28 = vsel %vm1245_vm2, %v1430_v10, %v1406_v11 }
  0x71   :  { %v667_v48 = vmax.bf16 %v2128_v57, %v2127_v51  ;;  %v668_v56 = vmax.bf16 %v2132_v46, %v2131_v2  ;;  %v2141_v23 = vmax.bf16 %v2139_v4, %v2140_v3  ;;  %v2144_v58 = vsel %vm1245_vm2, %v2142_v34, %v2143_v44  ;;  %v2145_v43 = vld [vmem:[#allocation20_spill] sm:$0xff]  ;;  %v2146_v24 = vld [vmem:[#allocation29_spill] sm:$0xff]  ;;  %v2150_v20 = vld [vmem:[#allocation30_spill] sm:$0xff] }
  0x72   :  { %v669_v0 = vmax.bf16 %v2138_v45, %v2135_v18  ;;  %v2147_v55 = vmax.bf16 %v2145_v43, %v2146_v24  ;;  %v622_v17 = vsel %vm1245_vm2, %v617_v12, %v621_v22  ;;  %v2149_v33 = vld [vmem:[#allocation21_spill] sm:$0xff]  ;;  %v2152_v5 = vsel %vm1245_vm2, %v1443_v52, %v1419_v29  ;;  %v2153_v57 = vld [vmem:[#allocation26_spill] sm:$0xff]  ;;  %v2154_v47 = vld [vmem:[#allocation31_spill] sm:$0xff] }
  0x73   :  { %v670_v59 = vmax.bf16 %v2144_v58, %v2141_v23  ;;  %v2151_v54 = vmax.bf16 %v2149_v33, %v2150_v20  ;;  %v2155_v63 = vmax.bf16 %v2153_v57, %v2154_v47  ;;  %v2156_v2 = vld [vmem:[#allocation75_spill] sm:$0xff]  ;;  %v2157_v10 = vld [vmem:[#allocation73_spill] sm:$0xff]  ;;  %v2160_v22 = vld [vmem:[#allocation32_spill] sm:$0xff]  ;;  %v2168_v4 = vsel %vm1245_vm2, %v1482_v26, %v1458_v27 }
  0x74   :  { %v671_v8 = vmax.bf16 %v2148_v28, %v2147_v55  ;;  %v2158_v11 = vsel %vm1245_vm2, %v2156_v2, %v2157_v10  ;;  %v2159_v19 = vld [vmem:[#allocation27_spill] sm:$0xff]  ;;  %v2162_v32 = vld [vmem:[#allocation76_spill] sm:$0xff]  ;;  %v2163_v18 = vld [vmem:[#allocation74_spill] sm:$0xff]  ;;  %v2172_v58 = vsel %vm1245_vm2, %v1495_v21, %v1471_v38 }
  0x75   :  { %v672_v51 = vmax.bf16 %v2152_v5, %v2151_v54  ;;  %v673_v46 = vmax.bf16 %v2158_v11, %v2155_v63  ;;  %v2161_v12 = vmax.bf16 %v2159_v19, %v2160_v22  ;;  %v2164_v42 = vsel %vm1245_vm2, %v2162_v32, %v2163_v18  ;;  %v2165_v29 = vld [vmem:[#allocation28_spill] sm:$0xff]  ;;  %v2169_v23 = vld [vmem:[#allocation33_spill] sm:$0xff]  ;;  %v2173_v24 = vld [vmem:[#allocation34_spill] sm:$0xff] }
  0x76   :  { %v2166_v52 = vld [vmem:[#allocation36_spill] sm:$0xff]  ;;  %v2170_v34 = vld [vmem:[#allocation37_spill] sm:$0xff]  ;;  %v2174_v55 = vld [vmem:[#allocation38_spill] sm:$0xff]  ;;  %v2188_v19 = vsel %vm1245_vm2, %v1534_v35, %v1510_v36 }
  0x77   :  { %v674_v30 = vmax.bf16 %v2164_v42, %v2161_v12  ;;  %v2167_v45 = vmax.bf16 %v2165_v29, %v2166_v52  ;;  %v2171_v44 = vmax.bf16 %v2169_v23, %v2170_v34  ;;  %v2175_v28 = vmax.bf16 %v2173_v24, %v2174_v55  ;;  %v2176_v33 = vld [vmem:[#allocation79_spill] sm:$0xff]  ;;  %v2177_v20 = vld [vmem:[#allocation77_spill] sm:$0xff]  ;;  %v2182_v47 = vld [vmem:[#allocation80_spill] sm:$0xff] }
  0x78   :  { %v2178_v54 = vsel %vm1245_vm2, %v2176_v33, %v2177_v20  ;;  %v2179_v26 = vld [vmem:[#allocation35_spill] sm:$0xff]  ;;  %v2183_v63 = vld [vmem:[#allocation78_spill] sm:$0xff]  ;;  %v2185_v38 = vld [vmem:[#allocation40_spill] sm:$0xff]  ;;  %v2192_v42 = vsel %vm1245_vm2, %v1547_v61, %v1523_v49 }
  0x79   :  { %v675_v3 = vmax.bf16 %v2168_v4, %v2167_v45  ;;  %v676_v43 = vmax.bf16 %v2172_v58, %v2171_v44  ;;  %v677_v5 = vmax.bf16 %v2178_v54, %v2175_v28  ;;  %v2180_v27 = vld [vmem:[#allocation39_spill] sm:$0xff]  ;;  %v2184_v2 = vsel %vm1245_vm2, %v2182_v47, %v2183_v63  ;;  %v2189_v12 = vld [vmem:[#allocation41_spill] sm:$0xff]  ;;  %v2190_v32 = vld [vmem:[#allocation44_spill] sm:$0xff] }
  0x7a   :  { %v2181_v57 = vmax.bf16 %v2179_v26, %v2180_v27  ;;  %v2186_v21 = vld [vmem:[#allocation43_spill] sm:$0xff]  ;;  %v2191_v18 = vmax.bf16 %v2189_v12, %v2190_v32  ;;  %v2193_v52 = vld [vmem:[#allocation42_spill] sm:$0xff]  ;;  %v2194_v45 = vld [vmem:[#allocation45_spill] sm:$0xff] }
  0x7b   :  { %v2187_v11 = vmax.bf16 %v2185_v38, %v2186_v21  ;;  %v2195_v4 = vmax.bf16 %v2193_v52, %v2194_v45  ;;  %v2196_v23 = vld [vmem:[#allocation83_spill] sm:$0xff]  ;;  %v2197_v34 = vld [vmem:[#allocation81_spill] sm:$0xff]  ;;  %v2200_v36 = vld [vmem:[#allocation46_spill] sm:$0xff] }
  0x7c   :  { %v678_v10 = vmax.bf16 %v2184_v2, %v2181_v57  ;;  %v680_v29 = vmax.bf16 %v2192_v42, %v2191_v18  ;;  %v2198_v44 = vsel %vm1245_vm2, %v2196_v23, %v2197_v34  ;;  %v2199_v35 = vld [vmem:[#allocation47_spill] sm:$0xff]  ;;  %v2202_v55 = vld [vmem:[#allocation85_spill] sm:$0xff]  ;;  %v2203_v28 = vld [vmem:[#allocation82_spill] sm:$0xff] }
  0x7d   :  { %v679_v22 = vmax.bf16 %v2188_v19, %v2187_v11  ;;  %v681_v58 = vmax.bf16 %v2198_v44, %v2195_v4  ;;  %v2201_v24 = vmax.bf16 %v2199_v35, %v2200_v36  ;;  %v2204_v33 = vsel %vm1245_vm2, %v2202_v55, %v2203_v28  ;;  %v2205_v49 = vld [vmem:[#allocation48_spill] sm:$0xff]  ;;  %v2206_v61 = vld [vmem:[#allocation50_spill] sm:$0xff]  ;;  %v2208_v26 = vld [vmem:[#allocation87_spill] sm:$0xff] }
  0x7e   :  { %v2207_v54 = vmax.bf16 %v2205_v49, %v2206_v61  ;;  %v2209_v27 = vld [vmem:[#allocation84_spill] sm:$0xff]  ;;  %v2211_v63 = vld [vmem:[#allocation49_spill] sm:$0xff]  ;;  %v2212_v2 = vld [vmem:[#allocation51_spill] sm:$0xff] }
  0x7f   :  { %v682_v20 = vmax.bf16 %v2204_v33, %v2201_v24  ;;  %v2210_v57 = vsel %vm1245_vm2, %v2208_v26, %v2209_v27  ;;  %v2213_v38 = vmax.bf16 %v2211_v63, %v2212_v2  ;;  %v2214_v21 = vld [vmem:[#allocation88_spill] sm:$0xff]  ;;  %v2215_v11 = vld [vmem:[#allocation86_spill] sm:$0xff]  ;;  %v2220_v45 = vld [vmem:[#allocation55_spill] sm:$0xff]  ;;  %v692_v63 = vmax.bf16 %v660_v7, %v659_v25 }
  0x80   :  { %v683_v47 = vmax.bf16 %v2210_v57, %v2207_v54  ;;  %v2216_v19 = vsel %vm1245_vm2, %v2214_v21, %v2215_v11  ;;  %v2217_v32 = vld [vmem:[#allocation54_spill] sm:$0xff]  ;;  %v2218_v18 = vld [vmem:[#allocation52_spill] sm:$0xff]  ;;  %v2221_v4 = vld [vmem:[#allocation53_spill] sm:$0xff]  ;;  %v691_v57 = vmax.bf16 %v658_v6, %v657_v16  ;;  %v693_v2 = vmax.bf16 %v662_v37, %v661_v50 }
  0x81   :  { %v684_v12 = vmax.bf16 %v2216_v19, %v2213_v38  ;;  %v2219_v42 = vmax.bf16 %v2217_v32, %v2218_v18  ;;  %v2222_v23 = vmax.bf16 %v2220_v45, %v2221_v4  ;;  %v2223_v44 = vld [vmem:[#allocation56_spill] sm:$0xff]  ;;  %v2226_v55 = vld [vmem:[#allocation57_spill] sm:$0xff]  ;;  %v2229_v49 = vld [vmem:[#allocation58_spill] sm:$0xff]  ;;  %v695_v38 = vmax.bf16 %v666_v31, %v665_v1 }
  0x82   :  { %v2224_v35 = vld [vmem:[#allocation60_spill] sm:$0xff]  ;;  %v2227_v28 = vld [vmem:[#allocation61_spill] sm:$0xff]  ;;  %v2230_v61 = vmax.bf16 %v2229_v49, %v1196_v40  ;;  %v2231_v26 = vld [vmem:[#allocation59_spill] sm:$0xff]  ;;  %v696_v21 = vmax.bf16 %v668_v56, %v667_v48  ;;  %v697_v11 = vmax.bf16 %v670_v59, %v669_v0  ;;  %v699_v19 = vmax.bf16 %v675_v3, %v674_v30 }
  0x83   :  { %v685_v52 = vmax.bf16 %v552_v15, %v2219_v42  ;;  %v686_v34 = vmax.bf16 %v566_v9, %v2222_v23  ;;  %v2225_v36 = vmax.bf16 %v2223_v44, %v2224_v35  ;;  %v2228_v33 = vmax.bf16 %v2226_v55, %v2227_v28 }
  0x84   :  { %v689_v54 = vmax.bf16 %v608_v13, %v2230_v61  ;;  %v2232_v27 = vmax.bf16 %v2231_v26, %v1201_v39  ;;  %v694_v9 = vmax.bf16 %v664_v60, %v663_v14  ;;  %v700_v32 = vmax.bf16 %v677_v5, %v676_v43 }
  0x85   :  { %v687_v24 = vmax.bf16 %v580_v53, %v2225_v36  ;;  %v688_v41 = vmax.bf16 %v594_v62, %v2228_v33  ;;  %v698_v53 = vmax.bf16 %v672_v51, %v671_v8  ;;  %v701_v18 = vmax.bf16 %v679_v22, %v678_v10 }
  0x86   :  { %v690_v15 = vmax.bf16 %v622_v17, %v2232_v27  ;;  %v702_v62 = vmax.bf16 %v681_v58, %v680_v29  ;;  %v703_v42 = vmax.bf16 %v683_v47, %v682_v20  ;;  %v704_v45 = vmax.bf16 %v685_v52, %v684_v12 }
  0x87   :  { %v705_v40 = vmax.bf16 %v687_v24, %v686_v34  ;;  %v706_v13 = vmax.bf16 %v689_v54, %v688_v41  ;;  %v707_v4 = vmax.bf16 %v691_v57, %v659_v25  ;;  %v708_v23 = vmax.bf16 %v692_v63, %v661_v50 }
  0x88   :  { %v709_v39 = vmax.bf16 %v693_v2, %v663_v14  ;;  %v710_v17 = vmax.bf16 %v694_v9, %v665_v1  ;;  %v711_v16 = vmax.bf16 %v695_v38, %v667_v48  ;;  %v712_v6 = vmax.bf16 %v696_v21, %v669_v0 }
  0x89   :  { %v713_v7 = vmax.bf16 %v697_v11, %v671_v8  ;;  %v714_v37 = vmax.bf16 %v698_v53, %v673_v46  ;;  %v715_v60 = vmax.bf16 %v699_v19, %v676_v43  ;;  %v716_v31 = vmax.bf16 %v700_v32, %v678_v10 }
  0x8a   :  { %v717_v56 = vmax.bf16 %v701_v18, %v680_v29  ;;  %v718_v59 = vmax.bf16 %v702_v62, %v682_v20  ;;  %v719_v51 = vmax.bf16 %v703_v42, %v684_v12  ;;  %v720_v30 = vmax.bf16 %v704_v45, %v686_v34 }
  0x8b   :  { %v721_v3 = vmax.bf16 %v705_v40, %v688_v41  ;;  %v722_v5 = vmax.bf16 %v706_v13, %v690_v15  ;;  %v783_v22 = vcombine.low %v707_v4, %v708_v23  ;;  %v784_v58 = vcombine.low %v709_v39, %v710_v17 }
  0x8c   :  { %v786_v47 = vcombine.low %v711_v16, %v712_v6  ;;  %v788_v52 = vcombine.low %v713_v7, %v714_v37  ;;  %v790_v25 = vcombine.low %v715_v60, %v716_v31  ;;  %v792_v50 = vcombine.low %v717_v56, %v718_v59 }
  0x8d   :  { %v794_v14 = vcombine.low %v719_v51, %v720_v30  ;;  %v796_v1 = vcombine.low %v721_v3, %v722_v5  ;;  %747 = vst [vmem:[%s1907_s1] sm:$0xff] %v783_v22   ;;  %785 = vst [vmem:[%s1907_s1 + $0x8] sm:$0xff] %v784_v58  }
  0x8e   :  { %787 = vst [vmem:[%s1907_s1 + $0x10] sm:$0xff] %v786_v47   ;;  %789 = vst [vmem:[%s1907_s1 + $0x18] sm:$0xff] %v788_v52  }
  0x8f   :  { %791 = vst [vmem:[%s1907_s1 + $0x20] sm:$0xff] %v790_v25   ;;  %793 = vst [vmem:[%s1907_s1 + $0x28] sm:$0xff] %v792_v50  }
  0x90   :  { %795 = vst [vmem:[%s1907_s1 + $0x30] sm:$0xff] %v794_v14   ;;  %797 = vst [vmem:[%s1907_s1 + $0x38] sm:$0xff] %v796_v1  }

// kernel: densenet_forward.9
= control target key start
LH: loop header
LB: loop body
LE: loop exit
PB: predicated region body
PF: predicated region fallthrough
CT: control target
= control target key end

     0   :  { %s1411_s21 = smov 0   ;;  %s1820_s0 = inlined_call_operand.vmem [shape: f32[512,147], index: 0, kind: input, shape index: {}]   ;;  %s1821_s1 = inlined_call_operand.vmem [shape: bf16[147,128], index: 1, kind: input, shape index: {}]   ;;  %s1822_s2 = inlined_call_operand.vmem [shape: f32[1,147], index: 2, kind: input, shape index: {}]   ;;  %s1823_s3 = inlined_call_operand.vmem [shape: f32[1,147], index: 3, kind: input, shape index: {}]   ;;  %s1824_s4 = inlined_call_operand.vmem [shape: f32[1,128], index: 4, kind: input, shape index: {}]   ;;  %s1825_s5 = inlined_call_operand.vmem [shape: f32[1,128], index: 5, kind: input, shape index: {}]   ;;  %s1826_s6 = inlined_call_operand.vmem [shape: bf16[512,128], index: 6, kind: output, shape index: {}]  }
   0x1 LB: > { %s1126_s22 = sadd.s32 4294967295, %s1372_s21   ;;  %p1130_p0 = scmp.ge.s32.totalorder %s1372_s21, 1  ;;  %s1372_s21 = sphi %s1411_s21, %s16_s21  }
   0x2   : > { %p214_p1 = scmp.lt.s32.totalorder %s1372_s21, 3 }
   0x4   : > { %p215_p2 = pnand %p1130_p0, %p214_p1 }
   0x5   : > { %s1131_s29 = sshll.u32 (!%p215_p2), %s1126_s22, 5 }
   0x6   : > { %218 = sbr.rel (%p215_p2) target bundleno = 314 (0x13a), region = 44  ;;  %p246_p3 = scmp.lt.s32.totalorder (!%p215_p2), %s1131_s29, 63 }
   0xb   : > { %v1356_v0 = vld [vmem:[%s1821_s1 + $0x38] sm:$0xff]   ;;  %v1374_v1 = vmov 0   ;;  %v1357_v2 = vld [vmem:[%s1821_s1 + $0x30] sm:$0xff]   ;;  %v325_v3 = vlaneseq  ;;  %v1358_v4 = vld [vmem:[%s1821_s1 + $0x28] sm:$0xff]   ;;  %s1828_s29 = smov (!%p246_p3, %s1131_s29), 63  ;;  %vm583_vm0 = vcmask 154624  }
   0xc   : > { %639 = vmatprep.subr.bf16.mxu0 %v1374_v1  ;;  %1326 = vmatprep.subr.bf16.mxu1 %v1374_v1  ;;  %v1359_v6 = vld [vmem:[%s1821_s1 + $0x20] sm:$0xff]   ;;  %s1198_s12 = sshll.u32 %s1828_s29, 4  ;;  %v1360_v15 = vld [vmem:[%s1821_s1 + $0x18] sm:$0xff]   ;;  %v1361_v24 = vld [vmem:[%s1821_s1 + $0x10] sm:$0xff]   ;;  %vm632_vm1 = vcmask 1040384   ;;  %vm633_vm2 = vcmask 1041408  }
   0xd   : > { %640 = vmatpush1.bf16.msra.mxu0 %v1356_v0  ;;  %1336 = vmatpush1.bf16.msra.mxu1 %v1356_v0  ;;  %v1436_v5 = vshrl.u32 %v325_v3, 7  ;;  %v323_v7 = vld [vmem:[%s1822_s2] sm:$0x3]  ;;  %s1454_s15 = scalar_lea.vmem %s1820_s0, %s1198_s12  ;;  %v1362_v29 = vld [vmem:[%s1821_s1 + $0x8] sm:$0xff]   ;;  %v1375_v30 = vmov 65535   ;;  %s1135_s10 = sshll.u32 %s1828_s29, 2 }
   0xe   : > { %641 = vmatprep.subr.bf16.mxu0 %v1374_v1  ;;  %1327 = vmatprep.subr.bf16.mxu1 %v1374_v1  ;;  %v399_v8 = vld [vmem:[%s1823_s3] sm:$0x3]  ;;  %v260_v10 = vld [vmem:[%s1454_s15 + $0x8] sm:$0xff]  ;;  %v262_v11 = vld [vmem:[%s1454_s15 + $0x18] sm:$0xff]  ;;  %v634_v31 = vsel %vm632_vm1, 4294967295, %v1375_v30  ;;  %s1745_s13 = scalar_lea.vmem %s1826_s6, %s1135_s10 }
   0xf   : > { %v331_v9 = vsub.s32 1, %v1436_v5  ;;  %v292_v14 = vld [vmem:[%s1454_s15 + $0x108] sm:$0xff]  ;;  %v294_v16 = vld [vmem:[%s1454_s15 + $0x118] sm:$0xff]  ;;  %v327_v27 = vsub.s32 0, %v1436_v5  ;;  %v1363_v34 = vld [vmem:[%s1821_s1] sm:$0xff]   ;;  %v635_v35 = vsel %vm633_vm2, %v634_v31, 0 }
  0x10   : > { %v1364_v32 = vld [vmem:[%s1821_s1 + $0x48] ss:$0 sps:$4 sm:$0x33]   ;;  %v259_v36 = vld [vmem:[%s1454_s15] sm:$0xff]  ;;  %v261_v37 = vld [vmem:[%s1454_s15 + $0x10] sm:$0xff] }
  0x11   : > { %642 = vmatpush1.bf16.msra.mxu0 %v1357_v2  ;;  %1337 = vmatpush1.bf16.msra.mxu1 %v1357_v2  ;;  %v1458_v12 = vrot.slane %v323_v7, %v331_v9  ;;  %v1460_v13 = vrot.slane %v399_v8, %v331_v9  ;;  %v1492_v33 = vrot.slane %v323_v7, %v327_v27  ;;  %v291_v38 = vld [vmem:[%s1454_s15 + $0x100] sm:$0xff]  ;;  %v293_v39 = vld [vmem:[%s1454_s15 + $0x110] sm:$0xff]  ;;  %v264_v40 = vld [vmem:[%s1454_s15 + $0x28] sm:$0xff] }
  0x12   : > { %643 = vmatprep.subr.bf16.mxu0 %v1374_v1  ;;  %1328 = vmatprep.subr.bf16.mxu1 %v1374_v1  ;;  %v266_v41 = vld [vmem:[%s1454_s15 + $0x38] sm:$0xff]  ;;  %v296_v42 = vld [vmem:[%s1454_s15 + $0x128] sm:$0xff]  ;;  %v637_v44 = vand.u32 %v1364_v32, %v635_v35  ;;  %v1508_v45 = vrot.slane %v399_v8, %v327_v27  ;;  %v263_v55 = vld [vmem:[%s1454_s15 + $0x20] sm:$0xff] }
  0x13   : > { %v336_v17 = vmul.f32 %v1458_v12, %v260_v10  ;;  %v338_v18 = vmul.f32 %v1458_v12, %v262_v11  ;;  %v368_v19 = vmul.f32 %v1458_v12, %v292_v14  ;;  %v370_v20 = vmul.f32 %v1458_v12, %v294_v16  ;;  %v298_v43 = vld [vmem:[%s1454_s15 + $0x138] sm:$0xff]  ;;  %v265_v56 = vld [vmem:[%s1454_s15 + $0x30] sm:$0xff]  ;;  %v295_v57 = vld [vmem:[%s1454_s15 + $0x120] sm:$0xff] }
  0x14   : > { %v335_v46 = vmul.f32 %v1492_v33, %v259_v36  ;;  %v337_v47 = vmul.f32 %v1492_v33, %v261_v37  ;;  %v367_v48 = vmul.f32 %v1492_v33, %v291_v38  ;;  %v369_v49 = vmul.f32 %v1492_v33, %v293_v39  ;;  %v297_v62 = vld [vmem:[%s1454_s15 + $0x130] sm:$0xff]  ;;  %v268_v63 = vld [vmem:[%s1454_s15 + $0x48] sm:$0xff]  ;;  %v270_v0 = vld [vmem:[%s1454_s15 + $0x58] sm:$0xff] }
  0x15   : > { %644 = vmatpush1.bf16.msra.mxu0 %v1358_v4  ;;  %1338 = vmatpush1.bf16.msra.mxu1 %v1358_v4  ;;  %v412_v21 = vadd.f32 %v1460_v13, %v336_v17  ;;  %v414_v22 = vadd.f32 %v1460_v13, %v338_v18  ;;  %v444_v23 = vadd.f32 %v1460_v13, %v368_v19  ;;  %v1365_v2 = vld [vmem:[%s1821_s1 + $0x40] sm:$0xff]   ;;  %v302_v9 = vld [vmem:[%s1454_s15 + $0x158] sm:$0xff]  ;;  %v272_v31 = vld [vmem:[%s1454_s15 + $0x68] sm:$0xff] }
  0x16   : > { %645 = vmatprep.subr.bf16.mxu0 %v1374_v1  ;;  %1329 = vmatprep.subr.bf16.mxu1 %v1374_v1  ;;  %v446_v25 = vadd.f32 %v1460_v13, %v370_v20  ;;  %v340_v50 = vmul.f32 %v1458_v12, %v264_v40  ;;  %v342_v51 = vmul.f32 %v1458_v12, %v266_v41  ;;  %v274_v32 = vld [vmem:[%s1454_s15 + $0x78] sm:$0xff]  ;;  %v304_v40 = vld [vmem:[%s1454_s15 + $0x168] sm:$0xff] }
  0x17   : > { %v476_v26 = vpack.c.bf16 %v414_v22, %v412_v21  ;;  %v372_v52 = vmul.f32 %v1458_v12, %v296_v42  ;;  %v374_v53 = vmul.f32 %v1458_v12, %v298_v43  ;;  %v411_v54 = vadd.f32 %v1508_v45, %v335_v46  ;;  %v267_v21 = vld [vmem:[%s1454_s15 + $0x40] sm:$0xff]  ;;  %v269_v22 = vld [vmem:[%s1454_s15 + $0x50] sm:$0xff]  ;;  %v306_v41 = vld [vmem:[%s1454_s15 + $0x178] sm:$0xff] }
  0x18   : > { %v492_v28 = vpack.c.bf16 %v446_v25, %v444_v23  ;;  %v413_v58 = vadd.f32 %v1508_v45, %v337_v47  ;;  %v443_v59 = vadd.f32 %v1508_v45, %v367_v48  ;;  %v445_v60 = vadd.f32 %v1508_v45, %v369_v49  ;;  %v299_v25 = vld [vmem:[%s1454_s15 + $0x140] sm:$0xff] }
  0x19   : > { %646 = vmatpush1.bf16.msra.mxu0 %v1359_v6  ;;  %1339 = vmatpush1.bf16.msra.mxu1 %v1359_v6  ;;  %v416_v61 = vadd.f32 %v1460_v13, %v340_v50  ;;  %v418_v3 = vadd.f32 %v1460_v13, %v342_v51  ;;  %v448_v4 = vadd.f32 %v1460_v13, %v372_v52  ;;  %v300_v6 = vld [vmem:[%s1454_s15 + $0x148] sm:$0xff] }
  0x1a   : > { %647 = vmatprep.subr.bf16.mxu0 %v1374_v1  ;;  %1330 = vmatprep.subr.bf16.mxu1 %v1374_v1  ;;  %v450_v5 = vadd.f32 %v1460_v13, %v374_v53  ;;  %v339_v7 = vmul.f32 %v1492_v33, %v263_v55  ;;  %v341_v8 = vmul.f32 %v1492_v33, %v265_v56 }
  0x1b   : > { %1146 = vmatprep.mubr.msk.bf16.mxu0 %vm583_vm0, %v476_v26  ;;  %1154 = vmatprep.mubr.msk.bf16.mxu1 %vm583_vm0, %v492_v28  ;;  %v371_v10 = vmul.f32 %v1492_v33, %v295_v57  ;;  %v373_v11 = vmul.f32 %v1492_v33, %v297_v62  ;;  %v344_v14 = vmul.f32 %v1458_v12, %v268_v63  ;;  %v301_v26 = vld [vmem:[%s1454_s15 + $0x150] sm:$0xff]  ;;  %v271_v57 = vld [vmem:[%s1454_s15 + $0x60] sm:$0xff]  ;;  %v276_v63 = vld [vmem:[%s1454_s15 + $0x88] sm:$0xff] }
  0x1c   : > { %v475_v16 = vpack.c.bf16 %v413_v58, %v411_v54  ;;  %v491_v17 = vpack.c.bf16 %v445_v60, %v443_v59  ;;  %v478_v18 = vpack.c.bf16 %v418_v3, %v416_v61  ;;  %v494_v19 = vpack.c.bf16 %v450_v5, %v448_v4  ;;  %v273_v58 = vld [vmem:[%s1454_s15 + $0x70] sm:$0xff]  ;;  %v303_v59 = vld [vmem:[%s1454_s15 + $0x160] sm:$0xff]  ;;  %v278_v5 = vld [vmem:[%s1454_s15 + $0x98] sm:$0xff] }
  0x1d   : > { %648 = vmatpush1.bf16.msra.mxu0 %v1360_v15  ;;  %1340 = vmatpush1.bf16.msra.mxu1 %v1360_v15  ;;  %v346_v15 = vmul.f32 %v1458_v12, %v270_v0  ;;  %v378_v20 = vmul.f32 %v1458_v12, %v302_v9  ;;  %v415_v23 = vadd.f32 %v1508_v45, %v339_v7  ;;  %v305_v60 = vld [vmem:[%s1454_s15 + $0x170] sm:$0xff]  ;;  %v288_v0 = vld [vmem:[%s1454_s15 + $0xe8] sm:$0xff] }
  0x1e   : > { %649 = vmatprep.subr.bf16.mxu0 %v1374_v1  ;;  %1331 = vmatprep.subr.bf16.mxu1 %v1374_v1  ;;  %v447_v27 = vadd.f32 %v1508_v45, %v371_v10  ;;  %v449_v28 = vadd.f32 %v1508_v45, %v373_v11  ;;  %v343_v35 = vmul.f32 %v1492_v33, %v267_v21  ;;  %v320_v7 = vld [vmem:[%s1454_s15 + $0x1e8] sm:$0xff] }
  0x1f   : > { %v422_v30 = vadd.f32 %v1460_v13, %v346_v15  ;;  %v345_v36 = vmul.f32 %v1492_v33, %v269_v22  ;;  %v454_v37 = vadd.f32 %v1460_v13, %v378_v20  ;;  %v375_v38 = vmul.f32 %v1492_v33, %v299_v25  ;;  %v322_v15 = vld [vmem:[%s1454_s15 + $0x1f8] sm:$0xff] }
  0x20   : > { %v377_v39 = vmul.f32 %v1492_v33, %v301_v26  ;;  %v348_v42 = vmul.f32 %v1458_v12, %v272_v31  ;;  %v350_v43 = vmul.f32 %v1458_v12, %v274_v32  ;;  %v493_v46 = vpack.c.bf16 %v449_v28, %v447_v27  ;;  %v275_v31 = vld [vmem:[%s1454_s15 + $0x80] sm:$0xff] }
  0x21   : > { %650 = vmatpush1.bf16.msra.mxu0 %v1361_v24  ;;  %1341 = vmatpush1.bf16.msra.mxu1 %v1361_v24  ;;  %v417_v24 = vadd.f32 %v1508_v45, %v341_v8  ;;  %v419_v48 = vadd.f32 %v1508_v45, %v343_v35  ;;  %v380_v49 = vmul.f32 %v1458_v12, %v304_v40  ;;  %v309_v40 = vld [vmem:[%s1454_s15 + $0x190] sm:$0xff] }
  0x22   : > { %651 = vmatprep.subr.bf16.mxu0 %v1374_v1  ;;  %1332 = vmatprep.subr.bf16.mxu1 %v1374_v1  ;;  %v382_v50 = vmul.f32 %v1458_v12, %v306_v41  ;;  %v421_v52 = vadd.f32 %v1508_v45, %v345_v36  ;;  %v451_v53 = vadd.f32 %v1508_v45, %v375_v38  ;;  %v277_v38 = vld [vmem:[%s1454_s15 + $0x90] sm:$0xff] }
  0x23   : > { %v453_v54 = vadd.f32 %v1508_v45, %v377_v39  ;;  %v424_v55 = vadd.f32 %v1460_v13, %v348_v42  ;;  %v426_v56 = vadd.f32 %v1460_v13, %v350_v43  ;;  %v456_v61 = vadd.f32 %v1460_v13, %v380_v49  ;;  %v307_v39 = vld [vmem:[%s1454_s15 + $0x180] sm:$0xff]  ;;  %v280_v43 = vld [vmem:[%s1454_s15 + $0xa8] sm:$0xff] }
  0x24   : > { %v458_v62 = vadd.f32 %v1460_v13, %v382_v50  ;;  %v479_v3 = vpack.c.bf16 %v421_v52, %v419_v48  ;;  %v347_v9 = vmul.f32 %v1492_v33, %v271_v57  ;;  %v349_v10 = vmul.f32 %v1492_v33, %v273_v58  ;;  %v314_v48 = vld [vmem:[%s1454_s15 + $0x1b8] sm:$0xff] }
  0x25   : > { %652 = vmatpush1.bf16.msra.mxu0 %v1362_v29  ;;  %1342 = vmatpush1.bf16.msra.mxu1 %v1362_v29  ;;  %v420_v29 = vadd.f32 %v1460_v13, %v344_v14  ;;  %v495_v4 = vpack.c.bf16 %v453_v54, %v451_v53  ;;  %v482_v8 = vpack.c.bf16 %v426_v56, %v424_v55  ;;  %v310_v14 = vld [vmem:[%s1454_s15 + $0x198] sm:$0xff] }
  0x26   : > { %653 = vmatprep.subr.bf16.mxu0 %v1374_v1  ;;  %1333 = vmatprep.subr.bf16.mxu1 %v1374_v1  ;;  %v379_v11 = vmul.f32 %v1492_v33, %v303_v59  ;;  %v354_v20 = vmul.f32 %v1458_v12, %v278_v5  ;;  %v396_v22 = vmul.f32 %v1458_v12, %v320_v7  ;;  %v281_v5 = vld [vmem:[%s1454_s15 + $0xb0] sm:$0xff] }
  0x27   : > { %v480_v47 = vpack.c.bf16 %v422_v30, %v420_v29  ;;  %v398_v26 = vmul.f32 %v1458_v12, %v322_v15  ;;  %v423_v27 = vadd.f32 %v1508_v45, %v347_v9  ;;  %v425_v29 = vadd.f32 %v1508_v45, %v349_v10  ;;  %v313_v9 = vld [vmem:[%s1454_s15 + $0x1b0] sm:$0xff]  ;;  %v284_v10 = vld [vmem:[%s1454_s15 + $0xc8] sm:$0xff]  ;;  %v318_v15 = vld [vmem:[%s1454_s15 + $0x1d8] sm:$0xff] }
  0x28   : > { %v1617_v28 = vadd.f32 %v1460_v13, %v396_v22  ;;  %v455_v30 = vadd.f32 %v1508_v45, %v379_v11  ;;  %v351_v49 = vmul.f32 %v1492_v33, %v275_v31  ;;  %v353_v50 = vmul.f32 %v1492_v33, %v277_v38  ;;  %v286_v11 = vld [vmem:[%s1454_s15 + $0xd8] sm:$0xff]  ;;  %v283_v38 = vld [vmem:[%s1454_s15 + $0xc0] sm:$0xff] }
  0x29   : > { %654 = vmatpush1.bf16.msra.mxu0 %v1363_v34  ;;  %1343 = vmatpush1.bf16.msra.mxu1 %v1363_v34  ;;  %v385_v52 = vmul.f32 %v1492_v33, %v309_v40  ;;  %v481_v53 = vpack.c.bf16 %v425_v29, %v423_v27  ;;  %v356_v55 = vmul.f32 %v1458_v12, %v280_v43  ;;  %v317_v43 = vld [vmem:[%s1454_s15 + $0x1d0] sm:$0xff] }
  0x2a   : > { %667 = vmatprep.subr.bf16.mxu0 %v1374_v1  ;;  %1334 = vmatprep.subr.bf16.mxu1 %v1374_v1  ;;  %v360_v22 = vmul.f32 %v1458_v12, %v284_v10  ;;  %v394_v29 = vmul.f32 %v1458_v12, %v318_v15 }
  0x2d   : > { %668 = vmatpush2.bf16.msra.mxu0 %v637_v44  ;;  %1344 = vmatpush2.bf16.msra.mxu1 %v637_v44  ;;  %v477_v44 = vpack.c.bf16 %v417_v24, %v415_v23  ;;  %v386_v23 = vmul.f32 %v1458_v12, %v310_v14  ;;  %v316_v14 = vld [vmem:[%s1454_s15 + $0x1c8] sm:$0xff] }
  0x2e   : > { %669 = vmatprep.subr.bf16.mxu0 %v1374_v1  ;;  %1335 = vmatprep.subr.bf16.mxu1 %v1374_v1  ;;  %v376_v1 = vmul.f32 %v1458_v12, %v300_v6  ;;  %v308_v6 = vld [vmem:[%s1454_s15 + $0x188] sm:$0xff]  ;;  %v392_v27 = vmul.f32 %v1458_v12, %v316_v14 }
  0x2f   : > { %v384_v21 = vmul.f32 %v1458_v12, %v308_v6  ;;  %v462_v42 = vadd.f32 %v1460_v13, %v386_v23 }
  0x30   : > { %v452_v34 = vadd.f32 %v1460_v13, %v376_v1  ;;  %v364_v1 = vmul.f32 %v1458_v12, %v288_v0  ;;  %v461_v0 = vadd.f32 %v1508_v45, %v385_v52  ;;  %v468_v40 = vadd.f32 %v1460_v13, %v392_v27 }
  0x31   : > { %670 = vmatpush2.bf16.msra.mxu0 %v1365_v2  ;;  %1345 = vmatpush2.bf16.msra.mxu1 %v1365_v2  ;;  %v290_v2 = vld [vmem:[%s1454_s15 + $0xf8] sm:$0xff]  ;;  %v460_v41 = vadd.f32 %v1460_v13, %v384_v21  ;;  %v389_v21 = vmul.f32 %v1492_v33, %v313_v9  ;;  %v1724_v9 = vld [vmem:[%s1824_s4] ss:$0 sm:$0xff] }
  0x32   : > { %v496_v51 = vpack.c.bf16 %v454_v37, %v452_v34  ;;  %v1609_v24 = vadd.f32 %v1460_v13, %v364_v1  ;;  %v1625_v34 = vadd.f32 %v1460_v13, %v398_v26  ;;  %v430_v37 = vadd.f32 %v1460_v13, %v354_v20 }
  0x33   : > { %v500_v58 = vpack.c.bf16 %v462_v42, %v460_v41  ;;  %v362_v26 = vmul.f32 %v1458_v12, %v286_v11  ;;  %v470_v41 = vadd.f32 %v1460_v13, %v394_v29  ;;  %v315_v42 = vld [vmem:[%s1454_s15 + $0x1c0] sm:$0xff] }
  0x34   : > { %672 = vmatmul.mubr.bf16.vlgmr.msra.gmra.mxu0 %v475_v16  ;;  %736 = vmatmul.mubr.bf16.vlgmr.msra.gmra.mxu1 %v491_v17  ;;  %v381_v16 = vmul.f32 %v1492_v33, %v305_v60  ;;  %v352_v17 = vmul.f32 %v1458_v12, %v276_v63  ;;  %v390_v60 = vmul.f32 %v1458_v12, %v314_v48 }
  0x35   : > { %1147 = vmatprep.mubr.msk.bf16.mxu0 %vm583_vm0, %v478_v18  ;;  %1155 = vmatprep.mubr.msk.bf16.mxu1 %vm583_vm0, %v494_v19  ;;  %v366_v18 = vmul.f32 %v1458_v12, %v290_v2  ;;  %v498_v19 = vpack.c.bf16 %v458_v62, %v456_v61  ;;  %v427_v61 = vadd.f32 %v1508_v45, %v351_v49 }
  0x36   : > { %v457_v35 = vadd.f32 %v1508_v45, %v381_v16  ;;  %v428_v36 = vadd.f32 %v1460_v13, %v352_v17  ;;  %v429_v62 = vadd.f32 %v1508_v45, %v353_v50  ;;  %v432_v2 = vadd.f32 %v1460_v13, %v356_v55 }
  0x37   : > { %v1612_v25 = vadd.f32 %v1460_v13, %v366_v18  ;;  %v466_v7 = vadd.f32 %v1460_v13, %v390_v60  ;;  %v357_v18 = vmul.f32 %v1492_v33, %v281_v5  ;;  %v391_v50 = vmul.f32 %v1492_v33, %v315_v42  ;;  %v321_v60 = vld [vmem:[%s1454_s15 + $0x1f0] sm:$0xff] }
  0x38   : > { %v497_v54 = vpack.c.bf16 %v457_v35, %v455_v30  ;;  %v484_v57 = vpack.c.bf16 %v430_v37, %v428_v36  ;;  %v483_v16 = vpack.c.bf16 %v429_v62, %v427_v61  ;;  %v465_v36 = vadd.f32 %v1508_v45, %v389_v21 }
  0x39   : > { %v490_v32 = vpack.c.bf16 %v1612_v25, %v1609_v24  ;;  %v433_v31 = vadd.f32 %v1508_v45, %v357_v18  ;;  %v436_v37 = vadd.f32 %v1460_v13, %v360_v22  ;;  %v467_v55 = vadd.f32 %v1508_v45, %v391_v50  ;;  %v1730_v25 = vld [vmem:[%s1825_s5] ss:$0 sm:$0xff] }
  0x3c   : > { %680 = vmatmul.mubr.bf16.gmra.mxu0 %v477_v44  ;;  %744 = vmatmul.mubr.bf16.gmra.mxu1 %v493_v46  ;;  %v282_v44 = vld [vmem:[%s1454_s15 + $0xb8] sm:$0xff]  ;;  %v506_v46 = vpack.c.bf16 %v1625_v34, %v1617_v28 }
  0x3d   : > { %1148 = vmatprep.mubr.msk.bf16.mxu0 %vm583_vm0, %v480_v47  ;;  %1156 = vmatprep.mubr.msk.bf16.mxu1 %vm583_vm0, %v496_v51  ;;  %v312_v47 = vld [vmem:[%s1454_s15 + $0x1a8] sm:$0xff]  ;;  %v383_v51 = vmul.f32 %v1492_v33, %v307_v39  ;;  %v358_v56 = vmul.f32 %v1458_v12, %v282_v44  ;;  %v285_v39 = vld [vmem:[%s1454_s15 + $0xd0] sm:$0xff]  ;;  %v359_v44 = vmul.f32 %v1492_v33, %v283_v38 }
  0x3e   : > { %v388_v59 = vmul.f32 %v1458_v12, %v312_v47  ;;  %v438_v12 = vadd.f32 %v1460_v13, %v362_v26  ;;  %v361_v47 = vmul.f32 %v1492_v33, %v285_v39 }
  0x3f   : > { %v459_v63 = vadd.f32 %v1508_v45, %v383_v51  ;;  %v393_v51 = vmul.f32 %v1492_v33, %v317_v43 }
  0x40   : > { %v464_v6 = vadd.f32 %v1460_v13, %v388_v59  ;;  %v488_v52 = vpack.c.bf16 %v438_v12, %v436_v37  ;;  %v319_v59 = vld [vmem:[%s1454_s15 + $0x1e0] sm:$0xff] }
  0x41   : > { %v499_v17 = vpack.c.bf16 %v461_v0, %v459_v63 }
  0x42   : > { %v502_v23 = vpack.c.bf16 %v466_v7, %v464_v6 }
  0x44   : > { %688 = vmatmul.mubr.bf16.gmra.mxu0 %v479_v3  ;;  %752 = vmatmul.mubr.bf16.gmra.mxu1 %v495_v4  ;;  %v434_v3 = vadd.f32 %v1460_v13, %v358_v56  ;;  %v279_v4 = vld [vmem:[%s1454_s15 + $0xa0] sm:$0xff]  ;;  %v435_v13 = vadd.f32 %v1508_v45, %v359_v44  ;;  %v469_v56 = vadd.f32 %v1508_v45, %v393_v51 }
  0x45   : > { %1149 = vmatprep.mubr.msk.bf16.mxu0 %vm583_vm0, %v482_v8  ;;  %1157 = vmatprep.mubr.msk.bf16.mxu1 %vm583_vm0, %v498_v19  ;;  %v311_v8 = vld [vmem:[%s1454_s15 + $0x1a0] sm:$0xff]  ;;  %v355_v1 = vmul.f32 %v1492_v33, %v279_v4 }
  0x46   : > { %v486_v19 = vpack.c.bf16 %v434_v3, %v432_v2  ;;  %v387_v20 = vmul.f32 %v1492_v33, %v311_v8  ;;  %v503_v63 = vpack.c.bf16 %v469_v56, %v467_v55  ;;  %v395_v2 = vmul.f32 %v1492_v33, %v319_v59 }
  0x47   : > { %v431_v30 = vadd.f32 %v1508_v45, %v355_v1  ;;  %v397_v3 = vmul.f32 %v1492_v33, %v321_v60 }
  0x48   : > { %v463_v35 = vadd.f32 %v1508_v45, %v387_v20  ;;  %v471_v6 = vadd.f32 %v1508_v45, %v395_v2 }
  0x49   : > { %v485_v48 = vpack.c.bf16 %v433_v31, %v431_v30  ;;  %v473_v7 = vadd.f32 %v1508_v45, %v397_v3 }
  0x4a   : > { %v501_v49 = vpack.c.bf16 %v465_v36, %v463_v35 }
  0x4b   : > { %v505_v8 = vpack.c.bf16 %v473_v7, %v471_v6 }
  0x4c   : > { %696 = vmatmul.mubr.bf16.gmra.mxu0 %v481_v53  ;;  %760 = vmatmul.mubr.bf16.gmra.mxu1 %v497_v54  ;;  %v504_v53 = vpack.c.bf16 %v470_v41, %v468_v40  ;;  %v437_v54 = vadd.f32 %v1508_v45, %v361_v47 }
  0x4d   : > { %1150 = vmatprep.mubr.msk.bf16.mxu0 %vm583_vm0, %v484_v57  ;;  %1158 = vmatprep.mubr.msk.bf16.mxu1 %vm583_vm0, %v500_v58  ;;  %v287_v57 = vld [vmem:[%s1454_s15 + $0xe0] sm:$0xff]  ;;  %v289_v58 = vld [vmem:[%s1454_s15 + $0xf0] sm:$0xff] }
  0x4e   : > { %v487_v61 = vpack.c.bf16 %v437_v54, %v435_v13  ;;  %v363_v62 = vmul.f32 %v1492_v33, %v287_v57  ;;  %v365_v0 = vmul.f32 %v1492_v33, %v289_v58 }
  0x50   : > { %v439_v4 = vadd.f32 %v1508_v45, %v363_v62  ;;  %v441_v5 = vadd.f32 %v1508_v45, %v365_v0 }
  0x52   : > { %v489_v33 = vpack.c.bf16 %v441_v5, %v439_v4 }
  0x54   : > { %704 = vmatmul.mubr.bf16.gmra.mxu0 %v483_v16  ;;  %768 = vmatmul.mubr.bf16.gmra.mxu1 %v499_v17 }
  0x55   : > { %1151 = vmatprep.mubr.msk.bf16.mxu0 %vm583_vm0, %v486_v19  ;;  %1159 = vmatprep.mubr.msk.bf16.mxu1 %vm583_vm0, %v502_v23 }
  0x5c   : > { %712 = vmatmul.mubr.bf16.gmra.mxu0 %v485_v48  ;;  %776 = vmatmul.mubr.bf16.gmra.mxu1 %v501_v49 }
  0x5d   : > { %1152 = vmatprep.mubr.msk.bf16.mxu0 %vm583_vm0, %v488_v52  ;;  %1160 = vmatprep.mubr.msk.bf16.mxu1 %vm583_vm0, %v504_v53 }
  0x64   : > { %720 = vmatmul.mubr.bf16.gmra.mxu0 %v487_v61  ;;  %784 = vmatmul.mubr.bf16.gmra.mxu1 %v503_v63 }
  0x65   : > { %1153 = vmatprep.mubr.msk.bf16.mxu0 %vm583_vm0, %v490_v32  ;;  %1161 = vmatprep.mubr.msk.bf16.mxu1 %vm583_vm0, %v506_v46 }
  0x6c   : > { %728 = vmatmul.mubr.bf16.gmra.mxu0 %v489_v33  ;;  %792 = vmatmul.mubr.bf16.gmra.mxu1 %v505_v8 }
  0xf4   : > { %v673_v45 = vpop.f32.mrf.mxu0  ;;  %v737_v10 = vpop.f32.mrf.mxu1 }
  0xf5   : > { %v807_v24 = vmul.f32 %v1724_v9, %v673_v45  ;;  %v823_v28 = vmul.f32 %v1724_v9, %v737_v10 }
  0xf6   : > { %v675_v32 = vpop.f32.mrf.mxu0  ;;  %v739_v34 = vpop.f32.mrf.mxu1 }
  0xf7   : > { %v846_v46 = vadd.f32 %v1730_v25, %v807_v24  ;;  %v862_v11 = vadd.f32 %v1730_v25, %v823_v28 }
  0xf8   : > { %v676_v14 = vpop.f32.mrf.mxu0  ;;  %v740_v15 = vpop.f32.mrf.mxu1 }
  0xf9   : > { %v808_v16 = vmul.f32 %v1724_v9, %v676_v14  ;;  %v824_v17 = vmul.f32 %v1724_v9, %v740_v15  ;;  %v878_v21 = vmax.f32 %v846_v46, 0.0  ;;  %v894_v22 = vmax.f32 %v862_v11, 0.0 }
  0xfa   : > { %v678_v1 = vpop.f32.mrf.mxu0  ;;  %v742_v18 = vpop.f32.mrf.mxu1 }
  0xfb   : > { %v847_v19 = vadd.f32 %v1730_v25, %v808_v16  ;;  %v863_v20 = vadd.f32 %v1730_v25, %v824_v17 }
  0xfc   : > { %v681_v23 = vpop.f32.mrf.mxu0  ;;  %v745_v26 = vpop.f32.mrf.mxu1 }
  0xfd   : > { %v879_v27 = vmax.f32 %v847_v19, 0.0  ;;  %v895_v29 = vmax.f32 %v863_v20, 0.0  ;;  %v809_v30 = vmul.f32 %v1724_v9, %v681_v23  ;;  %v825_v31 = vmul.f32 %v1724_v9, %v745_v26 }
  0xfe   : > { %v683_v35 = vpop.f32.mrf.mxu0  ;;  %v747_v36 = vpop.f32.mrf.mxu1 }
  0xff   : > { %v1234_v37 = vpack.c.bf16 %v879_v27, %v878_v21  ;;  %v1274_v38 = vpack.c.bf16 %v895_v29, %v894_v22  ;;  %v848_v39 = vadd.f32 %v1730_v25, %v809_v30  ;;  %v864_v12 = vadd.f32 %v1730_v25, %v825_v31 }
 0x100   : > { %v684_v40 = vpop.f32.mrf.mxu0  ;;  %v748_v41 = vpop.f32.mrf.mxu1 }
 0x101   : > { %1235 = vst [vmem:[%s1745_s13] sm:$0xff] %v1234_v37   ;;  %1318 = vst [vmem:[%s1745_s13 + $0x40] sm:$0xff] %v1274_v38   ;;  %v810_v42 = vmul.f32 %v1724_v9, %v684_v40  ;;  %v826_v43 = vmul.f32 %v1724_v9, %v748_v41  ;;  %v880_v50 = vmax.f32 %v848_v39, 0.0  ;;  %v896_v51 = vmax.f32 %v864_v12, 0.0 }
 0x102   : > { %v686_v44 = vpop.f32.mrf.mxu0  ;;  %v750_v47 = vpop.f32.mrf.mxu1 }
 0x103   : > { %v849_v48 = vadd.f32 %v1730_v25, %v810_v42  ;;  %v865_v49 = vadd.f32 %v1730_v25, %v826_v43 }
 0x104   : > { %v689_v52 = vpop.f32.mrf.mxu0  ;;  %v753_v53 = vpop.f32.mrf.mxu1 }
 0x105   : > { %v881_v13 = vmax.f32 %v849_v48, 0.0  ;;  %v897_v54 = vmax.f32 %v865_v49, 0.0  ;;  %v811_v55 = vmul.f32 %v1724_v9, %v689_v52  ;;  %v827_v56 = vmul.f32 %v1724_v9, %v753_v53 }
 0x106   : > { %v691_v57 = vpop.f32.mrf.mxu0  ;;  %v755_v58 = vpop.f32.mrf.mxu1 }
 0x107   : > { %v1239_v59 = vpack.c.bf16 %v881_v13, %v880_v50  ;;  %v1279_v60 = vpack.c.bf16 %v897_v54, %v896_v51  ;;  %v850_v61 = vadd.f32 %v1730_v25, %v811_v55  ;;  %v866_v62 = vadd.f32 %v1730_v25, %v827_v56 }
 0x108   : > { %v692_v63 = vpop.f32.mrf.mxu0  ;;  %v756_v0 = vpop.f32.mrf.mxu1 }
 0x109   : > { %1311 = vst [vmem:[%s1745_s13 + $0x8] sm:$0xff] %v1239_v59   ;;  %1319 = vst [vmem:[%s1745_s13 + $0x48] sm:$0xff] %v1279_v60   ;;  %v812_v2 = vmul.f32 %v1724_v9, %v692_v63  ;;  %v828_v3 = vmul.f32 %v1724_v9, %v756_v0  ;;  %v882_v33 = vmax.f32 %v850_v61, 0.0  ;;  %v898_v8 = vmax.f32 %v866_v62, 0.0 }
 0x10a   : > { %v694_v4 = vpop.f32.mrf.mxu0  ;;  %v758_v5 = vpop.f32.mrf.mxu1 }
 0x10b   : > { %v851_v6 = vadd.f32 %v1730_v25, %v812_v2  ;;  %v867_v7 = vadd.f32 %v1730_v25, %v828_v3 }
 0x10c   : > { %v697_v45 = vpop.f32.mrf.mxu0  ;;  %v761_v10 = vpop.f32.mrf.mxu1 }
 0x10d   : > { %v883_v24 = vmax.f32 %v851_v6, 0.0  ;;  %v899_v28 = vmax.f32 %v867_v7, 0.0  ;;  %v813_v32 = vmul.f32 %v1724_v9, %v697_v45  ;;  %v829_v34 = vmul.f32 %v1724_v9, %v761_v10 }
 0x10e   : > { %v699_v46 = vpop.f32.mrf.mxu0  ;;  %v763_v11 = vpop.f32.mrf.mxu1 }
 0x10f   : > { %v1244_v14 = vpack.c.bf16 %v883_v24, %v882_v33  ;;  %v1284_v15 = vpack.c.bf16 %v899_v28, %v898_v8  ;;  %v852_v16 = vadd.f32 %v1730_v25, %v813_v32  ;;  %v868_v17 = vadd.f32 %v1730_v25, %v829_v34 }
 0x110   : > { %v700_v1 = vpop.f32.mrf.mxu0  ;;  %v764_v18 = vpop.f32.mrf.mxu1 }
 0x111   : > { %1312 = vst [vmem:[%s1745_s13 + $0x10] sm:$0xff] %v1244_v14   ;;  %1320 = vst [vmem:[%s1745_s13 + $0x50] sm:$0xff] %v1284_v15   ;;  %v814_v19 = vmul.f32 %v1724_v9, %v700_v1  ;;  %v830_v20 = vmul.f32 %v1724_v9, %v764_v18  ;;  %v884_v27 = vmax.f32 %v852_v16, 0.0  ;;  %v900_v29 = vmax.f32 %v868_v17, 0.0 }
 0x112   : > { %v702_v21 = vpop.f32.mrf.mxu0  ;;  %v766_v22 = vpop.f32.mrf.mxu1 }
 0x113   : > { %v853_v23 = vadd.f32 %v1730_v25, %v814_v19  ;;  %v869_v26 = vadd.f32 %v1730_v25, %v830_v20 }
 0x114   : > { %v705_v30 = vpop.f32.mrf.mxu0  ;;  %v769_v31 = vpop.f32.mrf.mxu1 }
 0x115   : > { %v885_v35 = vmax.f32 %v853_v23, 0.0  ;;  %v901_v36 = vmax.f32 %v869_v26, 0.0  ;;  %v815_v37 = vmul.f32 %v1724_v9, %v705_v30  ;;  %v831_v38 = vmul.f32 %v1724_v9, %v769_v31 }
 0x116   : > { %v707_v39 = vpop.f32.mrf.mxu0  ;;  %v771_v12 = vpop.f32.mrf.mxu1 }
 0x117   : > { %v1249_v40 = vpack.c.bf16 %v885_v35, %v884_v27  ;;  %v1289_v41 = vpack.c.bf16 %v901_v36, %v900_v29  ;;  %v854_v42 = vadd.f32 %v1730_v25, %v815_v37  ;;  %v870_v43 = vadd.f32 %v1730_v25, %v831_v38 }
 0x118   : > { %v708_v44 = vpop.f32.mrf.mxu0  ;;  %v772_v47 = vpop.f32.mrf.mxu1 }
 0x119   : > { %1313 = vst [vmem:[%s1745_s13 + $0x18] sm:$0xff] %v1249_v40   ;;  %1321 = vst [vmem:[%s1745_s13 + $0x58] sm:$0xff] %v1289_v41   ;;  %v816_v48 = vmul.f32 %v1724_v9, %v708_v44  ;;  %v832_v49 = vmul.f32 %v1724_v9, %v772_v47  ;;  %v886_v13 = vmax.f32 %v854_v42, 0.0  ;;  %v902_v54 = vmax.f32 %v870_v43, 0.0 }
 0x11a   : > { %v710_v50 = vpop.f32.mrf.mxu0  ;;  %v774_v51 = vpop.f32.mrf.mxu1 }
 0x11b   : > { %v855_v52 = vadd.f32 %v1730_v25, %v816_v48  ;;  %v871_v53 = vadd.f32 %v1730_v25, %v832_v49 }
 0x11c   : > { %v713_v55 = vpop.f32.mrf.mxu0  ;;  %v777_v56 = vpop.f32.mrf.mxu1 }
 0x11d   : > { %v887_v57 = vmax.f32 %v855_v52, 0.0  ;;  %v903_v58 = vmax.f32 %v871_v53, 0.0  ;;  %v817_v59 = vmul.f32 %v1724_v9, %v713_v55  ;;  %v833_v60 = vmul.f32 %v1724_v9, %v777_v56 }
 0x11e   : > { %v715_v61 = vpop.f32.mrf.mxu0  ;;  %v779_v62 = vpop.f32.mrf.mxu1 }
 0x11f   : > { %v1254_v63 = vpack.c.bf16 %v887_v57, %v886_v13  ;;  %v1294_v0 = vpack.c.bf16 %v903_v58, %v902_v54  ;;  %v856_v2 = vadd.f32 %v1730_v25, %v817_v59  ;;  %v872_v3 = vadd.f32 %v1730_v25, %v833_v60 }
 0x120   : > { %v716_v4 = vpop.f32.mrf.mxu0  ;;  %v780_v5 = vpop.f32.mrf.mxu1 }
 0x121   : > { %1314 = vst [vmem:[%s1745_s13 + $0x20] sm:$0xff] %v1254_v63   ;;  %1322 = vst [vmem:[%s1745_s13 + $0x60] sm:$0xff] %v1294_v0   ;;  %v818_v6 = vmul.f32 %v1724_v9, %v716_v4  ;;  %v834_v7 = vmul.f32 %v1724_v9, %v780_v5  ;;  %v888_v24 = vmax.f32 %v856_v2, 0.0  ;;  %v904_v28 = vmax.f32 %v872_v3, 0.0 }
 0x122   : > { %v718_v33 = vpop.f32.mrf.mxu0  ;;  %v782_v8 = vpop.f32.mrf.mxu1 }
 0x123   : > { %v857_v45 = vadd.f32 %v1730_v25, %v818_v6  ;;  %v873_v10 = vadd.f32 %v1730_v25, %v834_v7 }
 0x124   : > { %v721_v32 = vpop.f32.mrf.mxu0  ;;  %v785_v34 = vpop.f32.mrf.mxu1 }
 0x125   : > { %v889_v46 = vmax.f32 %v857_v45, 0.0  ;;  %v905_v11 = vmax.f32 %v873_v10, 0.0  ;;  %v819_v14 = vmul.f32 %v1724_v9, %v721_v32  ;;  %v835_v15 = vmul.f32 %v1724_v9, %v785_v34 }
 0x126   : > { %v723_v16 = vpop.f32.mrf.mxu0  ;;  %v787_v17 = vpop.f32.mrf.mxu1 }
 0x127   : > { %v1259_v1 = vpack.c.bf16 %v889_v46, %v888_v24  ;;  %v1299_v18 = vpack.c.bf16 %v905_v11, %v904_v28  ;;  %v858_v19 = vadd.f32 %v1730_v25, %v819_v14  ;;  %v874_v20 = vadd.f32 %v1730_v25, %v835_v15 }
 0x128   : > { %v724_v21 = vpop.f32.mrf.mxu0  ;;  %v788_v22 = vpop.f32.mrf.mxu1 }
 0x129   : > { %1315 = vst [vmem:[%s1745_s13 + $0x28] sm:$0xff] %v1259_v1   ;;  %1323 = vst [vmem:[%s1745_s13 + $0x68] sm:$0xff] %v1299_v18   ;;  %v820_v23 = vmul.f32 %v1724_v9, %v724_v21  ;;  %v836_v26 = vmul.f32 %v1724_v9, %v788_v22  ;;  %v890_v35 = vmax.f32 %v858_v19, 0.0  ;;  %v906_v36 = vmax.f32 %v874_v20, 0.0 }
 0x12a   : > { %v726_v27 = vpop.f32.mrf.mxu0  ;;  %v790_v29 = vpop.f32.mrf.mxu1 }
 0x12b   : > { %v859_v30 = vadd.f32 %v1730_v25, %v820_v23  ;;  %v875_v31 = vadd.f32 %v1730_v25, %v836_v26 }
 0x12c   : > { %v729_v37 = vpop.f32.mrf.mxu0  ;;  %v793_v38 = vpop.f32.mrf.mxu1 }
 0x12d   : > { %v891_v39 = vmax.f32 %v859_v30, 0.0  ;;  %v907_v12 = vmax.f32 %v875_v31, 0.0  ;;  %v821_v40 = vmul.f32 %v1724_v9, %v729_v37  ;;  %v837_v41 = vmul.f32 %v1724_v9, %v793_v38 }
 0x12e   : > { %v731_v42 = vpop.f32.mrf.mxu0  ;;  %v795_v43 = vpop.f32.mrf.mxu1 }
 0x12f   : > { %v1264_v44 = vpack.c.bf16 %v891_v39, %v890_v35  ;;  %v1304_v47 = vpack.c.bf16 %v907_v12, %v906_v36  ;;  %v860_v50 = vadd.f32 %v1730_v25, %v821_v40  ;;  %v876_v51 = vadd.f32 %v1730_v25, %v837_v41 }
 0x130   : > { %v732_v48 = vpop.f32.mrf.mxu0  ;;  %v796_v49 = vpop.f32.mrf.mxu1 }
 0x131   : > { %1316 = vst [vmem:[%s1745_s13 + $0x30] sm:$0xff] %v1264_v44   ;;  %1324 = vst [vmem:[%s1745_s13 + $0x70] sm:$0xff] %v1304_v47   ;;  %v822_v52 = vmul.f32 %v1724_v9, %v732_v48  ;;  %v838_v53 = vmul.f32 %v1724_v9, %v796_v49  ;;  %v892_v57 = vmax.f32 %v860_v50, 0.0  ;;  %v908_v58 = vmax.f32 %v876_v51, 0.0 }
 0x132   : > { %v734_v13 = vpop.f32.mrf.mxu0  ;;  %v798_v54 = vpop.f32.mrf.mxu1 }
 0x133   : > { %v861_v55 = vadd.f32 %v1730_v25, %v822_v52  ;;  %v877_v56 = vadd.f32 %v1730_v25, %v838_v53 }
 0x135   : > { %v893_v59 = vmax.f32 %v861_v55, 0.0  ;;  %v909_v60 = vmax.f32 %v877_v56, 0.0 }
 0x137   : > { %v1269_v61 = vpack.c.bf16 %v893_v59, %v892_v57  ;;  %v1309_v62 = vpack.c.bf16 %v909_v60, %v908_v58 }
 0x139   : > { %1317 = vst [vmem:[%s1745_s13 + $0x38] sm:$0xff] %v1269_v61   ;;  %1325 = vst [vmem:[%s1745_s13 + $0x78] sm:$0xff] %v1309_v62  }
 0x13a PF: > { %s16_s21 = sadd.s32 1, %s1372_s21  }
 0x13b   : > { %p13_p4 = scmp.ge.s32.totalorder %s16_s21, 4  }
 0x13d   :  { %15 = sbr.rel (!%p13_p4) target bundleno = 1 (0x1), region = 74 }

// kernel: densenet_forward.13
= control target key start
LH: loop header
LB: loop body
LE: loop exit
PB: predicated region body
PF: predicated region fallthrough
CT: control target
= control target key end

     0   :  { %s774_s1 = inlined_call_operand.vmem [shape: bf16[128,128], index: 1, kind: input, shape index: {}]   ;;  %s775_s0 = inlined_call_operand.vmem [shape: bf16[128,128], index: 0, kind: input, shape index: {}]   ;;  %s776_s2 = inlined_call_operand.vmem [shape: f32[1,128], index: 2, kind: input, shape index: {}]   ;;  %s777_s3 = inlined_call_operand.vmem [shape: f32[1,128], index: 3, kind: input, shape index: {}]   ;;  %s778_s4 = inlined_call_operand.vmem [shape: f32[1,128], index: 4, kind: input, shape index: {}]   ;;  %s779_s5 = inlined_call_operand.vmem [shape: f32[1,128], index: 5, kind: input, shape index: {}]   ;;  %s780_s6 = inlined_call_operand.vmem [shape: bf16[128,128], index: 6, kind: output, shape index: {}]  }
   0x1   :  { %v611_v0 = vld [vmem:[%s774_s1 + $0x38] sm:$0xff]   ;;  %v612_v1 = vld [vmem:[%s774_s1 + $0x30] sm:$0xff]   ;;  %v613_v2 = vld [vmem:[%s774_s1 + $0x28] sm:$0xff]  }
   0x2   :  { %563 = vmatprep.subr.bf16.mxu0 %v611_v0  ;;  %595 = vmatprep.subr.bf16.mxu1 %v611_v0  ;;  %v614_v3 = vld [vmem:[%s774_s1 + $0x20] sm:$0xff]   ;;  %v533_v9 = vld [vmem:[%s775_s0 + $0x8] sm:$0xff]   ;;  %v534_v16 = vld [vmem:[%s775_s0 + $0x10] sm:$0xff]  }
   0x3   :  { %564 = vmatpush3.bf16.msra.mxu0 %v611_v0  ;;  %603 = vmatpush3.bf16.msra.mxu1 %v611_v0  ;;  %v462_v4 = vld [vmem:[%s775_s0] sm:$0xff]   ;;  %v537_v13 = vld [vmem:[%s775_s0 + $0x28] sm:$0xff]   ;;  %v615_v17 = vld [vmem:[%s774_s1 + $0x18] sm:$0xff]   ;;  %v467_v20 = vunpack.c.l.bf16 %v533_v9  ;;  %v468_v21 = vunpack.c.h.bf16 %v533_v9  ;;  %v471_v28 = vunpack.c.l.bf16 %v534_v16  ;;  %v472_v40 = vunpack.c.h.bf16 %v534_v16 }
   0x4   :  { %565 = vmatprep.subr.bf16.mxu0 %v612_v1  ;;  %596 = vmatprep.subr.bf16.mxu1 %v612_v1  ;;  %v672_v5 = vld [vmem:[%s776_s2] ss:$0 sm:$0xff]  ;;  %v463_v6 = vunpack.c.l.bf16 %v462_v4  ;;  %v464_v7 = vunpack.c.h.bf16 %v462_v4  ;;  %v483_v24 = vunpack.c.l.bf16 %v537_v13  ;;  %v484_v25 = vunpack.c.h.bf16 %v537_v13  ;;  %v538_v31 = vld [vmem:[%s775_s0 + $0x30] sm:$0xff]   ;;  %v535_v44 = vld [vmem:[%s775_s0 + $0x18] sm:$0xff]  }
   0x5   :  { %v536_v8 = vld [vmem:[%s775_s0 + $0x20] sm:$0xff]   ;;  %v616_v32 = vld [vmem:[%s774_s1 + $0x10] sm:$0xff]   ;;  %v65_v35 = vmul.f32 %v467_v20, %v672_v5  ;;  %v66_v36 = vmul.f32 %v468_v21, %v672_v5  ;;  %v67_v42 = vmul.f32 %v471_v28, %v672_v5  ;;  %v487_v43 = vunpack.c.l.bf16 %v538_v31  ;;  %v539_v47 = vld [vmem:[%s775_s0 + $0x38] sm:$0xff]  }
   0x6   :  { %v683_v10 = vld [vmem:[%s777_s3] ss:$0 sm:$0xff]  ;;  %v479_v11 = vunpack.c.l.bf16 %v536_v8  ;;  %v480_v12 = vunpack.c.h.bf16 %v536_v8  ;;  %v63_v14 = vmul.f32 %v463_v6, %v672_v5  ;;  %v64_v15 = vmul.f32 %v464_v7, %v672_v5  ;;  %v617_v48 = vld [vmem:[%s774_s1 + $0x8] sm:$0xff]  }
   0x7   :  { %566 = vmatpush3.bf16.msra.mxu0 %v612_v1  ;;  %604 = vmatpush3.bf16.msra.mxu1 %v612_v1  ;;  %v73_v38 = vmul.f32 %v483_v24, %v672_v5  ;;  %v74_v39 = vmul.f32 %v484_v25, %v672_v5  ;;  %v68_v45 = vmul.f32 %v472_v40, %v672_v5  ;;  %v488_v46 = vunpack.c.h.bf16 %v538_v31  ;;  %v618_v63 = vld [vmem:[%s774_s1] sm:$0xff]  }
   0x8   :  { %567 = vmatprep.subr.bf16.mxu0 %v613_v2  ;;  %597 = vmatprep.subr.bf16.mxu1 %v613_v2  ;;  %v71_v18 = vmul.f32 %v479_v11, %v672_v5  ;;  %v72_v19 = vmul.f32 %v480_v12, %v672_v5  ;;  %v86_v22 = vadd.f32 %v683_v10, %v63_v14  ;;  %v475_v55 = vunpack.c.l.bf16 %v535_v44 }
   0x9   :  { %v87_v23 = vadd.f32 %v683_v10, %v64_v15  ;;  %v88_v49 = vadd.f32 %v683_v10, %v65_v35  ;;  %v89_v50 = vadd.f32 %v683_v10, %v66_v36  ;;  %v75_v51 = vmul.f32 %v487_v43, %v672_v5 }
   0xa   :  { %v94_v26 = vadd.f32 %v683_v10, %v71_v18  ;;  %v95_v27 = vadd.f32 %v683_v10, %v72_v19  ;;  %v102_v29 = vmax.f32 %v86_v22, 0.0  ;;  %v96_v52 = vadd.f32 %v683_v10, %v73_v38 }
   0xb   :  { %568 = vmatpush3.bf16.msra.mxu0 %v613_v2  ;;  %605 = vmatpush3.bf16.msra.mxu1 %v613_v2  ;;  %v103_v30 = vmax.f32 %v87_v23, 0.0  ;;  %v97_v53 = vadd.f32 %v683_v10, %v74_v39  ;;  %v76_v54 = vmul.f32 %v488_v46, %v672_v5  ;;  %v90_v56 = vadd.f32 %v683_v10, %v67_v42 }
   0xc   :  { %569 = vmatprep.subr.bf16.mxu0 %v614_v3  ;;  %598 = vmatprep.subr.bf16.mxu1 %v614_v3  ;;  %v110_v33 = vmax.f32 %v94_v26, 0.0  ;;  %v111_v34 = vmax.f32 %v95_v27, 0.0  ;;  %v476_v57 = vunpack.c.h.bf16 %v535_v44  ;;  %v491_v58 = vunpack.c.l.bf16 %v539_v47 }
   0xd   :  { %v118_v37 = vpack.c.bf16 %v103_v30, %v102_v29  ;;  %v492_v59 = vunpack.c.h.bf16 %v539_v47  ;;  %v91_v60 = vadd.f32 %v683_v10, %v68_v45  ;;  %v98_v61 = vadd.f32 %v683_v10, %v75_v51 }
   0xe   :  { %v122_v41 = vpack.c.bf16 %v111_v34, %v110_v33  ;;  %v99_v62 = vadd.f32 %v683_v10, %v76_v54  ;;  %v104_v0 = vmax.f32 %v88_v49, 0.0  ;;  %v105_v1 = vmax.f32 %v89_v50, 0.0  ;;  %v428_v33 = vld [vmem:[%s779_s5] ss:$0 sm:$0xff] }
   0xf   :  { %570 = vmatpush3.bf16.msra.mxu0 %v614_v3  ;;  %606 = vmatpush3.bf16.msra.mxu1 %v614_v3  ;;  %v112_v2 = vmax.f32 %v96_v52, 0.0  ;;  %v113_v3 = vmax.f32 %v97_v53, 0.0  ;;  %v69_v4 = vmul.f32 %v475_v55, %v672_v5  ;;  %v70_v6 = vmul.f32 %v476_v57, %v672_v5 }
  0x10   :  { %571 = vmatprep.subr.bf16.mxu0 %v615_v17  ;;  %599 = vmatprep.subr.bf16.mxu1 %v615_v17  ;;  %v77_v7 = vmul.f32 %v491_v58, %v672_v5  ;;  %v78_v8 = vmul.f32 %v492_v59, %v672_v5  ;;  %v106_v9 = vmax.f32 %v90_v56, 0.0  ;;  %v107_v11 = vmax.f32 %v91_v60, 0.0 }
  0x11   :  { %579 = vmatprep.mubr.bf16.mxu0 %v118_v37  ;;  %587 = vmatprep.mubr.bf16.mxu1 %v122_v41  ;;  %v114_v12 = vmax.f32 %v98_v61, 0.0  ;;  %v115_v13 = vmax.f32 %v99_v62, 0.0  ;;  %v119_v14 = vpack.c.bf16 %v105_v1, %v104_v0  ;;  %v123_v15 = vpack.c.bf16 %v113_v3, %v112_v2 }
  0x12   :  { %v92_v16 = vadd.f32 %v683_v10, %v69_v4  ;;  %v100_v18 = vadd.f32 %v683_v10, %v77_v7  ;;  %v101_v19 = vadd.f32 %v683_v10, %v78_v8  ;;  %v120_v5 = vpack.c.bf16 %v107_v11, %v106_v9 }
  0x13   :  { %572 = vmatpush3.bf16.msra.mxu0 %v615_v17  ;;  %607 = vmatpush3.bf16.msra.mxu1 %v615_v17  ;;  %v93_v17 = vadd.f32 %v683_v10, %v70_v6  ;;  %v124_v20 = vpack.c.bf16 %v115_v13, %v114_v12  ;;  %v427_v10 = vld [vmem:[%s778_s4] ss:$0 sm:$0xff] }
  0x14   :  { %573 = vmatprep.subr.bf16.mxu0 %v616_v32  ;;  %600 = vmatprep.subr.bf16.mxu1 %v616_v32  ;;  %v108_v21 = vmax.f32 %v92_v16, 0.0  ;;  %v116_v23 = vmax.f32 %v100_v18, 0.0  ;;  %v117_v24 = vmax.f32 %v101_v19, 0.0 }
  0x15   :  { %v109_v22 = vmax.f32 %v93_v17, 0.0 }
  0x16   :  { %v125_v26 = vpack.c.bf16 %v117_v24, %v116_v23 }
  0x17   :  { %574 = vmatpush3.bf16.msra.mxu0 %v616_v32  ;;  %608 = vmatpush3.bf16.msra.mxu1 %v616_v32  ;;  %v121_v25 = vpack.c.bf16 %v109_v22, %v108_v21 }
  0x18   :  { %575 = vmatprep.subr.bf16.mxu0 %v617_v48  ;;  %601 = vmatprep.subr.bf16.mxu1 %v617_v48 }
  0x1b   :  { %576 = vmatpush3.bf16.msra.mxu0 %v617_v48  ;;  %609 = vmatpush3.bf16.msra.mxu1 %v617_v48 }
  0x1c   :  { %577 = vmatprep.subr.bf16.mxu0 %v618_v63  ;;  %602 = vmatprep.subr.bf16.mxu1 %v618_v63 }
  0x1f   :  { %578 = vmatpush3.bf16.msra.mxu0 %v618_v63  ;;  %610 = vmatpush3.bf16.msra.mxu1 %v618_v63 }
  0x22   :  { %580 = vmatmul.mubr.bf16.vlgmr.msra.gmra.mxu0 %v119_v14  ;;  %588 = vmatmul.mubr.bf16.vlgmr.msra.gmra.mxu1 %v123_v15 }
  0x23   :  { %583 = vmatprep.mubr.bf16.mxu0 %v120_v5  ;;  %591 = vmatprep.mubr.bf16.mxu1 %v124_v20 }
  0x2a   :  { %584 = vmatmul.mubr.bf16.gmra.mxu0 %v121_v25  ;;  %592 = vmatmul.mubr.bf16.gmra.mxu1 %v125_v26 }
  0xe2   :  { %v581_v27 = vpop.f32.mrf.mxu0  ;;  %v589_v28 = vpop.f32.mrf.mxu1 }
  0xe3   :  { %v296_v29 = vmul.f32 %v581_v27, %v427_v10  ;;  %v304_v30 = vmul.f32 %v589_v28, %v427_v10 }
  0xe4   :  { %v224_v31 = vpop.f32.mrf.mxu0  ;;  %v256_v32 = vpop.f32.mrf.mxu1 }
  0xe5   :  { %v294_v34 = vmul.f32 %v427_v10, %v224_v31  ;;  %v302_v35 = vmul.f32 %v427_v10, %v256_v32  ;;  %v319_v40 = vadd.f32 %v428_v33, %v296_v29  ;;  %v327_v41 = vadd.f32 %v428_v33, %v304_v30 }
  0xe6   :  { %v582_v36 = vpop.f32.mrf.mxu0  ;;  %v590_v37 = vpop.f32.mrf.mxu1 }
  0xe7   :  { %v297_v38 = vmul.f32 %v582_v36, %v427_v10  ;;  %v305_v39 = vmul.f32 %v590_v37, %v427_v10  ;;  %v317_v48 = vadd.f32 %v428_v33, %v294_v34  ;;  %v325_v49 = vadd.f32 %v428_v33, %v302_v35 }
  0xe8   :  { %v227_v42 = vpop.f32.mrf.mxu0  ;;  %v259_v43 = vpop.f32.mrf.mxu1 }
  0xe9   :  { %v320_v44 = vadd.f32 %v428_v33, %v297_v38  ;;  %v328_v45 = vadd.f32 %v428_v33, %v305_v39  ;;  %v295_v46 = vmul.f32 %v427_v10, %v227_v42  ;;  %v303_v47 = vmul.f32 %v427_v10, %v259_v43 }
  0xea   :  { %v585_v50 = vpop.f32.mrf.mxu0  ;;  %v593_v51 = vpop.f32.mrf.mxu1 }
  0xeb   :  { %v501_v52 = vpack.c.bf16 %v320_v44, %v319_v40  ;;  %v521_v53 = vpack.c.bf16 %v328_v45, %v327_v41  ;;  %v318_v54 = vadd.f32 %v428_v33, %v295_v46  ;;  %v326_v55 = vadd.f32 %v428_v33, %v303_v47 }
  0xec   :  { %v300_v56 = vmul.f32 %v585_v50, %v427_v10  ;;  %v308_v57 = vmul.f32 %v593_v51, %v427_v10  ;;  %v240_v58 = vpop.f32.mrf.mxu0  ;;  %v272_v59 = vpop.f32.mrf.mxu1 }
  0xed   :  { %540 = vst [vmem:[%s780_s6 + $0x8] sm:$0xff] %v501_v52   ;;  %544 = vst [vmem:[%s780_s6 + $0x28] sm:$0xff] %v521_v53   ;;  %v496_v60 = vpack.c.bf16 %v318_v54, %v317_v48  ;;  %v516_v61 = vpack.c.bf16 %v326_v55, %v325_v49  ;;  %v298_v62 = vmul.f32 %v427_v10, %v240_v58 }
  0xee   :  { %v306_v63 = vmul.f32 %v427_v10, %v272_v59  ;;  %v586_v0 = vpop.f32.mrf.mxu0  ;;  %v594_v1 = vpop.f32.mrf.mxu1  ;;  %v323_v4 = vadd.f32 %v428_v33, %v300_v56  ;;  %v331_v6 = vadd.f32 %v428_v33, %v308_v57 }
  0xef   :  { %497 = vst [vmem:[%s780_s6] sm:$0xff] %v496_v60   ;;  %543 = vst [vmem:[%s780_s6 + $0x20] sm:$0xff] %v516_v61   ;;  %v301_v2 = vmul.f32 %v586_v0, %v427_v10  ;;  %v309_v3 = vmul.f32 %v594_v1, %v427_v10  ;;  %v321_v14 = vadd.f32 %v428_v33, %v298_v62 }
  0xf0   :  { %v243_v7 = vpop.f32.mrf.mxu0  ;;  %v275_v8 = vpop.f32.mrf.mxu1  ;;  %v329_v15 = vadd.f32 %v428_v33, %v306_v63 }
  0xf1   :  { %v324_v9 = vadd.f32 %v428_v33, %v301_v2  ;;  %v332_v11 = vadd.f32 %v428_v33, %v309_v3  ;;  %v299_v12 = vmul.f32 %v427_v10, %v243_v7  ;;  %v307_v13 = vmul.f32 %v427_v10, %v275_v8 }
  0xf3   :  { %v511_v16 = vpack.c.bf16 %v324_v9, %v323_v4  ;;  %v531_v17 = vpack.c.bf16 %v332_v11, %v331_v6  ;;  %v322_v18 = vadd.f32 %v428_v33, %v299_v12  ;;  %v330_v19 = vadd.f32 %v428_v33, %v307_v13 }
  0xf5   :  { %542 = vst [vmem:[%s780_s6 + $0x18] sm:$0xff] %v511_v16   ;;  %546 = vst [vmem:[%s780_s6 + $0x38] sm:$0xff] %v531_v17   ;;  %v506_v5 = vpack.c.bf16 %v322_v18, %v321_v14  ;;  %v526_v20 = vpack.c.bf16 %v330_v19, %v329_v15 }
  0xf7   :  { %541 = vst [vmem:[%s780_s6 + $0x10] sm:$0xff] %v506_v5   ;;  %545 = vst [vmem:[%s780_s6 + $0x30] sm:$0xff] %v526_v20  }

// kernel: densenet_forward.14
= control target key start
LH: loop header
LB: loop body
LE: loop exit
PB: predicated region body
PF: predicated region fallthrough
CT: control target
= control target key end

     0   :  { %s254_s0 = inlined_call_operand.vmem [shape: bf16[2,8,4,256], index: 0, kind: input, shape index: {}]   ;;  %s255_s1 = inlined_call_operand.vmem [shape: bf16[2,4,4,128], index: 1, kind: output, shape index: {}]  }
   0x1   :  { %v8_v0 = vld [vmem:[%s254_s0] sm:$0x3]  ;;  %v9_v1 = vld [vmem:[%s254_s0 + $0x4] sm:$0x3]  ;;  %v40_v2 = vld [vmem:[%s254_s0 + $0x2] sm:$0x3] }
   0x2   :  { %v24_v3 = vunpack.c.l.bf16 %v8_v0  ;;  %v25_v4 = vunpack.c.l.bf16 %v9_v1  ;;  %v41_v5 = vld [vmem:[%s254_s0 + $0x6] sm:$0x3]  ;;  %v56_v6 = vunpack.c.l.bf16 %v40_v2  ;;  %v10_v7 = vld [vmem:[%s254_s0 + $0x8] sm:$0x3]  ;;  %v11_v8 = vld [vmem:[%s254_s0 + $0xc] sm:$0x3] }
   0x3   :  { %v57_v9 = vunpack.c.l.bf16 %v41_v5  ;;  %v26_v10 = vunpack.c.l.bf16 %v10_v7  ;;  %v27_v11 = vunpack.c.l.bf16 %v11_v8  ;;  %v42_v12 = vld [vmem:[%s254_s0 + $0xa] sm:$0x3]  ;;  %v43_v13 = vld [vmem:[%s254_s0 + $0xe] sm:$0x3]  ;;  %v12_v14 = vld [vmem:[%s254_s0 + $0x10] sm:$0x3] }
   0x4   :  { %v72_v15 = vadd.f32 %v56_v6, %v24_v3  ;;  %v58_v16 = vunpack.c.l.bf16 %v42_v12  ;;  %v59_v17 = vunpack.c.l.bf16 %v43_v13  ;;  %v13_v18 = vld [vmem:[%s254_s0 + $0x14] sm:$0x3]  ;;  %v28_v19 = vunpack.c.l.bf16 %v12_v14  ;;  %v44_v20 = vld [vmem:[%s254_s0 + $0x12] sm:$0x3]  ;;  %v45_v21 = vld [vmem:[%s254_s0 + $0x16] sm:$0x3] }
   0x5   :  { %v73_v22 = vadd.f32 %v57_v9, %v25_v4  ;;  %v29_v23 = vunpack.c.l.bf16 %v13_v18  ;;  %v60_v24 = vunpack.c.l.bf16 %v44_v20  ;;  %v61_v25 = vunpack.c.l.bf16 %v45_v21  ;;  %v14_v26 = vld [vmem:[%s254_s0 + $0x18] sm:$0x3]  ;;  %v15_v27 = vld [vmem:[%s254_s0 + $0x1c] sm:$0x3]  ;;  %v46_v28 = vld [vmem:[%s254_s0 + $0x1a] sm:$0x3] }
   0x6   :  { %v74_v29 = vadd.f32 %v58_v16, %v26_v10  ;;  %v75_v30 = vadd.f32 %v59_v17, %v27_v11  ;;  %v30_v31 = vunpack.c.l.bf16 %v14_v26  ;;  %v31_v32 = vunpack.c.l.bf16 %v15_v27  ;;  %v47_v33 = vld [vmem:[%s254_s0 + $0x1e] sm:$0x3]  ;;  %v16_v34 = vld [vmem:[%s254_s0 + $0x20] sm:$0x3]  ;;  %v17_v35 = vld [vmem:[%s254_s0 + $0x24] sm:$0x3] }
   0x7   :  { %v88_v36 = vadd.f32 %v73_v22, %v72_v15  ;;  %v76_v37 = vadd.f32 %v60_v24, %v28_v19  ;;  %v77_v38 = vadd.f32 %v61_v25, %v29_v23  ;;  %v62_v39 = vunpack.c.l.bf16 %v46_v28  ;;  %v48_v40 = vld [vmem:[%s254_s0 + $0x22] sm:$0x3]  ;;  %v49_v41 = vld [vmem:[%s254_s0 + $0x26] sm:$0x3]  ;;  %v18_v42 = vld [vmem:[%s254_s0 + $0x28] sm:$0x3] }
   0x8   :  { %v89_v43 = vadd.f32 %v75_v30, %v74_v29  ;;  %v63_v44 = vunpack.c.l.bf16 %v47_v33  ;;  %v32_v45 = vunpack.c.l.bf16 %v16_v34  ;;  %v33_v46 = vunpack.c.l.bf16 %v17_v35  ;;  %v19_v47 = vld [vmem:[%s254_s0 + $0x2c] sm:$0x3]  ;;  %v50_v52 = vld [vmem:[%s254_s0 + $0x2a] sm:$0x3]  ;;  %v51_v53 = vld [vmem:[%s254_s0 + $0x2e] sm:$0x3] }
   0x9   :  { %v96_v48 = vmul.f32 0.25, %v88_v36  ;;  %v90_v49 = vadd.f32 %v77_v38, %v76_v37  ;;  %v78_v50 = vadd.f32 %v62_v39, %v30_v31  ;;  %v64_v51 = vunpack.c.l.bf16 %v48_v40  ;;  %v20_v58 = vld [vmem:[%s254_s0 + $0x30] sm:$0x3]  ;;  %v21_v59 = vld [vmem:[%s254_s0 + $0x34] sm:$0x3] }
   0xa   :  { %v97_v54 = vmul.f32 0.25, %v89_v43  ;;  %v79_v55 = vadd.f32 %v63_v44, %v31_v32  ;;  %v65_v56 = vunpack.c.l.bf16 %v49_v41  ;;  %v34_v57 = vunpack.c.l.bf16 %v18_v42  ;;  %v52_v0 = vld [vmem:[%s254_s0 + $0x32] sm:$0x3]  ;;  %v53_v5 = vld [vmem:[%s254_s0 + $0x36] sm:$0x3] }
   0xb   :  { %v104_v60 = vpack.c.bf16 %v96_v48, %v96_v48  ;;  %v98_v61 = vmul.f32 0.25, %v90_v49  ;;  %v80_v62 = vadd.f32 %v64_v51, %v32_v45  ;;  %v35_v63 = vunpack.c.l.bf16 %v19_v47  ;;  %v22_v6 = vld [vmem:[%s254_s0 + $0x38] sm:$0x3]  ;;  %v23_v7 = vld [vmem:[%s254_s0 + $0x3c] sm:$0x3] }
   0xc   :  { %v105_v1 = vpack.c.bf16 %v97_v54, %v97_v54  ;;  %v91_v2 = vadd.f32 %v79_v55, %v78_v50  ;;  %v81_v3 = vadd.f32 %v65_v56, %v33_v46  ;;  %v66_v4 = vunpack.c.l.bf16 %v50_v52  ;;  %v54_v12 = vld [vmem:[%s254_s0 + $0x3a] sm:$0x3]  ;;  %v55_v17 = vld [vmem:[%s254_s0 + $0x3e] sm:$0x3] }
   0xd   :  { %112 = vst [vmem:[%s255_s1] sm:$0x3] %v104_v60  ;;  %v106_v8 = vpack.c.bf16 %v98_v61, %v98_v61  ;;  %v67_v9 = vunpack.c.l.bf16 %v51_v53  ;;  %v36_v10 = vunpack.c.l.bf16 %v20_v58  ;;  %v37_v11 = vunpack.c.l.bf16 %v21_v59 }
   0xe   :  { %113 = vst [vmem:[%s255_s1 + $0x2] sm:$0x3] %v105_v1  ;;  %v99_v13 = vmul.f32 0.25, %v91_v2  ;;  %v92_v14 = vadd.f32 %v81_v3, %v80_v62  ;;  %v82_v15 = vadd.f32 %v66_v4, %v34_v57  ;;  %v68_v16 = vunpack.c.l.bf16 %v52_v0 }
   0xf   :  { %114 = vst [vmem:[%s255_s1 + $0x4] sm:$0x3] %v106_v8  ;;  %v83_v18 = vadd.f32 %v67_v9, %v35_v63  ;;  %v69_v19 = vunpack.c.l.bf16 %v53_v5  ;;  %v38_v20 = vunpack.c.l.bf16 %v22_v6  ;;  %v39_v21 = vunpack.c.l.bf16 %v23_v7 }
  0x10   :  { %v107_v22 = vpack.c.bf16 %v99_v13, %v99_v13  ;;  %v100_v23 = vmul.f32 0.25, %v92_v14  ;;  %v84_v24 = vadd.f32 %v68_v16, %v36_v10  ;;  %v70_v25 = vunpack.c.l.bf16 %v54_v12 }
  0x11   :  { %v93_v26 = vadd.f32 %v83_v18, %v82_v15  ;;  %v85_v27 = vadd.f32 %v69_v19, %v37_v11  ;;  %v71_v28 = vunpack.c.l.bf16 %v55_v17 }
  0x12   :  { %115 = vst [vmem:[%s255_s1 + $0x6] sm:$0x3] %v107_v22  ;;  %v108_v29 = vpack.c.bf16 %v100_v23, %v100_v23  ;;  %v86_v30 = vadd.f32 %v70_v25, %v38_v20 }
  0x13   :  { %v101_v31 = vmul.f32 0.25, %v93_v26  ;;  %v94_v32 = vadd.f32 %v85_v27, %v84_v24  ;;  %v87_v33 = vadd.f32 %v71_v28, %v39_v21 }
  0x14   :  { %116 = vst [vmem:[%s255_s1 + $0x8] sm:$0x3] %v108_v29 }
  0x15   :  { %v109_v34 = vpack.c.bf16 %v101_v31, %v101_v31  ;;  %v102_v35 = vmul.f32 0.25, %v94_v32  ;;  %v95_v36 = vadd.f32 %v87_v33, %v86_v30 }
  0x17   :  { %117 = vst [vmem:[%s255_s1 + $0xa] sm:$0x3] %v109_v34  ;;  %v110_v37 = vpack.c.bf16 %v102_v35, %v102_v35  ;;  %v103_v38 = vmul.f32 0.25, %v95_v36 }
  0x19   :  { %118 = vst [vmem:[%s255_s1 + $0xc] sm:$0x3] %v110_v37  ;;  %v111_v39 = vpack.c.bf16 %v103_v38, %v103_v38 }
  0x1b   :  { %119 = vst [vmem:[%s255_s1 + $0xe] sm:$0x3] %v111_v39 }

// kernel: densenet_forward.17
= control target key start
LH: loop header
LB: loop body
LE: loop exit
PB: predicated region body
PF: predicated region fallthrough
CT: control target
= control target key end

     0   :  { %v288_v1 = vmov 0.0   ;;  %vm289_vm0 = vmmov 0   ;;  %s363_s0 = inlined_call_operand.vmem [shape: bf16[2,16,128], index: 0, kind: input, shape index: {}]   ;;  %s364_s1 = inlined_call_operand.vmem [shape: f32[1,1,128], index: 1, kind: input, shape index: {}]   ;;  %s365_s2 = inlined_call_operand.vmem [shape: f32[1,1,128], index: 2, kind: input, shape index: {}]   ;;  %s366_s3 = inlined_call_operand.vmem [shape: bf16[128,128], index: 3, kind: input, shape index: {}]   ;;  %s367_s4 = inlined_call_operand.vmem [shape: f32[1,128], index: 4, kind: input, shape index: {}]   ;;  %s368_s5 = inlined_call_operand.hbm [shape: f32[2,128], index: 5, kind: output, shape index: {}]  }
   0x1   :  { %v258_v0 = vld [vmem:[%s366_s3 + $0x38] sm:$0xff]   ;;  %235 = vmatprep.subr.bf16.mxu0 %v288_v1  ;;  %v259_v2 = vld [vmem:[%s366_s3 + $0x30] sm:$0xff]   ;;  %251 = vmatprep.mubr.msk.bf16.mxu0 %vm289_vm0, %v288_v1  ;;  %v260_v3 = vld [vmem:[%s366_s3 + $0x28] sm:$0xff]  }
   0x2   :  { %236 = vmatpush3.bf16.msra.mxu0 %v258_v0  ;;  %v218_v4 = vld [vmem:[%s363_s0] sm:$0xff]   ;;  %v225_v5 = vld [vmem:[%s363_s0 + $0x8] sm:$0xff]  }
   0x3   :  { %237 = vmatprep.subr.bf16.mxu0 %v288_v1  ;;  %v206_v6 = vld [vmem:[%s364_s1] ss:$0 sm:$0xff]  ;;  %v219_v7 = vunpack.c.l.bf16 %v218_v4  ;;  %v220_v8 = vunpack.c.h.bf16 %v218_v4  ;;  %v223_v9 = vunpack.c.l.bf16 %v225_v5  ;;  %v224_v10 = vunpack.c.h.bf16 %v225_v5 }
   0x6   :  { %238 = vmatpush3.bf16.msra.mxu0 %v259_v2 }
   0x7   :  { %239 = vmatprep.subr.bf16.mxu0 %v288_v1 }
   0x8   :  { %10 = vsyncpa [#allocation3], 0  ;;  %v261_v11 = vld [vmem:[%s366_s3 + $0x20] sm:$0xff]   ;;  %v37_v13 = vmul.f32 %v219_v7, %v206_v6  ;;  %v38_v14 = vmul.f32 %v220_v8, %v206_v6  ;;  %v39_v15 = vmul.f32 %v223_v9, %v206_v6  ;;  %v40_v16 = vmul.f32 %v224_v10, %v206_v6  ;;  %v262_v21 = vld [vmem:[%s366_s3 + $0x18] sm:$0xff]   ;;  %s290_s16 = smov [#allocation2]  }
   0x9   :  { %v207_v12 = vld [vmem:[%s365_s2] ss:$0 sm:$0xff]  ;;  %v263_v28 = vld [vmem:[%s366_s3 + $0x10] sm:$0xff]   ;;  %v264_v33 = vld [vmem:[%s366_s3 + $0x8] sm:$0xff]   ;;  %vm99_vm1 = vcmask 1041409  }
   0xa   :  { %240 = vmatpush3.bf16.msra.mxu0 %v260_v3  ;;  %v48_v17 = vadd.f32 %v207_v12, %v37_v13  ;;  %v49_v18 = vadd.f32 %v207_v12, %v38_v14  ;;  %v50_v19 = vadd.f32 %v207_v12, %v39_v15  ;;  %v51_v20 = vadd.f32 %v207_v12, %v40_v16  ;;  %v265_v38 = vld [vmem:[%s366_s3] sm:$0xff]   ;;  %s198_s3 = sshll.u32 %s290_s16, 4  ;;  %s199_s3 = int_to_ptr.vmem [resolvable:$true] %s198_s3 }
   0xb   :  { %241 = vmatprep.subr.bf16.mxu0 %v288_v1  ;;  %v208_v49 = vld [vmem:[%s367_s4] ss:$0 sm:$0xff]  ;;  %s266_s17 = scalar_lea.vmem %s199_s3, 32  ;;  %p271_p1 = scmp.lt.s32.totalorder %s199_s3, %s199_s3 }
   0xc   :  { %v52_v22 = vmax.f32 %v48_v17, 0.0  ;;  %v53_v23 = vmax.f32 %v49_v18, 0.0  ;;  %v54_v24 = vmax.f32 %v50_v19, 0.0  ;;  %v55_v25 = vmax.f32 %v51_v20, 0.0  ;;  %p267_p0 = scmp.ne.s32.totalorder %s199_s3, %s266_s17  ;;  %p272_p2 = scmp.lt.s32.totalorder %s266_s17, %s266_s17 }
   0xe   :  { %242 = vmatpush3.bf16.msra.mxu0 %v261_v11  ;;  %v56_v26 = vadd.f32 %v53_v23, %v52_v22  ;;  %v63_v27 = vadd.f32 %v55_v25, %v54_v24  ;;  %p273_p3 = por %p272_p2, %p271_p1 }
   0xf   :  { %243 = vmatprep.subr.bf16.mxu0 %v288_v1 }
  0x10   :  { %v57_v29 = vrot.slane %v56_v26, 4  ;;  %v64_v30 = vrot.slane %v63_v27, 4  ;;  %p274_p4 = pnand %p273_p3, %p267_p0 }
  0x12   :  { %244 = vmatpush3.bf16.msra.mxu0 %v262_v21  ;;  %v58_v31 = vadd.f32 %v57_v29, %v56_v26  ;;  %v65_v32 = vadd.f32 %v64_v30, %v63_v27 }
  0x13   :  { %245 = vmatprep.subr.bf16.mxu0 %v288_v1 }
  0x14   :  { %v59_v34 = vrot.slane %v58_v31, 2  ;;  %v66_v35 = vrot.slane %v65_v32, 2 }
  0x16   :  { %246 = vmatpush3.bf16.msra.mxu0 %v263_v28  ;;  %v60_v36 = vadd.f32 %v59_v34, %v58_v31  ;;  %v67_v37 = vadd.f32 %v66_v35, %v65_v32 }
  0x17   :  { %247 = vmatprep.subr.bf16.mxu0 %v288_v1 }
  0x18   :  { %v61_v39 = vrot.slane %v60_v36, 1  ;;  %v68_v40 = vrot.slane %v67_v37, 1 }
  0x1a   :  { %248 = vmatpush3.bf16.msra.mxu0 %v264_v33  ;;  %v62_v41 = vadd.f32 %v61_v39, %v60_v36  ;;  %v69_v42 = vadd.f32 %v68_v40, %v67_v37 }
  0x1b   :  { %249 = vmatprep.subr.bf16.mxu0 %v288_v1 }
  0x1c   :  { %v70_v43 = vpack.c.bf16 %v62_v41, %v62_v41  ;;  %v71_v44 = vpack.c.bf16 %v69_v42, %v69_v42 }
  0x1e   :  { %250 = vmatpush3.bf16.msra.mxu0 %v265_v38  ;;  %v97_v45 = vunpack.c.l.b16 %v70_v43  ;;  %v98_v46 = vunpack.c.l.b16 %v71_v44 }
  0x20   :  { %v100_v47 = vsel %vm99_vm1, %v98_v46, %v97_v45 }
  0x21   :  { %v101_v48 = vpack.c.b16 %v100_v47, %v100_v47 }
  0x23   :  { %252 = vmatmul.mubr.bf16.vlgmr.msra.gmra.mxu0 %v101_v48 }
  0xe3   :  { %v185_v50 = vpop.f32.mrf.mxu0 }
  0xe4   :  { %v186_v51 = vadd.f32 %v208_v49, %v185_v50 }
  0xe5   :  { %v253_v52 = vpop.f32.mrf.mxu0 }
  0xe6   :  { %191 = vst [vmem:[#allocation2] sm:$0x3] %v186_v51 }
  0xe7   :  { %v188_v53 = vpop.f32.mrf.mxu0 }
  0xe8   :  { %277 = shalt.err (!%p274_p4)
}
  0xe9   :  { %201 = dma.vmem_to_hbm [thread:$0]  %s199_s3, 32, %s368_s5, [#allocation3]   ;;  %v254_v54 = vpop.f32.mrf.mxu0 }
  0xea   :  { %286 = dma.done.wait [#allocation3], 32  }
  0xeb   :  { %287 = vsyncadd [#allocation3], 4294967264 }
  0xec   :  { %205 = vsyncpa [#allocation3], 1 }

// kernel: densenet_forward.11
= control target key start
LH: loop header
LB: loop body
LE: loop exit
PB: predicated region body
PF: predicated region fallthrough
CT: control target
= control target key end

     0   :  { %s4185_s3 = inlined_call_operand.vmem [shape: bf16[128,128], index: 3, kind: input, shape index: {}]   ;;  %s4186_s0 = inlined_call_operand.vmem [shape: bf16[2,8,8,128], index: 0, kind: input, shape index: {}, may-alias: {0,7}]   ;;  %s4187_s1 = inlined_call_operand.vmem [shape: f32[1,128], index: 1, kind: input, shape index: {}]   ;;  %s4188_s2 = inlined_call_operand.vmem [shape: f32[1,128], index: 2, kind: input, shape index: {}]   ;;  %s4189_s6 = inlined_call_operand.vmem [shape: bf16[9,128,128], index: 6, kind: input, shape index: {}]   ;;  %s4190_s4 = inlined_call_operand.vmem [shape: f32[1,128], index: 4, kind: input, shape index: {}]   ;;  %s4191_s5 = inlined_call_operand.vmem [shape: f32[1,128], index: 5, kind: input, shape index: {}]   ;;  %s4192_s7 = inlined_call_operand.vmem [shape: bf16[2,8,8,128], index: 7, kind: output, shape index: {}, may-alias: {0,7}]  }
   0x1   :  { %v3046_v0 = vld [vmem:[%s4185_s3 + $0x38] sm:$0xff]   ;;  %v3047_v1 = vld [vmem:[%s4185_s3 + $0x30] sm:$0xff]   ;;  %v3048_v2 = vld [vmem:[%s4185_s3 + $0x28] sm:$0xff]  }
   0x2   :  { %2725 = vmatprep.subr.bf16.mxu0 %v3046_v0  ;;  %v3049_v3 = vld [vmem:[%s4185_s3 + $0x20] sm:$0xff]   ;;  %v3194_v8 = vld [vmem:[%s4186_s0 + $0x8] sm:$0xff]   ;;  %v3199_v9 = vld [vmem:[%s4186_s0 + $0x10] sm:$0xff]  }
   0x3   :  { %2726 = vmatpush3.bf16.msra.mxu0 %v3046_v0  ;;  %v3182_v4 = vld [vmem:[%s4186_s0] sm:$0xff]   ;;  %4223 = vst [vmem:[#allocation3_spill] sm:$0xff] %v3199_v9  ;;  %v3204_v10 = vld [vmem:[%s4186_s0 + $0x18] sm:$0xff]   ;;  %v4208_v12 = vunpack.c.l.bf16 %v3194_v8  ;;  %v4207_v13 = vunpack.c.h.bf16 %v3194_v8  ;;  %v4202_v14 = vunpack.c.l.bf16 %v3199_v9  ;;  %v4201_v15 = vunpack.c.h.bf16 %v3199_v9  ;;  %v3051_v30 = vld [vmem:[%s4185_s3 + $0x10] sm:$0xff]  }
   0x4   :  { %2727 = vmatprep.subr.bf16.mxu0 %v3047_v1  ;;  %v3187_v5 = vld [vmem:[%s4187_s1] ss:$0 sm:$0xff]  ;;  %v4206_v6 = vunpack.c.l.bf16 %v3182_v4  ;;  %v4205_v7 = vunpack.c.h.bf16 %v3182_v4  ;;  %4224 = vst [vmem:[#allocation4_spill] sm:$0xff] %v3204_v10  ;;  %v3050_v16 = vld [vmem:[%s4185_s3 + $0x18] sm:$0xff]   ;;  %v4204_v19 = vunpack.c.l.bf16 %v3204_v10  ;;  %v4203_v20 = vunpack.c.h.bf16 %v3204_v10  ;;  %v3056_v35 = vld [vmem:[%s4189_s6 + $0x70] sm:$0xff]  }
   0x5   :  { %v3209_v11 = vld [vmem:[%s4188_s2] ss:$0 sm:$0xff]  ;;  %v68_v21 = vmul.f32 %v4208_v12, %v3187_v5  ;;  %v69_v22 = vmul.f32 %v4207_v13, %v3187_v5  ;;  %v70_v23 = vmul.f32 %v4202_v14, %v3187_v5  ;;  %v71_v24 = vmul.f32 %v4201_v15, %v3187_v5  ;;  %v3054_v25 = vld [vmem:[%s4189_s6 + $0x78] sm:$0xff]   ;;  %v3278_v40 = vld [vmem:[%s4186_s0 + $0x28] sm:$0xff]  }
   0x6   :  { %v66_v17 = vmul.f32 %v4206_v6, %v3187_v5  ;;  %v67_v18 = vmul.f32 %v4205_v7, %v3187_v5  ;;  %v72_v28 = vmul.f32 %v4204_v19, %v3187_v5  ;;  %v3249_v29 = vld [vmem:[%s4186_s0 + $0x20] sm:$0xff]   ;;  %2757 = vmatprep.subr.bf16.mxu1 %v3054_v25  ;;  %v73_v38 = vmul.f32 %v4203_v20, %v3187_v5  ;;  %v3283_v41 = vld [vmem:[%s4186_s0 + $0x30] sm:$0xff]   ;;  %v3289_v43 = vld [vmem:[%s4186_s0 + $0x38] sm:$0xff]  }
   0x7   :  { %2728 = vmatpush3.bf16.msra.mxu0 %v3047_v1  ;;  %4225 = vst [vmem:[#allocation5_spill] sm:$0xff] %v3249_v29  ;;  %v3255_v31 = vadd.f32 %v3209_v11, %v68_v21  ;;  %v3258_v32 = vadd.f32 %v3209_v11, %v69_v22  ;;  %v3261_v33 = vadd.f32 %v3209_v11, %v70_v23  ;;  %4226 = vst [vmem:[#allocation6_spill] sm:$0xff] %v3278_v40  ;;  %v3058_v44 = vld [vmem:[%s4189_s6 + $0x68] sm:$0xff]   ;;  %v3089_v7 = vld [vmem:[%s4189_s6 + $0x170] sm:$0xff]  }
   0x8   :  { %2729 = vmatprep.subr.bf16.mxu0 %v3048_v2  ;;  %v89_v26 = vadd.f32 %v3209_v11, %v66_v17  ;;  %v90_v27 = vadd.f32 %v3209_v11, %v67_v18  ;;  %v3264_v34 = vadd.f32 %v3209_v11, %v71_v24  ;;  %v3273_v39 = vadd.f32 %v3209_v11, %v72_v28  ;;  %v3052_v49 = vld [vmem:[%s4185_s3 + $0x8] sm:$0xff]   ;;  %v3053_v18 = vld [vmem:[%s4185_s3] sm:$0xff]  }
   0x9   :  { %4227 = vst [vmem:[#allocation7_spill] sm:$0xff] %v3283_v41  ;;  %2758 = vmatpush3.bf16.msra.mxu1 %v3054_v25  ;;  %v107_v42 = vmax.f32 %v3255_v31, 0.0  ;;  %4228 = vst [vmem:[#allocation8_spill] sm:$0xff] %v3289_v43  ;;  %v108_v46 = vmax.f32 %v3258_v32, 0.0  ;;  %v109_v47 = vmax.f32 %v3261_v33, 0.0  ;;  %v4198_v48 = vunpack.c.l.bf16 %v3249_v29 }
   0xa   :  { %v105_v36 = vmax.f32 %v89_v26, 0.0  ;;  %v106_v37 = vmax.f32 %v90_v27, 0.0  ;;  %2759 = vmatprep.subr.bf16.mxu1 %v3056_v35  ;;  %v110_v50 = vmax.f32 %v3264_v34, 0.0  ;;  %v111_v51 = vmax.f32 %v3273_v39, 0.0 }
   0xb   :  { %2730 = vmatpush3.bf16.msra.mxu0 %v3048_v2  ;;  %v4197_v52 = vunpack.c.h.bf16 %v3249_v29  ;;  %v4200_v53 = vunpack.c.l.bf16 %v3278_v40  ;;  %v96_v54 = vadd.f32 %v3209_v11, %v73_v38  ;;  %v74_v55 = vmul.f32 %v4198_v48, %v3187_v5  ;;  %v3057_v38 = vld [vmem:[%s4189_s6 + $0x30] sm:$0xff]  }
   0xc   :  { %2731 = vmatprep.subr.bf16.mxu0 %v3049_v3  ;;  %v121_v45 = vpack.c.bf16 %v106_v37, %v105_v36  ;;  %v4199_v56 = vunpack.c.h.bf16 %v3278_v40  ;;  %v4194_v57 = vunpack.c.l.bf16 %v3283_v41  ;;  %v4193_v60 = vunpack.c.h.bf16 %v3283_v41 }
   0xd   :  { %v75_v58 = vmul.f32 %v4197_v52, %v3187_v5  ;;  %v76_v59 = vmul.f32 %v4200_v53, %v3187_v5  ;;  %v4196_v61 = vunpack.c.l.bf16 %v3289_v43  ;;  %2760 = vmatpush3.bf16.msra.mxu1 %v3056_v35  ;;  %v97_v62 = vadd.f32 %v3209_v11, %v74_v55  ;;  %v3055_v35 = vld [vmem:[%s4189_s6 + $0x38] sm:$0xff]   ;;  %v3083_v52 = vld [vmem:[%s4189_s6 + $0xc8] sm:$0xff]  }
   0xe   :  { %2741 = vmatprep.mubr.bf16.mxu0 %v121_v45  ;;  %v77_v63 = vmul.f32 %v4199_v56, %v3187_v5  ;;  %v78_v0 = vmul.f32 %v4194_v57, %v3187_v5  ;;  %v4195_v1 = vunpack.c.h.bf16 %v3289_v43  ;;  %2761 = vmatprep.subr.bf16.mxu1 %v3058_v44  ;;  %v112_v21 = vmax.f32 %v96_v54, 0.0  ;;  %v3064_v54 = vld [vmem:[%s4189_s6 + $0x50] sm:$0xff]   ;;  %v3063_v55 = vld [vmem:[%s4189_s6 + $0x18] sm:$0xff]  }
   0xf   :  { %2732 = vmatpush3.bf16.msra.mxu0 %v3049_v3  ;;  %v98_v2 = vadd.f32 %v3209_v11, %v75_v58  ;;  %v99_v3 = vadd.f32 %v3209_v11, %v76_v59  ;;  %v80_v17 = vmul.f32 %v4196_v61, %v3187_v5  ;;  %v113_v25 = vmax.f32 %v97_v62, 0.0  ;;  %v3066_v58 = vld [vmem:[%s4189_s6 + $0x48] sm:$0xff]   ;;  %v3065_v62 = vld [vmem:[%s4189_s6 + $0x10] sm:$0xff]  }
  0x10   :  { %2733 = vmatprep.subr.bf16.mxu0 %v3050_v16  ;;  %v100_v22 = vadd.f32 %v3209_v11, %v77_v63  ;;  %v101_v23 = vadd.f32 %v3209_v11, %v78_v0  ;;  %v81_v24 = vmul.f32 %v4195_v1, %v3187_v5  ;;  %v122_v37 = vpack.c.bf16 %v108_v46, %v107_v42  ;;  %v3068_v63 = vld [vmem:[%s4189_s6 + $0x40] sm:$0xff]   ;;  %v3067_v0 = vld [vmem:[%s4189_s6 + $0x8] sm:$0xff]  }
  0x11   :  { %v114_v26 = vmax.f32 %v98_v2, 0.0  ;;  %v103_v28 = vadd.f32 %v3209_v11, %v80_v17  ;;  %2762 = vmatpush3.bf16.msra.mxu1 %v3058_v44  ;;  %v123_v39 = vpack.c.bf16 %v110_v50, %v109_v47  ;;  %v124_v44 = vpack.c.bf16 %v112_v21, %v111_v51  ;;  %v3062_v50 = vld [vmem:[%s4189_s6 + $0x58] sm:$0xff]   ;;  %v3061_v51 = vld [vmem:[%s4189_s6 + $0x20] sm:$0xff]  }
  0x12   :  { %v116_v31 = vmax.f32 %v100_v22, 0.0  ;;  %v104_v32 = vadd.f32 %v3209_v11, %v81_v24  ;;  %v117_v33 = vmax.f32 %v101_v23, 0.0  ;;  %v4209_v59 = vmov 0.0   ;;  %v3070_v2 = vld [vmem:[%s4189_s6 + $0xb8] sm:$0xff]   ;;  %v3440_v17 = vld [vmem:[%s4190_s4] ss:$0 sm:$0xff] }
  0x13   :  { %2734 = vmatpush3.bf16.msra.mxu0 %v3050_v16  ;;  %v79_v16 = vmul.f32 %v4193_v60, %v3187_v5  ;;  %v119_v5 = vmax.f32 %v103_v28, 0.0  ;;  %v125_v45 = vpack.c.bf16 %v114_v26, %v113_v25  ;;  %352 = vst [vmem:[#allocation2] sm:$0xff] %v4209_v59  ;;  %353 = vst [vmem:[#allocation2 + $0x8] sm:$0xff] %v4209_v59  ;;  %v3445_v21 = vld [vmem:[%s4191_s5] ss:$0 sm:$0xff] }
  0x14   :  { %2735 = vmatprep.subr.bf16.mxu0 %v3051_v30  ;;  %v120_v36 = vmax.f32 %v104_v32, 0.0  ;;  %354 = vst [vmem:[#allocation2 + $0x10] sm:$0xff] %v4209_v59  ;;  %355 = vst [vmem:[#allocation2 + $0x18] sm:$0xff] %v4209_v59 }
  0x15   :  { %v102_v27 = vadd.f32 %v3209_v11, %v79_v16  ;;  %v3059_v11 = vld [vmem:[%s4189_s6 + $0x28] sm:$0xff]   ;;  %357 = vst [vmem:[#allocation2 + $0x28] sm:$0xff] %v4209_v59  ;;  %358 = vst [vmem:[#allocation2 + $0x30] sm:$0xff] %v4209_v59  ;;  %v3434_v16 = vld [vmem:[%s4189_s6 + $0xf8] sm:$0xff]  }
  0x16   :  { %v128_v47 = vpack.c.bf16 %v120_v36, %v119_v5  ;;  %360 = vst [vmem:[#allocation2 + $0x40] sm:$0xff] %v4209_v59  ;;  %361 = vst [vmem:[#allocation2 + $0x48] sm:$0xff] %v4209_v59 }
  0x17   :  { %2736 = vmatpush3.bf16.msra.mxu0 %v3051_v30  ;;  %v115_v30 = vmax.f32 %v99_v3, 0.0  ;;  %v118_v34 = vmax.f32 %v102_v27, 0.0  ;;  %363 = vst [vmem:[#allocation2 + $0x58] sm:$0xff] %v4209_v59  ;;  %364 = vst [vmem:[#allocation2 + $0x60] sm:$0xff] %v4209_v59  ;;  %v3069_v3 = vld [vmem:[%s4189_s6] sm:$0xff]  }
  0x18   :  { %2737 = vmatprep.subr.bf16.mxu0 %v3052_v49  ;;  %366 = vst [vmem:[#allocation2 + $0x70] sm:$0xff] %v4209_v59  ;;  %367 = vst [vmem:[#allocation2 + $0x78] sm:$0xff] %v4209_v59 }
  0x19   :  { %v126_v42 = vpack.c.bf16 %v116_v31, %v115_v30  ;;  %v127_v46 = vpack.c.bf16 %v118_v34, %v117_v33  ;;  %369 = vst [vmem:[#allocation2 + $0x88] sm:$0xff] %v4209_v59  ;;  %370 = vst [vmem:[#allocation2 + $0x90] sm:$0xff] %v4209_v59 }
  0x1a   :  { %372 = vst [vmem:[#allocation2 + $0xa0] sm:$0xff] %v4209_v59  ;;  %373 = vst [vmem:[#allocation2 + $0xa8] sm:$0xff] %v4209_v59 }
  0x1b   :  { %2738 = vmatpush3.bf16.msra.mxu0 %v3052_v49  ;;  %v3060_v49 = vld [vmem:[%s4189_s6 + $0x60] sm:$0xff]   ;;  %375 = vst [vmem:[#allocation2 + $0xb8] sm:$0xff] %v4209_v59  ;;  %376 = vst [vmem:[#allocation2 + $0xc0] sm:$0xff] %v4209_v59 }
  0x1c   :  { %2739 = vmatprep.subr.bf16.mxu0 %v3053_v18  ;;  %2763 = vmatprep.subr.bf16.mxu1 %v3060_v49  ;;  %378 = vst [vmem:[#allocation2 + $0xd0] sm:$0xff] %v4209_v59  ;;  %379 = vst [vmem:[#allocation2 + $0xd8] sm:$0xff] %v4209_v59 }
  0x1d   :  { %2764 = vmatpush3.bf16.msra.mxu1 %v3060_v49  ;;  %380 = vst [vmem:[#allocation2 + $0xe0] sm:$0xff] %v4209_v59  ;;  %381 = vst [vmem:[#allocation2 + $0xe8] sm:$0xff] %v4209_v59 }
  0x1e   :  { %2765 = vmatprep.subr.bf16.mxu1 %v3062_v50  ;;  %382 = vst [vmem:[#allocation2 + $0xf0] sm:$0xff] %v4209_v59  ;;  %383 = vst [vmem:[#allocation2 + $0xf8] sm:$0xff] %v4209_v59 }
  0x1f   :  { %2740 = vmatpush3.bf16.msra.mxu0 %v3053_v18  ;;  %384 = vst [vmem:[#allocation2 + $0x100] sm:$0xff] %v4209_v59  ;;  %385 = vst [vmem:[#allocation2 + $0x108] sm:$0xff] %v4209_v59 }
  0x20   :  { %2789 = vmatprep.subr.bf16.mxu0 %v3055_v35  ;;  %387 = vst [vmem:[#allocation2 + $0x118] sm:$0xff] %v4209_v59  ;;  %388 = vst [vmem:[#allocation2 + $0x120] sm:$0xff] %v4209_v59 }
  0x21   :  { %2766 = vmatpush3.bf16.msra.mxu1 %v3062_v50  ;;  %390 = vst [vmem:[#allocation2 + $0x130] sm:$0xff] %v4209_v59  ;;  %391 = vst [vmem:[#allocation2 + $0x138] sm:$0xff] %v4209_v59 }
  0x22   :  { %2742 = vmatmul.mubr.bf16.vlgmr.msra.gmra.mxu0 %v122_v37  ;;  %2767 = vmatprep.subr.bf16.mxu1 %v3064_v54  ;;  %393 = vst [vmem:[#allocation2 + $0x148] sm:$0xff] %v4209_v59  ;;  %394 = vst [vmem:[#allocation2 + $0x150] sm:$0xff] %v4209_v59 }
  0x23   :  { %2745 = vmatprep.mubr.bf16.mxu0 %v123_v39  ;;  %2790 = vmatpush3.bf16.msra.mxu0 %v3055_v35  ;;  %396 = vst [vmem:[#allocation2 + $0x160] sm:$0xff] %v4209_v59  ;;  %397 = vst [vmem:[#allocation2 + $0x168] sm:$0xff] %v4209_v59 }
  0x24   :  { %2791 = vmatprep.subr.bf16.mxu0 %v3057_v38  ;;  %399 = vst [vmem:[#allocation2 + $0x178] sm:$0xff] %v4209_v59  ;;  %400 = vst [vmem:[#allocation2 + $0x180] sm:$0xff] %v4209_v59 }
  0x25   :  { %2768 = vmatpush3.bf16.msra.mxu1 %v3064_v54  ;;  %402 = vst [vmem:[#allocation2 + $0x190] sm:$0xff] %v4209_v59  ;;  %403 = vst [vmem:[#allocation2 + $0x198] sm:$0xff] %v4209_v59  ;;  %v3072_v54 = vld [vmem:[%s4189_s6 + $0xb0] sm:$0xff]  }
  0x26   :  { %405 = vst [vmem:[#allocation2 + $0x1a8] sm:$0xff] %v4209_v59  ;;  %406 = vst [vmem:[#allocation2 + $0x1b0] sm:$0xff] %v4209_v59  ;;  %2769 = vmatprep.subr.bf16.mxu1 %v3066_v58  ;;  %v808_v6 = vld [vmem:[#allocation2 + $0xf9] sm:$0xff] }
  0x27   :  { %2792 = vmatpush3.bf16.msra.mxu0 %v3057_v38  ;;  %408 = vst [vmem:[#allocation2 + $0x1c0] sm:$0xff] %v4209_v59  ;;  %409 = vst [vmem:[#allocation2 + $0x1c8] sm:$0xff] %v4209_v59 }
  0x28   :  { %2793 = vmatprep.subr.bf16.mxu0 %v3059_v11  ;;  %410 = vst [vmem:[#allocation2 + $0x1d0] sm:$0xff] %v4209_v59  ;;  %411 = vst [vmem:[#allocation2 + $0x1d8] sm:$0xff] %v4209_v59 }
  0x29   :  { %2770 = vmatpush3.bf16.msra.mxu1 %v3066_v58  ;;  %v429_v58 = vld [vmem:[#allocation2 + $0x7] sm:$0xff] }
  0x2a   :  { %2746 = vmatmul.mubr.bf16.gmra.mxu0 %v124_v44  ;;  %2771 = vmatprep.subr.bf16.mxu1 %v3068_v63 }
  0x2b   :  { %2749 = vmatprep.mubr.bf16.mxu0 %v125_v45  ;;  %2794 = vmatpush3.bf16.msra.mxu0 %v3059_v11 }
  0x2c   :  { %2795 = vmatprep.subr.bf16.mxu0 %v3061_v51 }
  0x2d   :  { %2772 = vmatpush3.bf16.msra.mxu1 %v3068_v63 }
  0x2e   :  { %2821 = vmatprep.subr.bf16.mxu1 %v3070_v2 }
  0x2f   :  { %2796 = vmatpush3.bf16.msra.mxu0 %v3061_v51 }
  0x30   :  { %2797 = vmatprep.subr.bf16.mxu0 %v3063_v55 }
  0x32   :  { %2750 = vmatmul.mubr.bf16.gmra.mxu0 %v126_v42 }
  0x33   :  { %2753 = vmatprep.mubr.bf16.mxu0 %v127_v46  ;;  %2798 = vmatpush3.bf16.msra.mxu0 %v3063_v55 }
  0x34   :  { %2799 = vmatprep.subr.bf16.mxu0 %v3065_v62 }
  0x37   :  { %2800 = vmatpush3.bf16.msra.mxu0 %v3065_v62 }
  0x38   :  { %2801 = vmatprep.subr.bf16.mxu0 %v3067_v0 }
  0x3a   :  { %2754 = vmatmul.mubr.bf16.gmra.mxu0 %v128_v47 }
  0x3b   :  { %2802 = vmatpush3.bf16.msra.mxu0 %v3067_v0 }
  0x3c   :  { %2803 = vmatprep.subr.bf16.mxu0 %v3069_v3 }
  0x3f   :  { %2804 = vmatpush3.bf16.msra.mxu0 %v3069_v3 }
  0x40   :  { %2853 = vmatprep.subr.bf16.mxu0 %v3434_v16 }
  0xe2   :  { %v2743_v18 = vpop.f32.mrf.mxu0 }
  0xe3   :  { %v299_v22 = vmul.f32 %v2743_v18, %v3440_v17 }
  0xe4   :  { %v227_v23 = vpop.f32.mrf.mxu0 }
  0xe5   :  { %v322_v24 = vadd.f32 %v3445_v21, %v299_v22  ;;  %v297_v25 = vmul.f32 %v3440_v17, %v227_v23 }
  0xe6   :  { %v2744_v26 = vpop.f32.mrf.mxu0 }
  0xe7   :  { %v3450_v27 = vmax.f32 %v322_v24, 0.0  ;;  %v320_v28 = vadd.f32 %v3445_v21, %v297_v25  ;;  %v300_v30 = vmul.f32 %v2744_v26, %v3440_v17  ;;  %v3074_v26 = vld [vmem:[%s4189_s6 + $0xa8] sm:$0xff]  }
  0xe8   :  { %v230_v31 = vpop.f32.mrf.mxu0 }
  0xe9   :  { %415 = vst [vmem:[#allocation2 + $0x50] sm:$0xff] %v3450_v27  ;;  %v3455_v32 = vmax.f32 %v320_v28, 0.0  ;;  %v323_v33 = vadd.f32 %v3445_v21, %v300_v30  ;;  %v298_v34 = vmul.f32 %v3440_v17, %v230_v31 }
  0xea   :  { %v2747_v35 = vpop.f32.mrf.mxu0 }
  0xeb   :  { %413 = vst [vmem:[#allocation2 + $0x20] sm:$0xff] %v3455_v32  ;;  %v3460_v5 = vmax.f32 %v323_v33, 0.0  ;;  %v321_v36 = vadd.f32 %v3445_v21, %v298_v34  ;;  %v303_v37 = vmul.f32 %v2747_v35, %v3440_v17  ;;  %v485_v38 = vpack.c.bf16 %v3455_v32, %v4209_v59 }
  0xec   :  { %v243_v39 = vpop.f32.mrf.mxu0 }
  0xed   :  { %416 = vst [vmem:[#allocation2 + $0x68] sm:$0xff] %v3460_v5  ;;  %v3467_v11 = vmax.f32 %v321_v36, 0.0  ;;  %v326_v44 = vadd.f32 %v3445_v21, %v303_v37  ;;  %v301_v45 = vmul.f32 %v3440_v17, %v243_v39  ;;  %2773 = vmatprep.mubr.bf16.mxu1 %v485_v38  ;;  %v1221_v42 = vpack.c.bf16 %v3460_v5, %v3450_v27 }
  0xee   :  { %v2748_v46 = vpop.f32.mrf.mxu0 }
  0xef   :  { %414 = vst [vmem:[#allocation2 + $0x38] sm:$0xff] %v3467_v11  ;;  %v342_v47 = vmax.f32 %v326_v44, 0.0  ;;  %v324_v49 = vadd.f32 %v3445_v21, %v301_v45  ;;  %v304_v50 = vmul.f32 %v2748_v46, %v3440_v17  ;;  %v486_v51 = vpack.c.bf16 %v3450_v27, %v3467_v11  ;;  %v3073_v46 = vld [vmem:[%s4189_s6 + $0xf0] sm:$0xff]  }
  0xf0   :  { %v246_v55 = vpop.f32.mrf.mxu0  ;;  %v3502_v36 = vld [vmem:[#allocation2 + $0x4f] sm:$0xff] }
  0xf1   :  { %419 = vst [vmem:[#allocation2 + $0xb0] sm:$0xff] %v342_v47  ;;  %v3481_v62 = vmax.f32 %v324_v49, 0.0  ;;  %v327_v63 = vadd.f32 %v3445_v21, %v304_v50  ;;  %v302_v0 = vmul.f32 %v3440_v17, %v246_v55  ;;  %2774 = vmatmul.mubr.bf16.vlgmr.msra.gmra.mxu1 %v486_v51  ;;  %v3076_v51 = vld [vmem:[%s4189_s6 + $0xa0] sm:$0xff]   ;;  %v3661_v15 = vld [vmem:[#allocation2 + $0x51] sm:$0xff] }
  0xf2   :  { %v2751_v3 = vpop.f32.mrf.mxu0  ;;  %v3485_v18 = vld [vmem:[#allocation2 + $0x1f] sm:$0xff]  ;;  %2822 = vmatpush3.bf16.msra.mxu1 %v3070_v2  ;;  %v3105_v27 = vld [vmem:[%s4189_s6 + $0x1f0] sm:$0xff]  }
  0xf3   :  { %417 = vst [vmem:[#allocation2 + $0x80] sm:$0xff] %v3481_v62  ;;  %v343_v22 = vmax.f32 %v327_v63, 0.0  ;;  %v325_v23 = vadd.f32 %v3445_v21, %v302_v0  ;;  %v307_v24 = vmul.f32 %v2751_v3, %v3440_v17  ;;  %v445_v25 = vpack.c.bf16 %v3485_v18, %v429_v58  ;;  %2823 = vmatprep.subr.bf16.mxu1 %v3072_v54 }
  0xf4   :  { %v259_v28 = vpop.f32.mrf.mxu0  ;;  %v487_v30 = vpack.c.bf16 %v3481_v62, %v3460_v5  ;;  %v3529_v0 = vld [vmem:[#allocation2 + $0x67] sm:$0xff] }
  0xf5   :  { %420 = vst [vmem:[#allocation2 + $0xc8] sm:$0xff] %v343_v22  ;;  %v3496_v2 = vmax.f32 %v325_v23, 0.0  ;;  %v330_v31 = vadd.f32 %v3445_v21, %v307_v24  ;;  %v305_v33 = vmul.f32 %v3440_v17, %v259_v28  ;;  %2805 = vmatprep.mubr.bf16.mxu0 %v445_v25  ;;  %v3504_v37 = vpack.c.bf16 %v343_v22, %v342_v47  ;;  %v3668_v20 = vld [vmem:[#allocation2 + $0x69] sm:$0xff] }
  0xf6   :  { %v2752_v34 = vpop.f32.mrf.mxu0  ;;  %v3500_v35 = vld [vmem:[#allocation2 + $0x37] sm:$0xff]  ;;  %2777 = vmatprep.mubr.bf16.mxu1 %v487_v30  ;;  %2824 = vmatpush3.bf16.msra.mxu1 %v3072_v54  ;;  %v1019_v19 = vpack.c.bf16 %v3529_v0, %v3502_v36 }
  0xf7   :  { %418 = vst [vmem:[#allocation2 + $0x98] sm:$0xff] %v3496_v2  ;;  %v3507_v38 = vmax.f32 %v330_v31, 0.0  ;;  %v328_v39 = vadd.f32 %v3445_v21, %v305_v33  ;;  %v308_v44 = vmul.f32 %v2752_v34, %v3440_v17  ;;  %v3513_v45 = vpack.c.bf16 %v3502_v36, %v3500_v35  ;;  %2825 = vmatprep.subr.bf16.mxu1 %v3074_v26  ;;  %v3078_v30 = vld [vmem:[%s4189_s6 + $0x98] sm:$0xff]   ;;  %v3092_v36 = vld [vmem:[%s4189_s6 + $0x120] sm:$0xff]  }
  0xf8   :  { %v262_v49 = vpop.f32.mrf.mxu0  ;;  %v488_v50 = vpack.c.bf16 %v342_v47, %v3496_v2  ;;  %v3648_v56 = vld [vmem:[#allocation2 + $0x39] sm:$0xff]  ;;  %v3696_v12 = vld [vmem:[#allocation2 + $0xb1] sm:$0xff] }
  0xf9   :  { %423 = vst [vmem:[#allocation2 + $0x140] sm:$0xff] %v3507_v38  ;;  %v3523_v54 = vmax.f32 %v328_v39, 0.0  ;;  %v331_v55 = vadd.f32 %v3445_v21, %v308_v44  ;;  %v306_v58 = vmul.f32 %v3440_v17, %v262_v49  ;;  %2806 = vmatmul.mubr.bf16.vlgmr.msra.gmra.mxu0 %v3513_v45  ;;  %v3558_v44 = vld [vmem:[#allocation2 + $0xaf] sm:$0xff]  ;;  %v3666_v14 = vpack.c.bf16 %v3661_v15, %v3648_v56 }
  0xfa   :  { %v2755_v63 = vpop.f32.mrf.mxu0  ;;  %2854 = vmatpush3.bf16.msra.mxu0 %v3434_v16  ;;  %v3531_v47 = vld [vmem:[#allocation2 + $0x7f] sm:$0xff]  ;;  %2778 = vmatmul.mubr.bf16.gmra.mxu1 %v488_v50  ;;  %v3075_v16 = vld [vmem:[%s4189_s6 + $0xe8] sm:$0xff]  }
  0xfb   :  { %421 = vst [vmem:[#allocation2 + $0x110] sm:$0xff] %v3523_v54  ;;  %v3534_v3 = vmax.f32 %v331_v55, 0.0  ;;  %v329_v22 = vadd.f32 %v3445_v21, %v306_v58  ;;  %v311_v23 = vmul.f32 %v2755_v63, %v3440_v17  ;;  %v3540_v24 = vpack.c.bf16 %v3531_v47, %v3529_v0  ;;  %2855 = vmatprep.subr.bf16.mxu0 %v3073_v46  ;;  %v3657_v53 = vld [vmem:[#allocation2 + $0x81] sm:$0xff] }
  0xfc   :  { %2826 = vmatpush3.bf16.msra.mxu1 %v3074_v26  ;;  %v275_v25 = vpop.f32.mrf.mxu0  ;;  %v489_v28 = vpack.c.bf16 %v3523_v54, %v4209_v59  ;;  %v3096_v59 = vld [vmem:[%s4189_s6 + $0x110] sm:$0xff]  }
  0xfd   :  { %2827 = vmatprep.subr.bf16.mxu1 %v3076_v51  ;;  %424 = vst [vmem:[#allocation2 + $0x158] sm:$0xff] %v3534_v3  ;;  %v3551_v31 = vmax.f32 %v329_v22, 0.0  ;;  %v334_v33 = vadd.f32 %v3445_v21, %v311_v23  ;;  %v309_v26 = vmul.f32 %v3440_v17, %v275_v25  ;;  %2809 = vmatprep.mubr.bf16.mxu0 %v3540_v24  ;;  %v437_v23 = vld [vmem:[#allocation2 + $0xf7] sm:$0xff] }
  0xfe   :  { %v2756_v34 = vpop.f32.mrf.mxu0  ;;  %2856 = vmatpush3.bf16.msra.mxu0 %v3073_v46  ;;  %v3556_v39 = vld [vmem:[#allocation2 + $0x97] sm:$0xff]  ;;  %2781 = vmatprep.mubr.bf16.mxu1 %v489_v28  ;;  %v1225_v49 = vpack.c.bf16 %v3534_v3, %v3507_v38  ;;  %v3077_v46 = vld [vmem:[%s4189_s6 + $0xe0] sm:$0xff]  }
  0xff   :  { %422 = vst [vmem:[#allocation2 + $0x128] sm:$0xff] %v3551_v31  ;;  %v3563_v50 = vmax.f32 %v334_v33, 0.0  ;;  %v332_v55 = vadd.f32 %v3445_v21, %v309_v26  ;;  %v312_v58 = vmul.f32 %v2756_v34, %v3440_v17  ;;  %v3569_v63 = vpack.c.bf16 %v3558_v44, %v3556_v39  ;;  %2857 = vmatprep.subr.bf16.mxu0 %v3075_v16  ;;  %v3080_v28 = vld [vmem:[%s4189_s6 + $0x90] sm:$0xff]  }
 0x100   :  { %2828 = vmatpush3.bf16.msra.mxu1 %v3076_v51  ;;  %v278_v22 = vpop.f32.mrf.mxu0  ;;  %v490_v25 = vpack.c.bf16 %v3507_v38, %v3551_v31  ;;  %v1020_v13 = vpack.c.bf16 %v3556_v39, %v3531_v47  ;;  %v3710_v47 = vld [vmem:[#allocation2 + $0xc7] sm:$0xff]  ;;  %v3094_v39 = vld [vmem:[%s4189_s6 + $0x118] sm:$0xff]   ;;  %v3113_v38 = vld [vmem:[%s4189_s6 + $0x1d0] sm:$0xff]  }
 0x101   :  { %2829 = vmatprep.subr.bf16.mxu1 %v3078_v30  ;;  %427 = vst [vmem:[#allocation2 + $0x1a0] sm:$0xff] %v3563_v50  ;;  %v3580_v33 = vmax.f32 %v332_v55, 0.0  ;;  %v335_v51 = vadd.f32 %v3445_v21, %v312_v58  ;;  %v310_v26 = vmul.f32 %v3440_v17, %v278_v22  ;;  %2810 = vmatmul.mubr.bf16.gmra.mxu0 %v3569_v63  ;;  %v3079_v17 = vld [vmem:[%s4189_s6 + $0xd8] sm:$0xff]   ;;  %v3082_v55 = vld [vmem:[%s4189_s6 + $0x88] sm:$0xff]  }
 0x102   :  { %2858 = vmatpush3.bf16.msra.mxu0 %v3075_v16  ;;  %v3585_v34 = vld [vmem:[#allocation2 + $0x10f] sm:$0xff]  ;;  %2782 = vmatmul.mubr.bf16.gmra.mxu1 %v490_v25  ;;  %v3607_v22 = vld [vmem:[#allocation2 + $0x13f] sm:$0xff] }
 0x103   :  { %425 = vst [vmem:[#allocation2 + $0x170] sm:$0xff] %v3580_v33  ;;  %v3588_v60 = vmax.f32 %v335_v51, 0.0  ;;  %v333_v57 = vadd.f32 %v3445_v21, %v310_v26  ;;  %v449_v1 = vpack.c.bf16 %v3585_v34, %v437_v23  ;;  %2859 = vmatprep.subr.bf16.mxu0 %v3077_v46  ;;  %v491_v16 = vpack.c.bf16 %v3580_v33, %v3534_v3  ;;  %v3621_v25 = vld [vmem:[#allocation2 + $0x21] sm:$0xff] }
 0x104   :  { %2830 = vmatpush3.bf16.msra.mxu1 %v3078_v30  ;;  %v3084_v51 = vld [vmem:[%s4189_s6 + $0x80] sm:$0xff]  }
 0x105   :  { %2831 = vmatprep.subr.bf16.mxu1 %v3080_v28  ;;  %428 = vst [vmem:[#allocation2 + $0x1b8] sm:$0xff] %v3588_v60  ;;  %v3601_v58 = vmax.f32 %v333_v57, 0.0  ;;  %2813 = vmatprep.mubr.bf16.mxu0 %v449_v1  ;;  %v3081_v57 = vld [vmem:[%s4189_s6 + $0xd0] sm:$0xff]  }
 0x106   :  { %2785 = vmatprep.mubr.bf16.mxu1 %v491_v16  ;;  %2860 = vmatpush3.bf16.msra.mxu0 %v3077_v46  ;;  %v3605_v30 = vld [vmem:[#allocation2 + $0x127] sm:$0xff] }
 0x107   :  { %426 = vst [vmem:[#allocation2 + $0x188] sm:$0xff] %v3601_v58  ;;  %v3612_v23 = vpack.c.bf16 %v3607_v22, %v3605_v30  ;;  %2861 = vmatprep.subr.bf16.mxu0 %v3079_v17  ;;  %v3619_v1 = vpack.c.bf16 %v3563_v50, %v3601_v58  ;;  %v800_v46 = vld [vmem:[#allocation2 + $0x9] sm:$0xff] }
 0x108   :  { %2832 = vmatpush3.bf16.msra.mxu1 %v3080_v28  ;;  %v3627_v28 = vld [vmem:[#allocation2 + $0x157] sm:$0xff]  ;;  %v816_v16 = vpack.c.bf16 %v3621_v25, %v800_v46  ;;  %v3646_v48 = vld [vmem:[#allocation2 + $0x19f] sm:$0xff] }
 0x109   :  { %2833 = vmatprep.subr.bf16.mxu1 %v3082_v55  ;;  %2814 = vmatmul.mubr.bf16.gmra.mxu0 %v3612_v23  ;;  %v3758_v21 = vld [vmem:[#allocation2 + $0x1a1] sm:$0xff] }
 0x10a   :  { %2862 = vmatpush3.bf16.msra.mxu0 %v3079_v17  ;;  %v3629_v26 = vld [vmem:[#allocation2 + $0x16f] sm:$0xff]  ;;  %2786 = vmatmul.mubr.bf16.gmra.mxu1 %v3619_v1  ;;  %v3086_v17 = vld [vmem:[%s4189_s6 + $0x138] sm:$0xff]  }
 0x10b   :  { %v3635_v61 = vpack.c.bf16 %v3629_v26, %v3627_v28  ;;  %2863 = vmatprep.subr.bf16.mxu0 %v3081_v57  ;;  %2837 = vmatprep.mubr.bf16.mxu1 %v816_v16  ;;  %v3085_v16 = vld [vmem:[%s4189_s6 + $0xc0] sm:$0xff]  }
 0x10c   :  { %2834 = vmatpush3.bf16.msra.mxu1 %v3082_v55 }
 0x10d   :  { %2835 = vmatprep.subr.bf16.mxu1 %v3084_v51  ;;  %2817 = vmatprep.mubr.bf16.mxu0 %v3635_v61 }
 0x10e   :  { %2864 = vmatpush3.bf16.msra.mxu0 %v3081_v57  ;;  %v3644_v46 = vld [vmem:[#allocation2 + $0x187] sm:$0xff]  ;;  %v1018_v57 = vpack.c.bf16 %v3500_v35, %v3485_v18  ;;  %v3675_v18 = vpack.c.bf16 %v3657_v53, %v3668_v20  ;;  %v3087_v35 = vld [vmem:[%s4189_s6 + $0x178] sm:$0xff]  }
 0x10f   :  { %v3652_v55 = vpack.c.bf16 %v3646_v48, %v3644_v46  ;;  %2865 = vmatprep.subr.bf16.mxu0 %v3083_v52 }
 0x110   :  { %2836 = vmatpush3.bf16.msra.mxu1 %v3084_v51  ;;  %v3088_v51 = vld [vmem:[%s4189_s6 + $0x130] sm:$0xff]  }
 0x111   :  { %2885 = vmatprep.subr.bf16.mxu1 %v3086_v17  ;;  %2818 = vmatmul.mubr.bf16.gmra.mxu0 %v3652_v55 }
 0x112   :  { %2866 = vmatpush3.bf16.msra.mxu0 %v3083_v52  ;;  %2869 = vmatprep.mubr.bf16.mxu0 %v1018_v57  ;;  %v3090_v52 = vld [vmem:[%s4189_s6 + $0x128] sm:$0xff]   ;;  %v3685_v57 = vld [vmem:[#allocation2 + $0x99] sm:$0xff] }
 0x113   :  { %2867 = vmatprep.subr.bf16.mxu0 %v3085_v16  ;;  %2838 = vmatmul.mubr.bf16.vlgmr.msra.gmra.mxu1 %v3666_v14  ;;  %v1424_v5 = vpack.c.bf16 %v3685_v57, %v3657_v53  ;;  %v3815_v53 = vld [vmem:[#allocation2 + $0xc9] sm:$0xff] }
 0x114   :  { %2886 = vmatpush3.bf16.msra.mxu1 %v3086_v17  ;;  %2841 = vmatprep.mubr.bf16.mxu1 %v3675_v18  ;;  %v3692_v17 = vld [vmem:[#allocation2 + $0x111] sm:$0xff] }
 0x115   :  { %2887 = vmatprep.subr.bf16.mxu1 %v3088_v51  ;;  %v820_v0 = vpack.c.bf16 %v3692_v17, %v808_v6  ;;  %v1021_v6 = vpack.c.bf16 %v3710_v47, %v3558_v44  ;;  %v3732_v44 = vld [vmem:[#allocation2 + $0x159] sm:$0xff] }
 0x116   :  { %2868 = vmatpush3.bf16.msra.mxu0 %v3085_v16  ;;  %v3700_v16 = vpack.c.bf16 %v3696_v12, %v3685_v57 }
 0x117   :  { %2917 = vmatprep.subr.bf16.mxu0 %v3087_v35 }
 0x118   :  { %2888 = vmatpush3.bf16.msra.mxu1 %v3088_v51  ;;  %v3093_v51 = vld [vmem:[%s4189_s6 + $0x160] sm:$0xff]  }
 0x119   :  { %2870 = vmatmul.mubr.bf16.vlgmr.msra.gmra.mxu0 %v1019_v19  ;;  %2889 = vmatprep.subr.bf16.mxu1 %v3090_v52  ;;  %v3091_v19 = vld [vmem:[%s4189_s6 + $0x168] sm:$0xff]  }
 0x11a   :  { %2873 = vmatprep.mubr.bf16.mxu0 %v1020_v13  ;;  %2918 = vmatpush3.bf16.msra.mxu0 %v3087_v35  ;;  %v3715_v13 = vld [vmem:[#allocation2 + $0x129] sm:$0xff]  ;;  %v3722_v35 = vld [vmem:[#allocation2 + $0x171] sm:$0xff] }
 0x11b   :  { %2919 = vmatprep.subr.bf16.mxu0 %v3089_v7  ;;  %2842 = vmatmul.mubr.bf16.gmra.mxu1 %v3700_v16  ;;  %v1426_v57 = vpack.c.bf16 %v3715_v13, %v3692_v17  ;;  %v3111_v17 = vld [vmem:[%s4189_s6 + $0x1d8] sm:$0xff]  }
 0x11c   :  { %2890 = vmatpush3.bf16.msra.mxu1 %v3090_v52  ;;  %2845 = vmatprep.mubr.bf16.mxu1 %v820_v0  ;;  %v1022_v52 = vpack.c.bf16 %v3605_v30, %v3585_v34  ;;  %v3726_v0 = vld [vmem:[#allocation2 + $0x141] sm:$0xff]  ;;  %v3739_v34 = vpack.c.bf16 %v3722_v35, %v3732_v44  ;;  %v3095_v30 = vld [vmem:[%s4189_s6 + $0x158] sm:$0xff]  }
 0x11d   :  { %2891 = vmatprep.subr.bf16.mxu1 %v3092_v36 }
 0x11e   :  { %2920 = vmatpush3.bf16.msra.mxu0 %v3089_v7  ;;  %v3730_v7 = vpack.c.bf16 %v3726_v0, %v3715_v13  ;;  %v3114_v13 = vld [vmem:[%s4189_s6 + $0x188] sm:$0xff]  }
 0x11f   :  { %2921 = vmatprep.subr.bf16.mxu0 %v3091_v19 }
 0x120   :  { %2892 = vmatpush3.bf16.msra.mxu1 %v3092_v36  ;;  %v3098_v36 = vld [vmem:[%s4189_s6 + $0x108] sm:$0xff]  }
 0x121   :  { %2874 = vmatmul.mubr.bf16.gmra.mxu0 %v1021_v6  ;;  %2893 = vmatprep.subr.bf16.mxu1 %v3094_v39  ;;  %v1023_v6 = vpack.c.bf16 %v3627_v28, %v3607_v22  ;;  %v3100_v22 = vld [vmem:[%s4189_s6 + $0x100] sm:$0xff]   ;;  %v1220_v28 = vpack.c.bf16 %v3467_v11, %v3455_v32 }
 0x122   :  { %2877 = vmatprep.mubr.bf16.mxu0 %v1022_v52  ;;  %2922 = vmatpush3.bf16.msra.mxu0 %v3091_v19  ;;  %v3749_v19 = vld [vmem:[#allocation2 + $0x189] sm:$0xff]  ;;  %v3101_v11 = vld [vmem:[%s4189_s6 + $0x140] sm:$0xff]  }
 0x123   :  { %2923 = vmatprep.subr.bf16.mxu0 %v3093_v51  ;;  %2846 = vmatmul.mubr.bf16.gmra.mxu1 %v3730_v7  ;;  %v3097_v52 = vld [vmem:[%s4189_s6 + $0x150] sm:$0xff]   ;;  %v1428_v3 = vpack.c.bf16 %v3749_v19, %v3722_v35  ;;  %v1811_v35 = vld [vmem:[#allocation2 + $0x38] sm:$0xff] }
 0x124   :  { %2894 = vmatpush3.bf16.msra.mxu1 %v3094_v39  ;;  %2849 = vmatprep.mubr.bf16.mxu1 %v3739_v34  ;;  %v1024_v39 = vpack.c.bf16 %v3644_v46, %v3629_v26  ;;  %v3773_v26 = vld [vmem:[#allocation2 + $0x1b7] sm:$0xff] }
 0x125   :  { %2895 = vmatprep.subr.bf16.mxu1 %v3096_v59  ;;  %v3102_v46 = vld [vmem:[%s4189_s6 + $0x1b8] sm:$0xff]   ;;  %v1025_v32 = vpack.c.bf16 %v3773_v26, %v3646_v48  ;;  %v1222_v48 = vpack.c.bf16 %v3496_v2, %v3481_v62  ;;  %v1423_v62 = vpack.c.bf16 %v3668_v20, %v3661_v15  ;;  %v1224_v15 = vpack.c.bf16 %v3551_v31, %v3523_v54  ;;  %v3107_v20 = vld [vmem:[%s4189_s6 + $0x1e8] sm:$0xff]  }
 0x126   :  { %2924 = vmatpush3.bf16.msra.mxu0 %v3093_v51  ;;  %v3762_v51 = vpack.c.bf16 %v3758_v21, %v3749_v19  ;;  %v3110_v2 = vld [vmem:[%s4189_s6 + $0x198] sm:$0xff]   ;;  %v1425_v54 = vpack.c.bf16 %v3815_v53, %v3696_v12  ;;  %v1226_v12 = vpack.c.bf16 %v3601_v58, %v3580_v33  ;;  %v1427_v58 = vpack.c.bf16 %v3732_v44, %v3726_v0  ;;  %v3115_v44 = vld [vmem:[%s4189_s6 + $0x1c8] sm:$0xff]  }
 0x127   :  { %2925 = vmatprep.subr.bf16.mxu0 %v3095_v30  ;;  %v4229_v0 = vpack.c.bf16 %v3588_v60, %v3563_v50  ;;  %v3118_v19 = vld [vmem:[%s4189_s6 + $0x238] sm:$0xff]  }
 0x128   :  { %2896 = vmatpush3.bf16.msra.mxu1 %v3096_v59  ;;  %v3099_v59 = vld [vmem:[%s4189_s6 + $0x148] sm:$0xff]  }
 0x129   :  { %2878 = vmatmul.mubr.bf16.gmra.mxu0 %v1023_v6  ;;  %2897 = vmatprep.subr.bf16.mxu1 %v3098_v36  ;;  %v3112_v6 = vld [vmem:[%s4189_s6 + $0x190] sm:$0xff]  }
 0x12a   :  { %2881 = vmatprep.mubr.bf16.mxu0 %v1024_v39  ;;  %2926 = vmatpush3.bf16.msra.mxu0 %v3095_v30  ;;  %v1422_v30 = vpack.c.bf16 %v3648_v56, %v3621_v25  ;;  %v3103_v56 = vld [vmem:[%s4189_s6 + $0x1f8] sm:$0xff]   ;;  %v3106_v25 = vld [vmem:[%s4189_s6 + $0x1a8] sm:$0xff]   ;;  %v1812_v39 = vld [vmem:[#allocation2 + $0x50] sm:$0xff] }
 0x12b   :  { %2927 = vmatprep.subr.bf16.mxu0 %v3097_v52  ;;  %2850 = vmatmul.mubr.bf16.gmra.mxu1 %v3762_v51 }
 0x12c   :  { %2898 = vmatpush3.bf16.msra.mxu1 %v3098_v36  ;;  %2901 = vmatprep.mubr.bf16.mxu1 %v1220_v28  ;;  %v3104_v36 = vld [vmem:[%s4189_s6 + $0x1b0] sm:$0xff]   ;;  %v1827_v28 = vpack.c.bf16 %v1812_v39, %v1811_v35 }
 0x12d   :  { %2899 = vmatprep.subr.bf16.mxu1 %v3100_v22 }
 0x12e   :  { %2928 = vmatpush3.bf16.msra.mxu0 %v3097_v52  ;;  %v3857_v52 = vld [vmem:[#allocation2 + $0x1b9] sm:$0xff] }
 0x12f   :  { %2929 = vmatprep.subr.bf16.mxu0 %v3099_v59  ;;  %v1429_v50 = vpack.c.bf16 %v3857_v52, %v3758_v21  ;;  %v1814_v21 = vld [vmem:[#allocation2 + $0x80] sm:$0xff] }
 0x130   :  { %2900 = vmatpush3.bf16.msra.mxu1 %v3100_v22  ;;  %v3117_v22 = vld [vmem:[%s4189_s6 + $0x1c0] sm:$0xff]  }
 0x131   :  { %2882 = vmatmul.mubr.bf16.gmra.mxu0 %v1025_v32  ;;  %2949 = vmatprep.subr.bf16.mxu1 %v3102_v46  ;;  %v1813_v32 = vld [vmem:[#allocation2 + $0x68] sm:$0xff] }
 0x132   :  { %2930 = vmatpush3.bf16.msra.mxu0 %v3099_v59  ;;  %2933 = vmatprep.mubr.bf16.mxu0 %v1422_v30  ;;  %v1815_v59 = vld [vmem:[#allocation2 + $0x98] sm:$0xff]  ;;  %v1828_v30 = vpack.c.bf16 %v1814_v21, %v1813_v32 }
 0x133   :  { %2931 = vmatprep.subr.bf16.mxu0 %v3101_v11  ;;  %2902 = vmatmul.mubr.bf16.vlgmr.msra.gmra.mxu1 %v1221_v42  ;;  %v3108_v42 = vld [vmem:[%s4189_s6 + $0x1a0] sm:$0xff]  }
 0x134   :  { %2950 = vmatpush3.bf16.msra.mxu1 %v3102_v46  ;;  %2905 = vmatprep.mubr.bf16.mxu1 %v1222_v48  ;;  %v3120_v46 = vld [vmem:[%s4189_s6 + $0x228] sm:$0xff]  }
 0x135   :  { %2951 = vmatprep.subr.bf16.mxu1 %v3104_v36 }
 0x136   :  { %2932 = vmatpush3.bf16.msra.mxu0 %v3101_v11  ;;  %v1616_v11 = vld [vmem:[#allocation2 + $0xdf] sm:$0xff] }
 0x137   :  { %2981 = vmatprep.subr.bf16.mxu0 %v3103_v56 }
 0x138   :  { %2952 = vmatpush3.bf16.msra.mxu1 %v3104_v36  ;;  %v1816_v36 = vld [vmem:[#allocation2 + $0xb0] sm:$0xff] }
 0x139   :  { %2934 = vmatmul.mubr.bf16.vlgmr.msra.gmra.mxu0 %v1423_v62  ;;  %2953 = vmatprep.subr.bf16.mxu1 %v3106_v25  ;;  %v1829_v48 = vpack.c.bf16 %v1816_v36, %v1815_v59  ;;  %v3122_v62 = vld [vmem:[%s4189_s6 + $0x218] sm:$0xff]  }
 0x13a   :  { %2937 = vmatprep.mubr.bf16.mxu0 %v1424_v5  ;;  %2982 = vmatpush3.bf16.msra.mxu0 %v3103_v56  ;;  %v1817_v56 = vld [vmem:[#allocation2 + $0xc8] sm:$0xff] }
 0x13b   :  { %2983 = vmatprep.subr.bf16.mxu0 %v3105_v27  ;;  %2906 = vmatmul.mubr.bf16.gmra.mxu1 %v3504_v37  ;;  %v3109_v37 = vld [vmem:[%s4189_s6 + $0x1e0] sm:$0xff]  }
 0x13c   :  { %2954 = vmatpush3.bf16.msra.mxu1 %v3106_v25  ;;  %2909 = vmatprep.mubr.bf16.mxu1 %v1224_v15  ;;  %v1820_v25 = vld [vmem:[#allocation2 + $0x140] sm:$0xff]  ;;  %v3124_v15 = vld [vmem:[%s4189_s6 + $0x208] sm:$0xff]  }
 0x13d   :  { %2955 = vmatprep.subr.bf16.mxu1 %v3108_v42 }
 0x13e   :  { %2984 = vmatpush3.bf16.msra.mxu0 %v3105_v27  ;;  %v4230_v27 = vmov 0.0  }
 0x13f   :  { %2985 = vmatprep.subr.bf16.mxu0 %v3107_v20  ;;  %v1830_v5 = vpack.c.bf16 %v4230_v27, %v1817_v56 }
 0x140   :  { %2956 = vmatpush3.bf16.msra.mxu1 %v3108_v42  ;;  %v3123_v42 = vld [vmem:[%s4189_s6 + $0x210] sm:$0xff]  }
 0x141   :  { %2938 = vmatmul.mubr.bf16.gmra.mxu0 %v1425_v54  ;;  %2957 = vmatprep.subr.bf16.mxu1 %v3110_v2 }
 0x142   :  { %2941 = vmatprep.mubr.bf16.mxu0 %v1426_v57  ;;  %2986 = vmatpush3.bf16.msra.mxu0 %v3107_v20 }
 0x143   :  { %2987 = vmatprep.subr.bf16.mxu0 %v3109_v37  ;;  %2910 = vmatmul.mubr.bf16.gmra.mxu1 %v1225_v49  ;;  %v3116_v49 = vld [vmem:[%s4189_s6 + $0x180] sm:$0xff]  }
 0x144   :  { %2958 = vmatpush3.bf16.msra.mxu1 %v3110_v2  ;;  %2913 = vmatprep.mubr.bf16.mxu1 %v1226_v12 }
 0x145   :  { %2959 = vmatprep.subr.bf16.mxu1 %v3112_v6 }
 0x146   :  { %2988 = vmatpush3.bf16.msra.mxu0 %v3109_v37 }
 0x147   :  { %2989 = vmatprep.subr.bf16.mxu0 %v3111_v17 }
 0x148   :  { %2960 = vmatpush3.bf16.msra.mxu1 %v3112_v6 }
 0x149   :  { %2942 = vmatmul.mubr.bf16.gmra.mxu0 %v1427_v58  ;;  %2961 = vmatprep.subr.bf16.mxu1 %v3114_v13 }
 0x14a   :  { %2945 = vmatprep.mubr.bf16.mxu0 %v1428_v3  ;;  %2990 = vmatpush3.bf16.msra.mxu0 %v3111_v17 }
 0x14b   :  { %2991 = vmatprep.subr.bf16.mxu0 %v3113_v38  ;;  %2914 = vmatmul.mubr.bf16.gmra.mxu1 %v4229_v0 }
 0x14c   :  { %2962 = vmatpush3.bf16.msra.mxu1 %v3114_v13  ;;  %2965 = vmatprep.mubr.bf16.mxu1 %v3513_v45  ;;  %v3119_v45 = vld [vmem:[%s4189_s6 + $0x230] sm:$0xff]  }
 0x14d   :  { %2963 = vmatprep.subr.bf16.mxu1 %v3116_v49 }
 0x14e   :  { %2992 = vmatpush3.bf16.msra.mxu0 %v3113_v38 }
 0x14f   :  { %2993 = vmatprep.subr.bf16.mxu0 %v3115_v44 }
 0x150   :  { %2964 = vmatpush3.bf16.msra.mxu1 %v3116_v49 }
 0x151   :  { %2946 = vmatmul.mubr.bf16.gmra.mxu0 %v1429_v50  ;;  %3013 = vmatprep.subr.bf16.mxu1 %v3118_v19 }
 0x152   :  { %2994 = vmatpush3.bf16.msra.mxu0 %v3115_v44  ;;  %2997 = vmatprep.mubr.bf16.mxu0 %v1827_v28 }
 0x153   :  { %2995 = vmatprep.subr.bf16.mxu0 %v3117_v22  ;;  %2966 = vmatmul.mubr.bf16.vlgmr.msra.gmra.mxu1 %v3540_v24  ;;  %v1628_v24 = vpack.c.bf16 %v1616_v11, %v3710_v47  ;;  %v1831_v47 = vpack.c.bf16 %v1820_v25, %v3551_v31  ;;  %v1624_v31 = vld [vmem:[#allocation2 + $0x1cf] sm:$0xff] }
 0x154   :  { %3014 = vmatpush3.bf16.msra.mxu1 %v3118_v19  ;;  %2969 = vmatprep.mubr.bf16.mxu1 %v3569_v63  ;;  %v3121_v63 = vld [vmem:[%s4189_s6 + $0x220] sm:$0xff]   ;;  %v1632_v2 = vpack.c.bf16 %v1624_v31, %v3773_v26 }
 0x155   :  { %3015 = vmatprep.subr.bf16.mxu1 %v3119_v45 }
 0x156   :  { %2996 = vmatpush3.bf16.msra.mxu0 %v3117_v22 }
 0x158   :  { %3016 = vmatpush3.bf16.msra.mxu1 %v3119_v45 }
 0x159   :  { %2998 = vmatmul.mubr.bf16.vlgmr.msra.gmra.mxu0 %v1828_v30  ;;  %3017 = vmatprep.subr.bf16.mxu1 %v3120_v46 }
 0x15a   :  { %3001 = vmatprep.mubr.bf16.mxu0 %v1829_v48 }
 0x15b   :  { %2970 = vmatmul.mubr.bf16.gmra.mxu1 %v1628_v24 }
 0x15c   :  { %3018 = vmatpush3.bf16.msra.mxu1 %v3120_v46  ;;  %2973 = vmatprep.mubr.bf16.mxu1 %v3612_v23  ;;  %v1821_v23 = vld [vmem:[#allocation2 + $0x158] sm:$0xff] }
 0x15d   :  { %3019 = vmatprep.subr.bf16.mxu1 %v3121_v63  ;;  %v1832_v20 = vpack.c.bf16 %v3580_v33, %v1821_v23  ;;  %v2020_v33 = vld [vmem:[#allocation2 + $0xe1] sm:$0xff] }
 0x15e   :  { %v2032_v26 = vpack.c.bf16 %v2020_v33, %v3815_v53 }
 0x160   :  { %3020 = vmatpush3.bf16.msra.mxu1 %v3121_v63 }
 0x161   :  { %3002 = vmatmul.mubr.bf16.gmra.mxu0 %v1830_v5  ;;  %3021 = vmatprep.subr.bf16.mxu1 %v3122_v62 }
 0x162   :  { %3005 = vmatprep.mubr.bf16.mxu0 %v1831_v47 }
 0x163   :  { %2974 = vmatmul.mubr.bf16.gmra.mxu1 %v3635_v61  ;;  %v3125_v61 = vld [vmem:[%s4189_s6 + $0x200] sm:$0xff]  }
 0x164   :  { %3022 = vmatpush3.bf16.msra.mxu1 %v3122_v62  ;;  %2977 = vmatprep.mubr.bf16.mxu1 %v3652_v55  ;;  %v1834_v55 = vpack.c.bf16 %v4230_v27, %v3588_v60 }
 0x165   :  { %3023 = vmatprep.subr.bf16.mxu1 %v3123_v42 }
 0x168   :  { %3024 = vmatpush3.bf16.msra.mxu1 %v3123_v42 }
 0x169   :  { %3006 = vmatmul.mubr.bf16.gmra.mxu0 %v1832_v20  ;;  %3025 = vmatprep.subr.bf16.mxu1 %v3124_v15 }
 0x16a   :  { %3009 = vmatprep.mubr.bf16.mxu0 %v3619_v1 }
 0x16b   :  { %2978 = vmatmul.mubr.bf16.gmra.mxu1 %v1632_v2 }
 0x16c   :  { %3026 = vmatpush3.bf16.msra.mxu1 %v3124_v15  ;;  %3029 = vmatprep.mubr.bf16.mxu1 %v3666_v14  ;;  %v2028_v14 = vld [vmem:[#allocation2 + $0x1d1] sm:$0xff] }
 0x16d   :  { %3027 = vmatprep.subr.bf16.mxu1 %v3125_v61  ;;  %v2036_v1 = vpack.c.bf16 %v2028_v14, %v3857_v52 }
 0x170   :  { %3028 = vmatpush3.bf16.msra.mxu1 %v3125_v61 }
 0x171   :  { %3010 = vmatmul.mubr.bf16.gmra.mxu0 %v1834_v55 }
 0x173   :  { %3030 = vmatmul.mubr.bf16.vlgmr.msra.gmra.mxu1 %v3675_v18 }
 0x174   :  { %3033 = vmatprep.mubr.bf16.mxu1 %v3700_v16 }
 0x17b   :  { %3034 = vmatmul.mubr.bf16.gmra.mxu1 %v2032_v26 }
 0x17c   :  { %3037 = vmatprep.mubr.bf16.mxu1 %v3730_v7 }
 0x183   :  { %3038 = vmatmul.mubr.bf16.gmra.mxu1 %v3739_v34 }
 0x184   :  { %3041 = vmatprep.mubr.bf16.mxu1 %v3762_v51 }
 0x18b   :  { %3042 = vmatmul.mubr.bf16.gmra.mxu1 %v2036_v1 }
 0x1b1   :  { %v2775_v60 = vpop.f32.mrf.mxu1 }
 0x1b3   :  { %v592_v54 = vpop.f32.mrf.mxu1 }
 0x1b5   :  { %v2776_v37 = vpop.f32.mrf.mxu1 }
 0x1b7   :  { %v595_v18 = vpop.f32.mrf.mxu1 }
 0x1b9   :  { %v2807_v57 = vpop.f32.mrf.mxu0 }
 0x1ba   :  { %v746_v16 = vadd.f32 %v2807_v57, %v2775_v60  ;;  %v2779_v6 = vpop.f32.mrf.mxu1 }
 0x1bb   :  { %v737_v12 = vpop.f32.mrf.mxu0 }
 0x1bc   :  { %v738_v53 = vadd.f32 %v737_v12, %v592_v54  ;;  %v608_v17 = vpop.f32.mrf.mxu1 }
 0x1bd   :  { %v2808_v13 = vpop.f32.mrf.mxu0 }
 0x1be   :  { %v749_v7 = vadd.f32 %v2808_v13, %v2776_v37  ;;  %v2780_v58 = vpop.f32.mrf.mxu1 }
 0x1bf   :  { %v740_v34 = vpop.f32.mrf.mxu0 }
 0x1c0   :  { %v741_v38 = vadd.f32 %v740_v34, %v595_v18  ;;  %v611_v51 = vpop.f32.mrf.mxu1 }
 0x1c1   :  { %v2811_v3 = vpop.f32.mrf.mxu0 }
 0x1c2   :  { %v762_v49 = vadd.f32 %v2811_v3, %v2779_v6  ;;  %v2783_v0 = vpop.f32.mrf.mxu1 }
 0x1c3   :  { %v753_v44 = vpop.f32.mrf.mxu0 }
 0x1c4   :  { %v754_v52 = vadd.f32 %v753_v44, %v608_v17  ;;  %v624_v35 = vpop.f32.mrf.mxu1 }
 0x1c5   :  { %v2812_v19 = vpop.f32.mrf.mxu0 }
 0x1c6   :  { %v765_v50 = vadd.f32 %v2812_v19, %v2780_v58  ;;  %v2784_v39 = vpop.f32.mrf.mxu1 }
 0x1c7   :  { %v756_v22 = vpop.f32.mrf.mxu0 }
 0x1c8   :  { %v757_v28 = vadd.f32 %v756_v22, %v611_v51  ;;  %v627_v45 = vpop.f32.mrf.mxu1 }
 0x1c9   :  { %v2815_v21 = vpop.f32.mrf.mxu0 }
 0x1ca   :  { %v778_v59 = vadd.f32 %v2815_v21, %v2783_v0  ;;  %v2787_v46 = vpop.f32.mrf.mxu1 }
 0x1cb   :  { %v769_v32 = vpop.f32.mrf.mxu0 }
 0x1cc   :  { %v770_v11 = vadd.f32 %v769_v32, %v624_v35  ;;  %v640_v30 = vpop.f32.mrf.mxu1 }
 0x1cd   :  { %v2816_v36 = vpop.f32.mrf.mxu0 }
 0x1ce   :  { %v781_v48 = vadd.f32 %v2816_v36, %v2784_v39  ;;  %v2788_v24 = vpop.f32.mrf.mxu1 }
 0x1cf   :  { %v772_v63 = vpop.f32.mrf.mxu0 }
 0x1d0   :  { %v773_v56 = vadd.f32 %v772_v63, %v627_v45  ;;  %v643_v25 = vpop.f32.mrf.mxu1 }
 0x1d1   :  { %v2819_v62 = vpop.f32.mrf.mxu0 }
 0x1d2   :  { %v794_v27 = vadd.f32 %v2819_v62, %v2787_v46 }
 0x1d3   :  { %v785_v5 = vpop.f32.mrf.mxu0  ;;  %v2839_v47 = vpop.f32.mrf.mxu1 }
 0x1d4   :  { %v786_v42 = vadd.f32 %v785_v5, %v640_v30  ;;  %v3910_v23 = vadd.f32 %v2839_v47, %v746_v16 }
 0x1d5   :  { %v2820_v15 = vpop.f32.mrf.mxu0  ;;  %v923_v31 = vpop.f32.mrf.mxu1 }
 0x1d6   :  { %v797_v20 = vadd.f32 %v2820_v15, %v2788_v24  ;;  %v3912_v2 = vadd.f32 %v923_v31, %v738_v53 }
 0x1d7   :  { %v788_v61 = vpop.f32.mrf.mxu0  ;;  %v2840_v55 = vpop.f32.mrf.mxu1 }
 0x1d8   :  { %v789_v33 = vadd.f32 %v788_v61, %v643_v25  ;;  %v3914_v26 = vadd.f32 %v2840_v55, %v749_v7 }
 0x1d9   :  { %v3916_v14 = vpop.f32.mrf.mxu0  ;;  %v926_v1 = vpop.f32.mrf.mxu1 }
 0x1da   :  { %v3918_v60 = vadd.f32 %v926_v1, %v741_v38 }
 0x1db   :  { %v3920_v54 = vpop.f32.mrf.mxu0  ;;  %v2843_v37 = vpop.f32.mrf.mxu1 }
 0x1dc   :  { %v3922_v18 = vadd.f32 %v2843_v37, %v762_v49 }
 0x1dd   :  { %v3924_v57 = vpop.f32.mrf.mxu0  ;;  %v939_v16 = vpop.f32.mrf.mxu1 }
 0x1de   :  { %v3926_v6 = vadd.f32 %v939_v16, %v754_v52 }
 0x1df   :  { %v3928_v12 = vpop.f32.mrf.mxu0  ;;  %v2844_v53 = vpop.f32.mrf.mxu1 }
 0x1e0   :  { %v3930_v17 = vadd.f32 %v2844_v53, %v765_v50 }
 0x1e1   :  { %v3932_v13 = vpop.f32.mrf.mxu0  ;;  %v942_v7 = vpop.f32.mrf.mxu1 }
 0x1e2   :  { %v3934_v58 = vadd.f32 %v942_v7, %v757_v28 }
 0x1e3   :  { %v3936_v34 = vpop.f32.mrf.mxu0  ;;  %v2847_v38 = vpop.f32.mrf.mxu1 }
 0x1e4   :  { %v3938_v51 = vadd.f32 %v2847_v38, %v778_v59 }
 0x1e5   :  { %v3940_v3 = vpop.f32.mrf.mxu0  ;;  %v955_v49 = vpop.f32.mrf.mxu1 }
 0x1e6   :  { %v3942_v0 = vadd.f32 %v955_v49, %v770_v11 }
 0x1e7   :  { %v3944_v44 = vpop.f32.mrf.mxu0  ;;  %v2848_v52 = vpop.f32.mrf.mxu1 }
 0x1e8   :  { %v3946_v35 = vadd.f32 %v2848_v52, %v781_v48 }
 0x1e9   :  { %v3948_v19 = vpop.f32.mrf.mxu0  ;;  %v958_v50 = vpop.f32.mrf.mxu1 }
 0x1ea   :  { %v3950_v39 = vadd.f32 %v958_v50, %v773_v56 }
 0x1eb   :  { %v3952_v22 = vpop.f32.mrf.mxu0  ;;  %v2851_v28 = vpop.f32.mrf.mxu1 }
 0x1ec   :  { %4231 = vst [vmem:[#allocation9_spill] sm:$0xff] %v3950_v39  ;;  %v3954_v45 = vadd.f32 %v2851_v28, %v794_v27 }
 0x1ed   :  { %v3956_v21 = vpop.f32.mrf.mxu0  ;;  %v971_v59 = vpop.f32.mrf.mxu1 }
 0x1ee   :  { %4232 = vst [vmem:[#allocation10_spill] sm:$0xff] %v3954_v45  ;;  %v3958_v46 = vadd.f32 %v971_v59, %v786_v42 }
 0x1ef   :  { %v3960_v32 = vpop.f32.mrf.mxu0  ;;  %v2852_v11 = vpop.f32.mrf.mxu1 }
 0x1f0   :  { %4233 = vst [vmem:[#allocation11_spill] sm:$0xff] %v3958_v46  ;;  %4234 = vst [vmem:[#allocation12_spill] sm:$0xff] %v3960_v32  ;;  %v3962_v30 = vadd.f32 %v2852_v11, %v797_v20 }
 0x1f1   :  { %v3964_v36 = vpop.f32.mrf.mxu0  ;;  %v974_v48 = vpop.f32.mrf.mxu1 }
 0x1f2   :  { %4235 = vst [vmem:[#allocation13_spill] sm:$0xff] %v3962_v30  ;;  %4236 = vst [vmem:[#allocation14_spill] sm:$0xff] %v3964_v36  ;;  %v3966_v24 = vadd.f32 %v974_v48, %v789_v33 }
 0x1f3   :  { %v3968_v63 = vpop.f32.mrf.mxu0  ;;  %v2903_v56 = vpop.f32.mrf.mxu1 }
 0x1f4   :  { %4237 = vst [vmem:[#allocation15_spill] sm:$0xff] %v3966_v24  ;;  %4238 = vst [vmem:[#allocation16_spill] sm:$0xff] %v3968_v63 }
 0x1f5   :  { %v3970_v25 = vpop.f32.mrf.mxu0  ;;  %v1327_v62 = vpop.f32.mrf.mxu1 }
 0x1f6   :  { %4239 = vst [vmem:[#allocation17_spill] sm:$0xff] %v3970_v25 }
 0x1f7   :  { %v3972_v27 = vpop.f32.mrf.mxu0  ;;  %v2904_v5 = vpop.f32.mrf.mxu1 }
 0x1f8   :  { %4240 = vst [vmem:[#allocation18_spill] sm:$0xff] %v3972_v27 }
 0x1f9   :  { %v2935_v47 = vpop.f32.mrf.mxu0  ;;  %v3974_v42 = vpop.f32.mrf.mxu1 }
 0x1fb   :  { %v1529_v15 = vpop.f32.mrf.mxu0  ;;  %v3976_v31 = vpop.f32.mrf.mxu1 }
 0x1fd   :  { %v2936_v20 = vpop.f32.mrf.mxu0  ;;  %v3978_v61 = vpop.f32.mrf.mxu1 }
 0x1ff   :  { %v1532_v55 = vpop.f32.mrf.mxu0  ;;  %v3980_v33 = vpop.f32.mrf.mxu1 }
 0x201   :  { %v3982_v1 = vpop.f32.mrf.mxu0  ;;  %v3984_v37 = vpop.f32.mrf.mxu1 }
 0x203   :  { %v3986_v16 = vpop.f32.mrf.mxu0  ;;  %v3988_v53 = vpop.f32.mrf.mxu1 }
 0x205   :  { %v3990_v7 = vpop.f32.mrf.mxu0  ;;  %v3992_v38 = vpop.f32.mrf.mxu1 }
 0x206   :  { %4241 = vst [vmem:[#allocation19_spill] sm:$0xff] %v3992_v38  ;;  %v1190_v38 = vadd.f32 %v3916_v14, %v3910_v23 }
 0x207   :  { %v3994_v49 = vpop.f32.mrf.mxu0  ;;  %v3996_v52 = vpop.f32.mrf.mxu1 }
 0x208   :  { %4242 = vst [vmem:[#allocation20_spill] sm:$0xff] %v3996_v52 }
 0x209   :  { %v3998_v50 = vpop.f32.mrf.mxu0  ;;  %v4000_v28 = vpop.f32.mrf.mxu1 }
 0x20a   :  { %4243 = vst [vmem:[#allocation21_spill] sm:$0xff] %v3998_v50  ;;  %4244 = vst [vmem:[#allocation22_spill] sm:$0xff] %v4000_v28 }
 0x20b   :  { %v4002_v59 = vpop.f32.mrf.mxu0  ;;  %v4004_v11 = vpop.f32.mrf.mxu1 }
 0x20c   :  { %4245 = vst [vmem:[#allocation23_spill] sm:$0xff] %v4002_v59  ;;  %4246 = vst [vmem:[#allocation24_spill] sm:$0xff] %v4004_v11 }
 0x20d   :  { %v4006_v48 = vpop.f32.mrf.mxu0  ;;  %v4008_v41 = vpop.f32.mrf.mxu1 }
 0x20e   :  { %4247 = vst [vmem:[#allocation25_spill] sm:$0xff] %v4006_v48  ;;  %4248 = vst [vmem:[#allocation26_spill] sm:$0xff] %v4008_v41 }
 0x20f   :  { %v4010_v43 = vpop.f32.mrf.mxu0  ;;  %v4012_v29 = vpop.f32.mrf.mxu1 }
 0x210   :  { %4249 = vst [vmem:[#allocation27_spill] sm:$0xff] %v4010_v43  ;;  %4250 = vst [vmem:[#allocation28_spill] sm:$0xff] %v4012_v29 }
 0x211   :  { %v4014_v40 = vpop.f32.mrf.mxu0  ;;  %v4016_v27 = vpop.f32.mrf.mxu1 }
 0x212   :  { %4251 = vst [vmem:[#allocation29_spill] sm:$0xff] %v4014_v40  ;;  %4252 = vst [vmem:[#allocation30_spill] sm:$0xff] %v4016_v27 }
 0x213   :  { %v4018_v24 = vpop.f32.mrf.mxu0  ;;  %v2967_v25 = vpop.f32.mrf.mxu1 }
 0x214   :  { %4253 = vst [vmem:[#allocation31_spill] sm:$0xff] %v4018_v24 }
 0x215   :  { %v4020_v30 = vpop.f32.mrf.mxu0  ;;  %v1732_v63 = vpop.f32.mrf.mxu1 }
 0x216   :  { %4254 = vst [vmem:[#allocation32_spill] sm:$0xff] %v4020_v30 }
 0x217   :  { %v4022_v46 = vpop.f32.mrf.mxu0  ;;  %v2968_v11 = vpop.f32.mrf.mxu1 }
 0x218   :  { %4255 = vst [vmem:[#allocation33_spill] sm:$0xff] %v4022_v46 }
 0x219   :  { %v2999_v9 = vpop.f32.mrf.mxu0  ;;  %v1735_v36 = vpop.f32.mrf.mxu1 }
 0x21b   :  { %v1934_v41 = vpop.f32.mrf.mxu0  ;;  %v2971_v45 = vpop.f32.mrf.mxu1 }
 0x21d   :  { %v3000_v43 = vpop.f32.mrf.mxu0  ;;  %v4024_v10 = vpop.f32.mrf.mxu1 }
 0x21f   :  { %v1937_v29 = vpop.f32.mrf.mxu0  ;;  %v2972_v40 = vpop.f32.mrf.mxu1 }
 0x221   :  { %v4026_v28 = vpop.f32.mrf.mxu0  ;;  %v4028_v27 = vpop.f32.mrf.mxu1 }
 0x222   :  { %4256 = vst [vmem:[#allocation34_spill] sm:$0xff] %v4028_v27 }
 0x223   :  { %v4030_v24 = vpop.f32.mrf.mxu1  ;;  %v4032_v30 = vpop.f32.mrf.mxu0 }
 0x224   :  { %4257 = vst [vmem:[#allocation35_spill] sm:$0xff] %v4030_v24  ;;  %4258 = vst [vmem:[#allocation36_spill] sm:$0xff] %v4032_v30  ;;  %v1188_v24 = vadd.f32 %v3920_v54, %v3912_v2 }
 0x225   :  { %v4034_v48 = vpop.f32.mrf.mxu1  ;;  %v4038_v59 = vpop.f32.mrf.mxu0 }
 0x226   :  { %4259 = vst [vmem:[#allocation37_spill] sm:$0xff] %v4034_v48  ;;  %4261 = vst [vmem:[#allocation39_spill] sm:$0xff] %v4038_v59  ;;  %v1191_v48 = vadd.f32 %v3924_v57, %v3914_v26  ;;  %v1390_v59 = vadd.f32 %v1327_v62, %v1188_v24  ;;  %v1194_v26 = vadd.f32 %v3932_v13, %v3922_v18 }
 0x227   :  { %v4036_v46 = vpop.f32.mrf.mxu1  ;;  %v4046_v32 = vpop.f32.mrf.mxu0 }
 0x228   :  { %4260 = vst [vmem:[#allocation38_spill] sm:$0xff] %v4036_v46  ;;  %4264 = vst [vmem:[#allocation42_spill] sm:$0xff] %v4046_v32  ;;  %v1392_v46 = vadd.f32 %v2903_v56, %v1190_v38  ;;  %v1393_v27 = vadd.f32 %v2904_v5, %v1191_v48  ;;  %v1396_v24 = vadd.f32 %v3976_v31, %v1194_v26 }
 0x229   :  { %v4040_v50 = vpop.f32.mrf.mxu1  ;;  %v4058_v23 = vpop.f32.mrf.mxu0 }
 0x22a   :  { %4262 = vst [vmem:[#allocation40_spill] sm:$0xff] %v4040_v50  ;;  %v1189_v50 = vadd.f32 %v3928_v12, %v3918_v60  ;;  %v1595_v32 = vadd.f32 %v2936_v20, %v1393_v27  ;;  %v1192_v12 = vadd.f32 %v3936_v34, %v3926_v6  ;;  %v1598_v34 = vadd.f32 %v3982_v1, %v1396_v24 }
 0x22b   :  { %v4042_v52 = vpop.f32.mrf.mxu1  ;;  %v4070_v62 = vpop.f32.mrf.mxu0 }
 0x22c   :  { %4263 = vst [vmem:[#allocation41_spill] sm:$0xff] %v4042_v52  ;;  %v1594_v52 = vadd.f32 %v2935_v47, %v1392_v46  ;;  %v1391_v2 = vadd.f32 %v3974_v42, %v1189_v50  ;;  %v1798_v60 = vadd.f32 %v2968_v11, %v1595_v32  ;;  %v1195_v46 = vadd.f32 %v3940_v3, %v3930_v17 }
 0x22d   :  { %v4048_v39 = vpop.f32.mrf.mxu1  ;;  %v1394_v13 = vadd.f32 %v3978_v61, %v1192_v12  ;;  %v1801_v42 = vadd.f32 %v2971_v45, %v1598_v34  ;;  %v4269_v45 = vunpack.c.l.bf16 %v3182_v4  ;;  %v1196_v50 = vadd.f32 %v3952_v22, %v3942_v0  ;;  %v4273_v48 = vld [vmem:[#allocation39_spill] sm:$0xff]  ;;  %v4274_v0 = vld [vmem:[#allocation9_spill] sm:$0xff]  ;;  %v4275_v22 = vld [vmem:[#allocation12_spill] sm:$0xff] }
 0x22e   :  { %4265 = vst [vmem:[#allocation43_spill] sm:$0xff] %v4048_v39  ;;  %v1592_v39 = vadd.f32 %v1529_v15, %v1390_v59  ;;  %v1797_v54 = vadd.f32 %v2967_v25, %v1594_v52  ;;  %v1593_v56 = vadd.f32 %v1532_v55, %v1391_v2  ;;  %v2000_v5 = vadd.f32 %v3000_v43, %v1798_v60  ;;  %v4283_v34 = vld [vmem:[#allocation35_spill] sm:$0xff] }
 0x22f   :  { %v4054_v30 = vpop.f32.mrf.mxu1  ;;  %v4268_v15 = vunpack.c.h.bf16 %v3194_v8  ;;  %v4270_v52 = vunpack.c.h.bf16 %v3182_v4  ;;  %v1197_v26 = vadd.f32 %v4275_v22, %v4274_v0  ;;  %v4279_v12 = vld [vmem:[#allocation42_spill] sm:$0xff] }
 0x230   :  { %4266 = vst [vmem:[#allocation44_spill] sm:$0xff] %v4054_v30  ;;  %v1999_v38 = vadd.f32 %v2999_v9, %v1797_v54  ;;  %v1795_v30 = vadd.f32 %v1732_v63, %v1592_v39  ;;  %v1796_v47 = vadd.f32 %v1735_v36, %v1593_v56  ;;  %v1193_v9 = vadd.f32 %v3944_v44, %v3934_v58 }
 0x231   :  { %v4060_v14 = vpop.f32.mrf.mxu1  ;;  %v1397_v39 = vadd.f32 %v3980_v33, %v1195_v46  ;;  %v1596_v63 = vadd.f32 %v3986_v16, %v1394_v13  ;;  %v4267_v58 = vunpack.c.l.bf16 %v3194_v8 }
 0x232   :  { %v1997_v25 = vadd.f32 %v1934_v41, %v1795_v30  ;;  %v1998_v17 = vadd.f32 %v1937_v29, %v1796_v47  ;;  %v1395_v43 = vadd.f32 %v3984_v37, %v1193_v9  ;;  %v3008_v30 = vpop.f32.mrf.mxu0  ;;  %v1198_v29 = vadd.f32 %v3948_v19, %v3938_v51  ;;  %v4281_v47 = vld [vmem:[#allocation25_spill] sm:$0xff]  ;;  %v4282_v9 = vld [vmem:[#allocation22_spill] sm:$0xff] }
 0x233   :  { %v3031_v57 = vpop.f32.mrf.mxu1  ;;  %v1599_v41 = vadd.f32 %v3990_v7, %v1397_v39  ;;  %v1799_v55 = vadd.f32 %v4024_v10, %v1596_v63  ;;  %v2003_v37 = vadd.f32 %v4026_v28, %v1801_v42  ;;  %v1199_v51 = vadd.f32 %v3956_v21, %v3946_v35  ;;  %v4271_v10 = vld [vmem:[#allocation34_spill] sm:$0xff]  ;;  %v4272_v28 = vld [vmem:[#allocation36_spill] sm:$0xff]  ;;  %v4276_v35 = vld [vmem:[#allocation19_spill] sm:$0xff] }
 0x234   :  { %v2201_v18 = vadd.f32 %v3031_v57, %v1999_v38  ;;  %v1597_v61 = vadd.f32 %v3994_v49, %v1395_v43  ;;  %v1400_v19 = vadd.f32 %v3988_v53, %v1198_v29  ;;  %v1969_v49 = vpop.f32.mrf.mxu0  ;;  %v1398_v21 = vadd.f32 %v4276_v35, %v1196_v50  ;;  %v4277_v53 = vld [vmem:[#allocation20_spill] sm:$0xff]  ;;  %v4278_v38 = vld [vmem:[#allocation21_spill] sm:$0xff]  ;;  %v4287_v42 = vld [vmem:[#allocation10_spill] sm:$0xff] }
 0x235   :  { %v2136_v27 = vpop.f32.mrf.mxu1  ;;  %v1802_v33 = vadd.f32 %v2972_v40, %v1599_v41  ;;  %v2001_v11 = vadd.f32 %v4272_v28, %v1799_v55  ;;  %v1401_v57 = vadd.f32 %v4277_v53, %v1199_v51  ;;  %v1399_v13 = vadd.f32 %v4282_v9, %v1197_v26  ;;  %v4295_v50 = vld [vmem:[#allocation11_spill] sm:$0xff]  ;;  %v4296_v51 = vld [vmem:[#allocation16_spill] sm:$0xff]  ;;  %v4308_v9 = vld [vmem:[#allocation30_spill] sm:$0xff] }
 0x236   :  { %v2199_v3 = vadd.f32 %v2136_v27, %v1997_v25  ;;  %v2217_v44 = vadd.f32 %v4267_v58, %v2201_v18  ;;  %v1800_v40 = vadd.f32 %v4271_v10, %v1597_v61  ;;  %v1602_v60 = vadd.f32 %v4278_v38, %v1400_v19  ;;  %v4280_v25 = vld [vmem:[#allocation23_spill] sm:$0xff]  ;;  %v3011_v39 = vpop.f32.mrf.mxu0  ;;  %v4288_v58 = vld [vmem:[#allocation14_spill] sm:$0xff]  ;;  %v4297_v10 = vld [vmem:[#allocation13_spill] sm:$0xff] }
 0x237   :  { %v3032_v6 = vpop.f32.mrf.mxu1  ;;  %v2004_v2 = vadd.f32 %v4273_v48, %v1802_v33  ;;  %v1603_v18 = vadd.f32 %v4281_v47, %v1401_v57  ;;  %v4291_v61 = vld [vmem:[#allocation38_spill] sm:$0xff]  ;;  %v1200_v19 = vadd.f32 %v4296_v51, %v4295_v50  ;;  %v4299_v28 = vld [vmem:[#allocation24_spill] sm:$0xff]  ;;  %v4301_v35 = vld [vmem:[#allocation15_spill] sm:$0xff] }
 0x238   :  { %v2202_v32 = vadd.f32 %v3032_v6, %v2000_v5  ;;  %v2215_v16 = vadd.f32 %v4269_v45, %v2199_v3  ;;  %v2002_v46 = vadd.f32 %v4279_v12, %v1800_v40  ;;  %v1600_v5 = vadd.f32 %v4280_v25, %v1398_v21  ;;  %v4284_v3 = vld [vmem:[#allocation4_spill] sm:$0xff]  ;;  %v4298_v40 = vld [vmem:[#allocation17_spill] sm:$0xff]  ;;  %v4302_v21 = vld [vmem:[#allocation18_spill] sm:$0xff] }
 0x239   :  { %v2139_v36 = vpop.f32.mrf.mxu1  ;;  %v4286_v41 = vunpack.c.h.bf16 %v4284_v3  ;;  %v1806_v55 = vadd.f32 %v4291_v61, %v1603_v18  ;;  %v4300_v48 = vld [vmem:[#allocation40_spill] sm:$0xff]  ;;  %v1201_v53 = vadd.f32 %v4302_v21, %v4301_v35  ;;  %v4303_v57 = vld [vmem:[#allocation26_spill] sm:$0xff]  ;;  %v4306_v25 = vld [vmem:[#allocation31_spill] sm:$0xff] }
 0x23a   :  { %v2218_v31 = vadd.f32 %v4268_v15, %v2202_v32  ;;  %v2200_v20 = vadd.f32 %v2139_v36, %v1998_v17  ;;  %v1805_v17 = vadd.f32 %v4283_v34, %v1602_v60  ;;  %v4285_v32 = vunpack.c.l.bf16 %v4284_v3  ;;  %v4289_v15 = vld [vmem:[#allocation27_spill] sm:$0xff]  ;;  %v4304_v38 = vld [vmem:[#allocation28_spill] sm:$0xff] }
 0x23b   :  { %v3035_v1 = vpop.f32.mrf.mxu1  ;;  %v2008_v0 = vadd.f32 %v3008_v30, %v1806_v55  ;;  %v4307_v47 = vld [vmem:[#allocation32_spill] sm:$0xff]  ;;  %v4316_v55 = vld [vmem:[#allocation5_spill] sm:$0xff] }
 0x23c   :  { %v2519_v7 = vpack.c.bf16 %v2218_v31, %v2217_v44  ;;  %v2216_v8 = vadd.f32 %v4270_v52, %v2200_v20  ;;  %v2205_v54 = vadd.f32 %v3035_v1, %v2003_v37  ;;  %v1202_v44 = vadd.f32 %v4288_v58, %v4287_v42  ;;  %v4290_v20 = vld [vmem:[#allocation37_spill] sm:$0xff]  ;;  %v4292_v37 = vld [vmem:[#allocation3_spill] sm:$0xff] }
 0x23d   :  { %v2152_v59 = vpop.f32.mrf.mxu1  ;;  %v1601_v31 = vadd.f32 %v4289_v15, %v1399_v13  ;;  %v1803_v29 = vadd.f32 %v4290_v20, %v1600_v5  ;;  %v2007_v1 = vadd.f32 %v4058_v23, %v1805_v17  ;;  %v4293_v45 = vunpack.c.l.bf16 %v4292_v37  ;;  %v4309_v17 = vld [vmem:[#allocation41_spill] sm:$0xff] }
 0x23e   :  { %2558 = vst [vmem:[%s4192_s7 + $0x8] sm:$0xff] %v2519_v7   ;;  %v2514_v4 = vpack.c.bf16 %v2216_v8, %v2215_v16  ;;  %v2203_v24 = vadd.f32 %v2152_v59, %v2001_v11  ;;  %v2221_v63 = vadd.f32 %v4285_v32, %v2205_v54  ;;  %v4294_v52 = vunpack.c.h.bf16 %v4292_v37  ;;  %v4310_v32 = vld [vmem:[#allocation6_spill] sm:$0xff]  ;;  %v4313_v42 = vld [vmem:[#allocation33_spill] sm:$0xff] }
 0x23f   :  { %v3036_v56 = vpop.f32.mrf.mxu1  ;;  %v1203_v59 = vadd.f32 %v4298_v40, %v4297_v10  ;;  %v1404_v11 = vadd.f32 %v4299_v28, %v1202_v44  ;;  %v2005_v23 = vadd.f32 %v4070_v62, %v1803_v29  ;;  %v1403_v13 = vadd.f32 %v4308_v9, %v1201_v53  ;;  %v4314_v44 = vld [vmem:[#allocation43_spill] sm:$0xff] }
 0x240   :  { %2515 = vst [vmem:[%s4192_s7] sm:$0xff] %v2514_v4   ;;  %v2206_v27 = vadd.f32 %v3036_v56, %v2004_v2  ;;  %v2219_v16 = vadd.f32 %v4293_v45, %v2203_v24  ;;  %v1804_v2 = vadd.f32 %v4300_v48, %v1601_v31  ;;  %v1982_v4 = vpop.f32.mrf.mxu0  ;;  %v1402_v56 = vadd.f32 %v4303_v57, %v1200_v19  ;;  %v4315_v31 = vld [vmem:[#allocation44_spill] sm:$0xff] }
 0x241   :  { %v2155_v6 = vpop.f32.mrf.mxu1  ;;  %v1405_v60 = vadd.f32 %v4304_v38, %v1203_v59  ;;  %v1605_v58 = vadd.f32 %v4313_v42, %v1403_v13  ;;  %v4318_v45 = vunpack.c.h.bf16 %v4316_v55 }
 0x242   :  { %v2222_v43 = vadd.f32 %v4286_v41, %v2206_v27  ;;  %v2204_v36 = vadd.f32 %v2155_v6, %v2002_v46  ;;  %v4305_v46 = vld [vmem:[#allocation29_spill] sm:$0xff]  ;;  %v2006_v27 = vadd.f32 %v1969_v49, %v1804_v2  ;;  %v1604_v5 = vadd.f32 %v4306_v25, %v1402_v56  ;;  %v3012_v6 = vpop.f32.mrf.mxu0 }
 0x243   :  { %v3039_v33 = vpop.f32.mrf.mxu1  ;;  %v1606_v24 = vadd.f32 %v4305_v46, %v1404_v11  ;;  %v1607_v18 = vadd.f32 %v4307_v47, %v1405_v60  ;;  %v4312_v49 = vunpack.c.h.bf16 %v4310_v32 }
 0x244   :  { %v2529_v7 = vpack.c.bf16 %v2222_v43, %v2221_v63  ;;  %v2220_v8 = vadd.f32 %v4294_v52, %v2204_v36  ;;  %v2209_v26 = vadd.f32 %v3039_v33, %v2007_v1  ;;  %v4311_v63 = vunpack.c.l.bf16 %v4310_v32  ;;  %v1985_v52 = vpop.f32.mrf.mxu0 }
 0x245   :  { %v2168_v54 = vpop.f32.mrf.mxu1  ;;  %v1809_v3 = vadd.f32 %v4309_v17, %v1606_v24  ;;  %v1807_v15 = vadd.f32 %v4314_v44, %v1604_v5  ;;  %v1810_v20 = vadd.f32 %v4315_v31, %v1607_v18  ;;  %v4317_v33 = vunpack.c.l.bf16 %v4316_v55 }
 0x246   :  { %2560 = vst [vmem:[%s4192_s7 + $0x18] sm:$0xff] %v2529_v7   ;;  %v2524_v22 = vpack.c.bf16 %v2220_v8, %v2219_v16  ;;  %v2207_v62 = vadd.f32 %v2168_v54, %v2005_v23  ;;  %v2225_v41 = vadd.f32 %v4311_v63, %v2209_v26  ;;  %v1808_v7 = vadd.f32 %v4060_v14, %v1605_v58  ;;  %v4319_v14 = vld [vmem:[#allocation8_spill] sm:$0xff] }
 0x247   :  { %v3040_v12 = vpop.f32.mrf.mxu1  ;;  %v2011_v61 = vadd.f32 %v3011_v39, %v1809_v3  ;;  %v2009_v50 = vadd.f32 %v1982_v4, %v1807_v15  ;;  %v2012_v51 = vadd.f32 %v3012_v6, %v1810_v20  ;;  %v4320_v48 = vunpack.c.l.bf16 %v4319_v14 }
 0x248   :  { %2559 = vst [vmem:[%s4192_s7 + $0x10] sm:$0xff] %v2524_v22   ;;  %v2210_v30 = vadd.f32 %v3040_v12, %v2008_v0  ;;  %v2223_v1 = vadd.f32 %v4317_v33, %v2207_v62  ;;  %v2010_v40 = vadd.f32 %v1985_v52, %v1808_v7  ;;  %v4321_v4 = vunpack.c.h.bf16 %v4319_v14  ;;  %v4322_v0 = vld [vmem:[#allocation7_spill] sm:$0xff] }
 0x249   :  { %v2171_v34 = vpop.f32.mrf.mxu1  ;;  %v4323_v22 = vunpack.c.l.bf16 %v4322_v0  ;;  %v4324_v21 = vunpack.c.h.bf16 %v4322_v0 }
 0x24a   :  { %v2226_v43 = vadd.f32 %v4312_v49, %v2210_v30  ;;  %v2208_v36 = vadd.f32 %v2171_v34, %v2006_v27 }
 0x24b   :  { %v3043_v29 = vpop.f32.mrf.mxu1 }
 0x24c   :  { %v2539_v37 = vpack.c.bf16 %v2226_v43, %v2225_v41  ;;  %v2224_v16 = vadd.f32 %v4318_v45, %v2208_v36  ;;  %v2213_v10 = vadd.f32 %v3043_v29, %v2011_v61 }
 0x24d   :  { %v2184_v8 = vpop.f32.mrf.mxu1 }
 0x24e   :  { %2562 = vst [vmem:[%s4192_s7 + $0x28] sm:$0xff] %v2539_v37   ;;  %v2534_v19 = vpack.c.bf16 %v2224_v16, %v2223_v1  ;;  %v2211_v59 = vadd.f32 %v2184_v8, %v2009_v50  ;;  %v2229_v2 = vadd.f32 %v4320_v48, %v2213_v10 }
 0x24f   :  { %v3044_v39 = vpop.f32.mrf.mxu1 }
 0x250   :  { %2561 = vst [vmem:[%s4192_s7 + $0x20] sm:$0xff] %v2534_v19   ;;  %v2214_v28 = vadd.f32 %v3044_v39, %v2012_v51  ;;  %v2227_v26 = vadd.f32 %v4323_v22, %v2211_v59 }
 0x251   :  { %v2187_v11 = vpop.f32.mrf.mxu1 }
 0x252   :  { %v2230_v54 = vadd.f32 %v4321_v4, %v2214_v28  ;;  %v2212_v23 = vadd.f32 %v2187_v11, %v2010_v40 }
 0x254   :  { %v2549_v35 = vpack.c.bf16 %v2230_v54, %v2229_v2  ;;  %v2228_v53 = vadd.f32 %v4324_v21, %v2212_v23 }
 0x256   :  { %2564 = vst [vmem:[%s4192_s7 + $0x38] sm:$0xff] %v2549_v35   ;;  %v2544_v57 = vpack.c.bf16 %v2228_v53, %v2227_v26 }
 0x258   :  { %2563 = vst [vmem:[%s4192_s7 + $0x30] sm:$0xff] %v2544_v57  }

// kernel: densenet_forward.15
= control target key start
LH: loop header
LB: loop body
LE: loop exit
PB: predicated region body
PF: predicated region fallthrough
CT: control target
= control target key end

     0   :  { %s2653_s3 = inlined_call_operand.vmem [shape: bf16[128,128], index: 3, kind: input, shape index: {}]   ;;  %s2654_s0 = inlined_call_operand.vmem [shape: bf16[2,4,4,128], index: 0, kind: input, shape index: {}, may-alias: {0,7}]   ;;  %s2655_s1 = inlined_call_operand.vmem [shape: f32[1,128], index: 1, kind: input, shape index: {}]   ;;  %s2656_s2 = inlined_call_operand.vmem [shape: f32[1,128], index: 2, kind: input, shape index: {}]   ;;  %s2657_s6 = inlined_call_operand.vmem [shape: bf16[9,128,128], index: 6, kind: input, shape index: {}]   ;;  %s2658_s4 = inlined_call_operand.vmem [shape: f32[1,128], index: 4, kind: input, shape index: {}]   ;;  %s2659_s5 = inlined_call_operand.vmem [shape: f32[1,128], index: 5, kind: input, shape index: {}]   ;;  %s2660_s7 = inlined_call_operand.vmem [shape: bf16[2,4,4,128], index: 7, kind: output, shape index: {}, may-alias: {0,7}]  }
   0x1   :  { %v2140_v0 = vld [vmem:[%s2653_s3 + $0x38] sm:$0xff]   ;;  %v2141_v1 = vld [vmem:[%s2653_s3 + $0x30] sm:$0xff]   ;;  %v2142_v2 = vld [vmem:[%s2653_s3 + $0x28] sm:$0xff]  }
   0x2   :  { %1939 = vmatprep.subr.bf16.mxu0 %v2140_v0  ;;  %v2143_v3 = vld [vmem:[%s2653_s3 + $0x20] sm:$0xff]   ;;  %v2144_v13 = vld [vmem:[%s2653_s3 + $0x18] sm:$0xff]   ;;  %v2345_v17 = vld [vmem:[%s2654_s0 + $0x8] sm:$0x3] }
   0x3   :  { %1940 = vmatpush3.bf16.msra.mxu0 %v2140_v0  ;;  %v2312_v4 = vld [vmem:[%s2654_s0] sm:$0x3]  ;;  %v2317_v5 = vld [vmem:[%s2654_s0 + $0x2] sm:$0x3]  ;;  %v2322_v6 = vld [vmem:[%s2654_s0 + $0x4] sm:$0x3]  ;;  %v39_v23 = vunpack.c.l.bf16 %v2345_v17 }
   0x4   :  { %1941 = vmatprep.subr.bf16.mxu0 %v2141_v1  ;;  %v2327_v7 = vld [vmem:[%s2654_s0 + $0x6] sm:$0x3]  ;;  %v35_v8 = vunpack.c.l.bf16 %v2312_v4  ;;  %v36_v9 = vunpack.c.l.bf16 %v2317_v5  ;;  %v37_v10 = vunpack.c.l.bf16 %v2322_v6  ;;  %v1627_v11 = vld [vmem:[%s2655_s1] ss:$0 sm:$0xff]  ;;  %v2350_v18 = vld [vmem:[%s2654_s0 + $0xa] sm:$0x3] }
   0x5   :  { %v1628_v12 = vld [vmem:[%s2656_s2] ss:$0 sm:$0xff]  ;;  %v38_v14 = vunpack.c.l.bf16 %v2327_v7  ;;  %v50_v15 = vcombine.high %v1627_v11, %v1627_v11  ;;  %v2355_v19 = vld [vmem:[%s2654_s0 + $0xc] sm:$0x3]  ;;  %v2364_v22 = vld [vmem:[%s2654_s0 + $0xe] sm:$0x3]  ;;  %v40_v24 = vunpack.c.l.bf16 %v2350_v18  ;;  %v56_v32 = vmul.f32 %v1627_v11, %v39_v23 }
   0x6   :  { %v67_v16 = vcombine.high %v1628_v12, %v1628_v12  ;;  %v52_v20 = vmul.f32 %v1627_v11, %v35_v8  ;;  %v54_v21 = vmul.f32 %v1627_v11, %v37_v10  ;;  %v41_v27 = vunpack.c.l.bf16 %v2355_v19  ;;  %v2148_v29 = vld [vmem:[%s2657_s6 + $0x78] sm:$0xff]   ;;  %v2150_v38 = vld [vmem:[%s2657_s6 + $0x70] sm:$0xff]   ;;  %v2146_v50 = vld [vmem:[%s2653_s3 + $0x8] sm:$0xff]  }
   0x7   :  { %1942 = vmatpush3.bf16.msra.mxu0 %v2141_v1  ;;  %v53_v25 = vmul.f32 %v50_v15, %v36_v9  ;;  %v55_v26 = vmul.f32 %v50_v15, %v38_v14  ;;  %v42_v28 = vunpack.c.l.bf16 %v2364_v22  ;;  %v57_v33 = vmul.f32 %v50_v15, %v40_v24  ;;  %1959 = vmatprep.subr.bf16.mxu1 %v2148_v29  ;;  %v2145_v39 = vld [vmem:[%s2653_s3 + $0x10] sm:$0xff]   ;;  %v2147_v56 = vld [vmem:[%s2653_s3] sm:$0xff]   ;;  %v2149_v59 = vld [vmem:[%s2657_s6 + $0x38] sm:$0xff]  }
   0x8   :  { %1943 = vmatprep.subr.bf16.mxu0 %v2142_v2  ;;  %v69_v30 = vadd.f32 %v1628_v12, %v52_v20  ;;  %v71_v31 = vadd.f32 %v1628_v12, %v54_v21  ;;  %v58_v36 = vmul.f32 %v1627_v11, %v41_v27  ;;  %v73_v42 = vadd.f32 %v1628_v12, %v56_v32  ;;  %v2151_v61 = vld [vmem:[%s2657_s6 + $0x30] sm:$0xff]   ;;  %v2152_v62 = vld [vmem:[%s2657_s6 + $0x68] sm:$0xff]   ;;  %v2154_v0 = vld [vmem:[%s2657_s6 + $0x60] sm:$0xff]  }
   0x9   :  { %v70_v34 = vadd.f32 %v67_v16, %v53_v25  ;;  %v72_v35 = vadd.f32 %v67_v16, %v55_v26  ;;  %v59_v37 = vmul.f32 %v50_v15, %v42_v28  ;;  %v74_v43 = vadd.f32 %v67_v16, %v57_v33  ;;  %1960 = vmatpush3.bf16.msra.mxu1 %v2148_v29  ;;  %v2153_v63 = vld [vmem:[%s2657_s6 + $0x28] sm:$0xff]   ;;  %v2155_v1 = vld [vmem:[%s2657_s6 + $0x20] sm:$0xff]   ;;  %v2157_v11 = vld [vmem:[%s2657_s6 + $0x18] sm:$0xff]  }
   0xa   :  { %v77_v40 = vmax.f32 %v69_v30, 0.0  ;;  %v79_v41 = vmax.f32 %v71_v31, 0.0  ;;  %v75_v46 = vadd.f32 %v1628_v12, %v58_v36  ;;  %1961 = vmatprep.subr.bf16.mxu1 %v2150_v38  ;;  %v81_v48 = vmax.f32 %v73_v42, 0.0  ;;  %v2158_v12 = vld [vmem:[%s2657_s6 + $0x50] sm:$0xff]   ;;  %v2160_v15 = vld [vmem:[%s2657_s6 + $0x48] sm:$0xff]   ;;  %v2162_v20 = vld [vmem:[%s2657_s6 + $0x40] sm:$0xff]  }
   0xb   :  { %1944 = vmatpush3.bf16.msra.mxu0 %v2142_v2  ;;  %v78_v44 = vmax.f32 %v70_v34, 0.0  ;;  %v80_v45 = vmax.f32 %v72_v35, 0.0  ;;  %v76_v47 = vadd.f32 %v67_v16, %v59_v37  ;;  %v82_v49 = vmax.f32 %v74_v43, 0.0  ;;  %v2161_v16 = vld [vmem:[%s2657_s6 + $0x8] sm:$0xff]   ;;  %v2163_v21 = vld [vmem:[%s2657_s6] sm:$0xff]   ;;  %v2168_v25 = vld [vmem:[%s2657_s6 + $0xb8] sm:$0xff]  }
   0xc   :  { %1945 = vmatprep.subr.bf16.mxu0 %v2143_v3  ;;  %v83_v53 = vmax.f32 %v75_v46, 0.0  ;;  %v2256_v2 = vmov 0.0   ;;  %v2169_v26 = vld [vmem:[%s2657_s6 + $0xf8] sm:$0xff]   ;;  %v1637_v29 = vld [vmem:[%s2658_s4] ss:$0 sm:$0xff] }
   0xd   :  { %v93_v51 = vcombine.low %v77_v40, %v78_v44  ;;  %v94_v52 = vcombine.low %v79_v41, %v80_v45  ;;  %v84_v54 = vmax.f32 %v76_v47, 0.0  ;;  %1962 = vmatpush3.bf16.msra.mxu1 %v2150_v38  ;;  %v95_v57 = vcombine.low %v81_v48, %v82_v49  ;;  %264 = vst [vmem:[#allocation2 + $0xb0] sm:$0xff] %v2256_v2  ;;  %v1638_v31 = vld [vmem:[%s2659_s5] ss:$0 sm:$0xff] }
   0xe   :  { %1963 = vmatprep.subr.bf16.mxu1 %v2152_v62  ;;  %267 = vst [vmem:[#allocation2 + $0xc8] sm:$0xff] %v2256_v2  ;;  %242 = vst [vmem:[#allocation2] sm:$0xff] %v2256_v2 }
   0xf   :  { %1946 = vmatpush3.bf16.msra.mxu0 %v2143_v3  ;;  %v101_v55 = vpack.c.bf16 %v94_v52, %v93_v51  ;;  %v96_v58 = vcombine.low %v83_v53, %v84_v54  ;;  %243 = vst [vmem:[#allocation2 + $0x8] sm:$0xff] %v2256_v2  ;;  %245 = vst [vmem:[#allocation2 + $0x18] sm:$0xff] %v2256_v2  ;;  %v2156_v3 = vld [vmem:[%s2657_s6 + $0x58] sm:$0xff]  }
  0x10   :  { %1947 = vmatprep.subr.bf16.mxu0 %v2144_v13  ;;  %246 = vst [vmem:[#allocation2 + $0x20] sm:$0xff] %v2256_v2  ;;  %248 = vst [vmem:[#allocation2 + $0x30] sm:$0xff] %v2256_v2 }
  0x11   :  { %1955 = vmatprep.mubr.bf16.mxu0 %v101_v55  ;;  %v102_v60 = vpack.c.bf16 %v96_v58, %v95_v57  ;;  %1964 = vmatpush3.bf16.msra.mxu1 %v2152_v62  ;;  %249 = vst [vmem:[#allocation2 + $0x38] sm:$0xff] %v2256_v2  ;;  %251 = vst [vmem:[#allocation2 + $0x48] sm:$0xff] %v2256_v2  ;;  %v2178_v62 = vld [vmem:[%s2657_s6 + $0xb0] sm:$0xff]  }
  0x12   :  { %1965 = vmatprep.subr.bf16.mxu1 %v2154_v0  ;;  %252 = vst [vmem:[#allocation2 + $0x50] sm:$0xff] %v2256_v2  ;;  %254 = vst [vmem:[#allocation2 + $0x60] sm:$0xff] %v2256_v2 }
  0x13   :  { %1948 = vmatpush3.bf16.msra.mxu0 %v2144_v13  ;;  %255 = vst [vmem:[#allocation2 + $0x68] sm:$0xff] %v2256_v2  ;;  %257 = vst [vmem:[#allocation2 + $0x78] sm:$0xff] %v2256_v2  ;;  %v2159_v13 = vld [vmem:[%s2657_s6 + $0x10] sm:$0xff]  }
  0x14   :  { %1949 = vmatprep.subr.bf16.mxu0 %v2145_v39  ;;  %258 = vst [vmem:[#allocation2 + $0x80] sm:$0xff] %v2256_v2  ;;  %260 = vst [vmem:[#allocation2 + $0x90] sm:$0xff] %v2256_v2 }
  0x15   :  { %1966 = vmatpush3.bf16.msra.mxu1 %v2154_v0  ;;  %261 = vst [vmem:[#allocation2 + $0x98] sm:$0xff] %v2256_v2  ;;  %263 = vst [vmem:[#allocation2 + $0xa8] sm:$0xff] %v2256_v2 }
  0x16   :  { %266 = vst [vmem:[#allocation2 + $0xc0] sm:$0xff] %v2256_v2  ;;  %269 = vst [vmem:[#allocation2 + $0xd8] sm:$0xff] %v2256_v2  ;;  %1967 = vmatprep.subr.bf16.mxu1 %v2156_v3 }
  0x17   :  { %1950 = vmatpush3.bf16.msra.mxu0 %v2145_v39  ;;  %270 = vst [vmem:[#allocation2 + $0xe0] sm:$0xff] %v2256_v2  ;;  %272 = vst [vmem:[#allocation2 + $0xf0] sm:$0xff] %v2256_v2 }
  0x18   :  { %1951 = vmatprep.subr.bf16.mxu0 %v2146_v50  ;;  %273 = vst [vmem:[#allocation2 + $0xf8] sm:$0xff] %v2256_v2  ;;  %275 = vst [vmem:[#allocation2 + $0x108] sm:$0xff] %v2256_v2 }
  0x19   :  { %276 = vst [vmem:[#allocation2 + $0x110] sm:$0xff] %v2256_v2  ;;  %1968 = vmatpush3.bf16.msra.mxu1 %v2156_v3 }
  0x1a   :  { %1969 = vmatprep.subr.bf16.mxu1 %v2158_v12 }
  0x1b   :  { %1952 = vmatpush3.bf16.msra.mxu0 %v2146_v50 }
  0x1c   :  { %1953 = vmatprep.subr.bf16.mxu0 %v2147_v56 }
  0x1d   :  { %1970 = vmatpush3.bf16.msra.mxu1 %v2158_v12  ;;  %v2179_v12 = vld [vmem:[%s2657_s6 + $0xf0] sm:$0xff]  }
  0x1e   :  { %1971 = vmatprep.subr.bf16.mxu1 %v2160_v15 }
  0x1f   :  { %1954 = vmatpush3.bf16.msra.mxu0 %v2147_v56 }
  0x20   :  { %1979 = vmatprep.subr.bf16.mxu0 %v2149_v59 }
  0x21   :  { %1972 = vmatpush3.bf16.msra.mxu1 %v2160_v15  ;;  %v2180_v15 = vld [vmem:[%s2657_s6 + $0xa8] sm:$0xff]  }
  0x22   :  { %1956 = vmatmul.mubr.bf16.vlgmr.msra.gmra.mxu0 %v102_v60  ;;  %1973 = vmatprep.subr.bf16.mxu1 %v2162_v20 }
  0x23   :  { %1980 = vmatpush3.bf16.msra.mxu0 %v2149_v59 }
  0x24   :  { %1981 = vmatprep.subr.bf16.mxu0 %v2151_v61 }
  0x25   :  { %1974 = vmatpush3.bf16.msra.mxu1 %v2162_v20  ;;  %v2182_v20 = vld [vmem:[%s2657_s6 + $0xa0] sm:$0xff]  }
  0x26   :  { %1999 = vmatprep.subr.bf16.mxu1 %v2168_v25 }
  0x27   :  { %1982 = vmatpush3.bf16.msra.mxu0 %v2151_v61 }
  0x28   :  { %1983 = vmatprep.subr.bf16.mxu0 %v2153_v63 }
  0x2b   :  { %1984 = vmatpush3.bf16.msra.mxu0 %v2153_v63 }
  0x2c   :  { %1985 = vmatprep.subr.bf16.mxu0 %v2155_v1 }
  0x2f   :  { %1986 = vmatpush3.bf16.msra.mxu0 %v2155_v1 }
  0x30   :  { %1987 = vmatprep.subr.bf16.mxu0 %v2157_v11 }
  0x33   :  { %1988 = vmatpush3.bf16.msra.mxu0 %v2157_v11 }
  0x34   :  { %1989 = vmatprep.subr.bf16.mxu0 %v2159_v13 }
  0x37   :  { %1990 = vmatpush3.bf16.msra.mxu0 %v2159_v13 }
  0x38   :  { %1991 = vmatprep.subr.bf16.mxu0 %v2161_v16 }
  0x3b   :  { %1992 = vmatpush3.bf16.msra.mxu0 %v2161_v16  ;;  %v2181_v16 = vld [vmem:[%s2657_s6 + $0xe8] sm:$0xff]  }
  0x3c   :  { %1993 = vmatprep.subr.bf16.mxu0 %v2163_v21 }
  0x3f   :  { %1994 = vmatpush3.bf16.msra.mxu0 %v2163_v21  ;;  %v2183_v21 = vld [vmem:[%s2657_s6 + $0xe0] sm:$0xff]  }
  0x40   :  { %2019 = vmatprep.subr.bf16.mxu0 %v2169_v26 }
  0xe2   :  { %v1957_v30 = vpop.f32.mrf.mxu0 }
  0xe3   :  { %v225_v32 = vmul.f32 %v1957_v30, %v1637_v29  ;;  %v2187_v30 = vld [vmem:[%s2657_s6 + $0xd0] sm:$0xff]  }
  0xe4   :  { %v201_v33 = vpop.f32.mrf.mxu0 }
  0xe5   :  { %v236_v34 = vadd.f32 %v1638_v31, %v225_v32  ;;  %v223_v35 = vmul.f32 %v1637_v29, %v201_v33  ;;  %v2189_v32 = vld [vmem:[%s2657_s6 + $0xc8] sm:$0xff]   ;;  %v2190_v33 = vld [vmem:[%s2657_s6 + $0x80] sm:$0xff]  }
  0xe6   :  { %v1958_v36 = vpop.f32.mrf.mxu0 }
  0xe7   :  { %v240_v37 = vmax.f32 %v236_v34, 0.0  ;;  %v234_v38 = vadd.f32 %v1638_v31, %v223_v35  ;;  %v226_v39 = vmul.f32 %v1958_v36, %v1637_v29  ;;  %v2191_v34 = vld [vmem:[%s2657_s6 + $0xc0] sm:$0xff]   ;;  %v2196_v36 = vld [vmem:[%s2657_s6 + $0x138] sm:$0xff]  }
  0xe8   :  { %v204_v40 = vpop.f32.mrf.mxu0 }
  0xe9   :  { %v284_v41 = vcombine.high %v240_v37, %v240_v37  ;;  %295 = vst [vmem:[#allocation2 + $0xb0] sm:$0xf] %v240_v37  ;;  %v238_v42 = vmax.f32 %v234_v38, 0.0  ;;  %v237_v43 = vadd.f32 %v1638_v31, %v226_v39  ;;  %v224_v44 = vmul.f32 %v1637_v29, %v204_v40  ;;  %v2186_v29 = vld [vmem:[%s2657_s6 + $0x90] sm:$0xff]   ;;  %v2197_v38 = vld [vmem:[%s2657_s6 + $0x178] sm:$0xff]  }
  0xeb   :  { %296 = vst [vmem:[#allocation2 + $0xc8] sm:$0xf] %v284_v41  ;;  %v282_v45 = vcombine.high %v238_v42, %v238_v42  ;;  %291 = vst [vmem:[#allocation2 + $0x20] sm:$0xf] %v238_v42  ;;  %v241_v46 = vmax.f32 %v237_v43, 0.0  ;;  %v235_v47 = vadd.f32 %v1638_v31, %v224_v44  ;;  %v2188_v31 = vld [vmem:[%s2657_s6 + $0x88] sm:$0xff]  }
  0xed   :  { %292 = vst [vmem:[#allocation2 + $0x38] sm:$0xf] %v282_v45  ;;  %v285_v48 = vcombine.high %v241_v46, %v241_v46  ;;  %297 = vst [vmem:[#allocation2 + $0xe0] sm:$0xf] %v241_v46  ;;  %v239_v49 = vmax.f32 %v235_v47, 0.0  ;;  %v2202_v47 = vld [vmem:[%s2657_s6 + $0x130] sm:$0xff]  }
  0xef   :  { %298 = vst [vmem:[#allocation2 + $0xf8] sm:$0xf] %v285_v48  ;;  %v283_v50 = vcombine.high %v239_v49, %v239_v49  ;;  %293 = vst [vmem:[#allocation2 + $0x50] sm:$0xf] %v239_v49  ;;  %v2203_v49 = vld [vmem:[%s2657_s6 + $0x170] sm:$0xff]  }
  0xf0   :  { %v2170_v53 = vld [vmem:[#allocation2 + $0x98] ss:$24 sps:$4 sm:$0xff]  }
  0xf1   :  { %294 = vst [vmem:[#allocation2 + $0x68] sm:$0xf] %v283_v50  ;;  %v2172_v57 = vld [vmem:[#allocation2 + $0x97] ss:$24 sps:$4 sm:$0xff]  }
  0xf2   :  { %v2164_v51 = vld [vmem:[#allocation2 + $0x8] ss:$24 sps:$4 sm:$0xff]   ;;  %v2192_v39 = vld [vmem:[#allocation2 + $0x99] ss:$24 sps:$4 sm:$0xff]  }
  0xf3   :  { %v2166_v52 = vld [vmem:[#allocation2 + $0x7] ss:$24 sps:$4 sm:$0xff]  }
  0xf4   :  { %v2171_v54 = vld [vmem:[#allocation2 + $0xc8] ss:$24 sps:$4 sm:$0xff]  }
  0xf5   :  { %v2173_v55 = vld [vmem:[#allocation2 + $0xc7] ss:$24 sps:$4 sm:$0xff]   ;;  %v366_v0 = vpack.c.bf16 %v2171_v54, %v2170_v53 }
  0xf6   :  { %v2165_v56 = vld [vmem:[#allocation2 + $0x38] ss:$24 sps:$4 sm:$0xff]   ;;  %v2174_v60 = vld [vmem:[#allocation2 + $0x9] ss:$24 sps:$4 sm:$0xff]   ;;  %v324_v1 = vpack.c.bf16 %v2173_v55, %v2172_v57 }
  0xf7   :  { %v2167_v58 = vld [vmem:[#allocation2 + $0x37] ss:$24 sps:$4 sm:$0xff]   ;;  %v365_v59 = vpack.c.bf16 %v2165_v56, %v2164_v51  ;;  %v2193_v35 = vld [vmem:[#allocation2 + $0xc9] ss:$24 sps:$4 sm:$0xff]  }
  0xf8   :  { %v2175_v61 = vld [vmem:[#allocation2 + $0x39] ss:$24 sps:$4 sm:$0xff]   ;;  %v323_v63 = vpack.c.bf16 %v2167_v58, %v2166_v52  ;;  %v603_v43 = vpack.c.bf16 %v2193_v35, %v2192_v39  ;;  %v2204_v51 = vld [vmem:[%s2657_s6 + $0x128] sm:$0xff]   ;;  %v2206_v53 = vld [vmem:[%s2657_s6 + $0x120] sm:$0xff]  }
  0xf9   :  { %1975 = vmatprep.mubr.bf16.mxu1 %v365_v59  ;;  %v2176_v2 = vld [vmem:[#allocation2 + $0x1f] ss:$24 sps:$4 sm:$0xff]   ;;  %v2177_v3 = vld [vmem:[#allocation2 + $0x4f] ss:$24 sps:$4 sm:$0xff]   ;;  %v602_v11 = vpack.c.bf16 %v2175_v61, %v2174_v60 }
  0xfa   :  { %1995 = vmatprep.mubr.bf16.mxu0 %v323_v63  ;;  %1976 = vmatmul.mubr.bf16.vlgmr.msra.gmra.mxu1 %v366_v0  ;;  %v746_v13 = vpack.c.bf16 %v2177_v3, %v2176_v2  ;;  %v2195_v37 = vld [vmem:[#allocation2 + $0xdf] ss:$24 sps:$4 sm:$0xff]   ;;  %v2199_v40 = vld [vmem:[#allocation2 + $0x50] ss:$24 sps:$4 sm:$0xff]  }
  0xfb   :  { %1996 = vmatmul.mubr.bf16.vlgmr.msra.gmra.mxu0 %v324_v1  ;;  %2000 = vmatpush3.bf16.msra.mxu1 %v2168_v25  ;;  %v2184_v25 = vld [vmem:[%s2657_s6 + $0x98] sm:$0xff]   ;;  %v2194_v41 = vld [vmem:[#allocation2 + $0xaf] ss:$24 sps:$4 sm:$0xff]  }
  0xfc   :  { %2020 = vmatpush3.bf16.msra.mxu0 %v2169_v26  ;;  %2015 = vmatprep.mubr.bf16.mxu1 %v602_v11  ;;  %v2185_v26 = vld [vmem:[%s2657_s6 + $0xd8] sm:$0xff]   ;;  %v2201_v42 = vld [vmem:[#allocation2 + $0x51] ss:$24 sps:$4 sm:$0xff]   ;;  %v747_v45 = vpack.c.bf16 %v2195_v37, %v2194_v41  ;;  %v2207_v54 = vld [vmem:[%s2657_s6 + $0x160] sm:$0xff]  }
  0xfd   :  { %2035 = vmatprep.mubr.bf16.mxu0 %v746_v13  ;;  %2001 = vmatprep.subr.bf16.mxu1 %v2178_v62  ;;  %v2198_v44 = vld [vmem:[#allocation2 + $0x20] ss:$24 sps:$4 sm:$0xff]   ;;  %v2205_v52 = vld [vmem:[%s2657_s6 + $0x168] sm:$0xff]   ;;  %v2210_v57 = vld [vmem:[%s2657_s6 + $0x110] sm:$0xff]  }
  0xfe   :  { %2021 = vmatprep.subr.bf16.mxu0 %v2179_v12  ;;  %v2200_v46 = vld [vmem:[#allocation2 + $0x21] ss:$24 sps:$4 sm:$0xff]   ;;  %v890_v48 = vpack.c.bf16 %v2199_v40, %v2198_v44  ;;  %v2211_v58 = vld [vmem:[%s2657_s6 + $0x150] sm:$0xff]   ;;  %v2212_v59 = vld [vmem:[%s2657_s6 + $0x108] sm:$0xff]  }
  0xff   :  { %2002 = vmatpush3.bf16.msra.mxu1 %v2178_v62  ;;  %v1034_v50 = vpack.c.bf16 %v2201_v42, %v2200_v46  ;;  %v2208_v55 = vld [vmem:[%s2657_s6 + $0x118] sm:$0xff]   ;;  %v2213_v60 = vld [vmem:[%s2657_s6 + $0x148] sm:$0xff]   ;;  %v2214_v61 = vld [vmem:[%s2657_s6 + $0x100] sm:$0xff]  }
 0x100   :  { %2022 = vmatpush3.bf16.msra.mxu0 %v2179_v12  ;;  %2003 = vmatprep.subr.bf16.mxu1 %v2180_v15  ;;  %v2209_v56 = vld [vmem:[%s2657_s6 + $0x158] sm:$0xff]   ;;  %v2215_v62 = vld [vmem:[%s2657_s6 + $0x140] sm:$0xff]   ;;  %v2216_v3 = vld [vmem:[#allocation2 + $0xb0] ss:$24 sps:$4 sm:$0xff]  }
 0x101   :  { %2023 = vmatprep.subr.bf16.mxu0 %v2181_v16  ;;  %v2217_v63 = vld [vmem:[#allocation2 + $0xe0] ss:$24 sps:$4 sm:$0xff]   ;;  %v2218_v12 = vld [vmem:[#allocation2 + $0xb1] ss:$24 sps:$4 sm:$0xff]  }
 0x102   :  { %v2220_v0 = vld [vmem:[%s2657_s6 + $0x1b8] sm:$0xff]   ;;  %v2225_v13 = vld [vmem:[#allocation2 + $0x68] ss:$24 sps:$4 sm:$0xff]   ;;  %v2234_v37 = vld [vmem:[%s2657_s6 + $0x190] sm:$0xff]  }
 0x103   :  { %2004 = vmatpush3.bf16.msra.mxu1 %v2180_v15  ;;  %v2219_v1 = vld [vmem:[#allocation2 + $0xe1] ss:$24 sps:$4 sm:$0xff]   ;;  %v891_v15 = vpack.c.bf16 %v2217_v63, %v2216_v3  ;;  %v2236_v39 = vld [vmem:[%s2657_s6 + $0x188] sm:$0xff]  }
 0x104   :  { %2024 = vmatpush3.bf16.msra.mxu0 %v2181_v16  ;;  %2005 = vmatprep.subr.bf16.mxu1 %v2182_v20  ;;  %v2221_v2 = vld [vmem:[%s2657_s6 + $0x1f8] sm:$0xff]   ;;  %v2237_v40 = vld [vmem:[%s2657_s6 + $0x1c8] sm:$0xff]   ;;  %v2238_v41 = vld [vmem:[%s2657_s6 + $0x180] sm:$0xff]  }
 0x105   :  { %2025 = vmatprep.subr.bf16.mxu0 %v2183_v21  ;;  %v2223_v11 = vld [vmem:[#allocation2 + $0x67] ss:$24 sps:$4 sm:$0xff]   ;;  %v2222_v16 = vld [vmem:[#allocation2 + $0x37] ss:$24 sps:$4 sm:$0xff]  }
 0x106   :  { %v2232_v35 = vld [vmem:[%s2657_s6 + $0x198] sm:$0xff]   ;;  %v2239_v42 = vld [vmem:[%s2657_s6 + $0x1c0] sm:$0xff]  }
 0x107   :  { %2006 = vmatpush3.bf16.msra.mxu1 %v2182_v20  ;;  %v1035_v20 = vpack.c.bf16 %v2219_v1, %v2218_v12  ;;  %v2244_v44 = vld [vmem:[%s2657_s6 + $0x238] sm:$0xff]  }
 0x108   :  { %2026 = vmatpush3.bf16.msra.mxu0 %v2183_v21  ;;  %2007 = vmatprep.subr.bf16.mxu1 %v2184_v25  ;;  %v2224_v21 = vld [vmem:[#allocation2 + $0x38] ss:$24 sps:$4 sm:$0xff]   ;;  %v2240_v46 = vld [vmem:[#allocation2 + $0xc7] ss:$24 sps:$4 sm:$0xff]  }
 0x109   :  { %2027 = vmatprep.subr.bf16.mxu0 %v2185_v26 }
 0x10b   :  { %2008 = vmatpush3.bf16.msra.mxu1 %v2184_v25  ;;  %v2226_v25 = vld [vmem:[%s2657_s6 + $0x1b0] sm:$0xff]  }
 0x10c   :  { %2028 = vmatpush3.bf16.msra.mxu0 %v2185_v26  ;;  %2009 = vmatprep.subr.bf16.mxu1 %v2186_v29  ;;  %v1179_v26 = vpack.c.bf16 %v2223_v11, %v2222_v16 }
 0x10d   :  { %2029 = vmatprep.subr.bf16.mxu0 %v2187_v30 }
 0x10f   :  { %2010 = vmatpush3.bf16.msra.mxu1 %v2186_v29  ;;  %v2227_v29 = vld [vmem:[%s2657_s6 + $0x1f0] sm:$0xff]  }
 0x110   :  { %2030 = vmatpush3.bf16.msra.mxu0 %v2187_v30  ;;  %2011 = vmatprep.subr.bf16.mxu1 %v2188_v31  ;;  %v1323_v30 = vpack.c.bf16 %v2225_v13, %v2224_v21 }
 0x111   :  { %2031 = vmatprep.subr.bf16.mxu0 %v2189_v32 }
 0x113   :  { %2012 = vmatpush3.bf16.msra.mxu1 %v2188_v31  ;;  %v2228_v31 = vld [vmem:[%s2657_s6 + $0x1a8] sm:$0xff]  }
 0x114   :  { %2032 = vmatpush3.bf16.msra.mxu0 %v2189_v32  ;;  %2013 = vmatprep.subr.bf16.mxu1 %v2190_v33  ;;  %v2229_v32 = vld [vmem:[%s2657_s6 + $0x1e8] sm:$0xff]  }
 0x115   :  { %2033 = vmatprep.subr.bf16.mxu0 %v2191_v34 }
 0x117   :  { %2014 = vmatpush3.bf16.msra.mxu1 %v2190_v33  ;;  %v2230_v33 = vld [vmem:[%s2657_s6 + $0x1a0] sm:$0xff]  }
 0x118   :  { %2034 = vmatpush3.bf16.msra.mxu0 %v2191_v34  ;;  %2039 = vmatprep.subr.bf16.mxu1 %v2196_v36  ;;  %v2231_v34 = vld [vmem:[%s2657_s6 + $0x1e0] sm:$0xff]  }
 0x119   :  { %2059 = vmatprep.subr.bf16.mxu0 %v2197_v38 }
 0x11a   :  { %2016 = vmatmul.mubr.bf16.vlgmr.msra.gmra.mxu1 %v603_v43  ;;  %v2241_v43 = vld [vmem:[#allocation2 + $0xf7] ss:$24 sps:$4 sm:$0xff]  }
 0x11b   :  { %2036 = vmatmul.mubr.bf16.vlgmr.msra.gmra.mxu0 %v747_v45  ;;  %2040 = vmatpush3.bf16.msra.mxu1 %v2196_v36  ;;  %v2233_v36 = vld [vmem:[%s2657_s6 + $0x1d8] sm:$0xff]  }
 0x11c   :  { %2055 = vmatprep.mubr.bf16.mxu1 %v890_v48  ;;  %2060 = vmatpush3.bf16.msra.mxu0 %v2197_v38  ;;  %v2235_v38 = vld [vmem:[%s2657_s6 + $0x1d0] sm:$0xff]   ;;  %v2242_v48 = vld [vmem:[#allocation2 + $0xc8] ss:$24 sps:$4 sm:$0xff]  }
 0x11d   :  { %2075 = vmatprep.mubr.bf16.mxu0 %v1034_v50  ;;  %2041 = vmatprep.subr.bf16.mxu1 %v2202_v47  ;;  %v2243_v45 = vld [vmem:[#allocation2 + $0xf8] ss:$24 sps:$4 sm:$0xff]  }
 0x11e   :  { %2061 = vmatprep.subr.bf16.mxu0 %v2203_v49  ;;  %v2245_v50 = vld [vmem:[#allocation2 + $0x39] ss:$24 sps:$4 sm:$0xff]  }
 0x11f   :  { %2042 = vmatpush3.bf16.msra.mxu1 %v2202_v47  ;;  %v2246_v47 = vld [vmem:[#allocation2 + $0x69] ss:$24 sps:$4 sm:$0xff]  }
 0x120   :  { %2062 = vmatpush3.bf16.msra.mxu0 %v2203_v49  ;;  %2043 = vmatprep.subr.bf16.mxu1 %v2204_v51  ;;  %v1180_v49 = vpack.c.bf16 %v2241_v43, %v2240_v46 }
 0x121   :  { %2063 = vmatprep.subr.bf16.mxu0 %v2205_v52 }
 0x123   :  { %2044 = vmatpush3.bf16.msra.mxu1 %v2204_v51  ;;  %v2247_v51 = vld [vmem:[%s2657_s6 + $0x230] sm:$0xff]  }
 0x124   :  { %2064 = vmatpush3.bf16.msra.mxu0 %v2205_v52  ;;  %2045 = vmatprep.subr.bf16.mxu1 %v2206_v53  ;;  %v1324_v52 = vpack.c.bf16 %v2243_v45, %v2242_v48 }
 0x125   :  { %2065 = vmatprep.subr.bf16.mxu0 %v2207_v54 }
 0x127   :  { %2046 = vmatpush3.bf16.msra.mxu1 %v2206_v53  ;;  %v1467_v53 = vpack.c.bf16 %v2246_v47, %v2245_v50 }
 0x128   :  { %2066 = vmatpush3.bf16.msra.mxu0 %v2207_v54  ;;  %2047 = vmatprep.subr.bf16.mxu1 %v2208_v55  ;;  %v2248_v54 = vld [vmem:[%s2657_s6 + $0x228] sm:$0xff]  }
 0x129   :  { %2067 = vmatprep.subr.bf16.mxu0 %v2209_v56 }
 0x12b   :  { %2048 = vmatpush3.bf16.msra.mxu1 %v2208_v55  ;;  %v2249_v55 = vld [vmem:[%s2657_s6 + $0x220] sm:$0xff]  }
 0x12c   :  { %2068 = vmatpush3.bf16.msra.mxu0 %v2209_v56  ;;  %2049 = vmatprep.subr.bf16.mxu1 %v2210_v57  ;;  %v2250_v56 = vld [vmem:[%s2657_s6 + $0x218] sm:$0xff]  }
 0x12d   :  { %2069 = vmatprep.subr.bf16.mxu0 %v2211_v58 }
 0x12f   :  { %2050 = vmatpush3.bf16.msra.mxu1 %v2210_v57  ;;  %v2251_v57 = vld [vmem:[%s2657_s6 + $0x210] sm:$0xff]  }
 0x130   :  { %2070 = vmatpush3.bf16.msra.mxu0 %v2211_v58  ;;  %2051 = vmatprep.subr.bf16.mxu1 %v2212_v59  ;;  %v2252_v58 = vld [vmem:[%s2657_s6 + $0x208] sm:$0xff]  }
 0x131   :  { %2071 = vmatprep.subr.bf16.mxu0 %v2213_v60 }
 0x133   :  { %2052 = vmatpush3.bf16.msra.mxu1 %v2212_v59  ;;  %v2253_v59 = vld [vmem:[%s2657_s6 + $0x200] sm:$0xff]  }
 0x134   :  { %2072 = vmatpush3.bf16.msra.mxu0 %v2213_v60  ;;  %2053 = vmatprep.subr.bf16.mxu1 %v2214_v61  ;;  %v2255_v60 = vld [vmem:[#allocation2 + $0xf9] ss:$24 sps:$4 sm:$0xff]  }
 0x135   :  { %2073 = vmatprep.subr.bf16.mxu0 %v2215_v62 }
 0x137   :  { %2054 = vmatpush3.bf16.msra.mxu1 %v2214_v61  ;;  %v2254_v61 = vld [vmem:[#allocation2 + $0xc9] ss:$24 sps:$4 sm:$0xff]  }
 0x138   :  { %2074 = vmatpush3.bf16.msra.mxu0 %v2215_v62  ;;  %2079 = vmatprep.subr.bf16.mxu1 %v2220_v0  ;;  %v1468_v62 = vpack.c.bf16 %v2255_v60, %v2254_v61 }
 0x139   :  { %2099 = vmatprep.subr.bf16.mxu0 %v2221_v2 }
 0x13a   :  { %2056 = vmatmul.mubr.bf16.vlgmr.msra.gmra.mxu1 %v891_v15 }
 0x13b   :  { %2076 = vmatmul.mubr.bf16.vlgmr.msra.gmra.mxu0 %v1035_v20  ;;  %2080 = vmatpush3.bf16.msra.mxu1 %v2220_v0 }
 0x13c   :  { %2095 = vmatprep.mubr.bf16.mxu1 %v1179_v26  ;;  %2100 = vmatpush3.bf16.msra.mxu0 %v2221_v2 }
 0x13d   :  { %2115 = vmatprep.mubr.bf16.mxu0 %v1323_v30  ;;  %2081 = vmatprep.subr.bf16.mxu1 %v2226_v25 }
 0x13e   :  { %2101 = vmatprep.subr.bf16.mxu0 %v2227_v29 }
 0x13f   :  { %2082 = vmatpush3.bf16.msra.mxu1 %v2226_v25 }
 0x140   :  { %2102 = vmatpush3.bf16.msra.mxu0 %v2227_v29  ;;  %2083 = vmatprep.subr.bf16.mxu1 %v2228_v31 }
 0x141   :  { %2103 = vmatprep.subr.bf16.mxu0 %v2229_v32 }
 0x143   :  { %2084 = vmatpush3.bf16.msra.mxu1 %v2228_v31 }
 0x144   :  { %2104 = vmatpush3.bf16.msra.mxu0 %v2229_v32  ;;  %2085 = vmatprep.subr.bf16.mxu1 %v2230_v33 }
 0x145   :  { %2105 = vmatprep.subr.bf16.mxu0 %v2231_v34 }
 0x147   :  { %2086 = vmatpush3.bf16.msra.mxu1 %v2230_v33 }
 0x148   :  { %2106 = vmatpush3.bf16.msra.mxu0 %v2231_v34  ;;  %2087 = vmatprep.subr.bf16.mxu1 %v2232_v35 }
 0x149   :  { %2107 = vmatprep.subr.bf16.mxu0 %v2233_v36 }
 0x14b   :  { %2088 = vmatpush3.bf16.msra.mxu1 %v2232_v35 }
 0x14c   :  { %2108 = vmatpush3.bf16.msra.mxu0 %v2233_v36  ;;  %2089 = vmatprep.subr.bf16.mxu1 %v2234_v37 }
 0x14d   :  { %2109 = vmatprep.subr.bf16.mxu0 %v2235_v38 }
 0x14f   :  { %2090 = vmatpush3.bf16.msra.mxu1 %v2234_v37 }
 0x150   :  { %2110 = vmatpush3.bf16.msra.mxu0 %v2235_v38  ;;  %2091 = vmatprep.subr.bf16.mxu1 %v2236_v39 }
 0x151   :  { %2111 = vmatprep.subr.bf16.mxu0 %v2237_v40 }
 0x153   :  { %2092 = vmatpush3.bf16.msra.mxu1 %v2236_v39 }
 0x154   :  { %2112 = vmatpush3.bf16.msra.mxu0 %v2237_v40  ;;  %2093 = vmatprep.subr.bf16.mxu1 %v2238_v41 }
 0x155   :  { %2113 = vmatprep.subr.bf16.mxu0 %v2239_v42 }
 0x157   :  { %2094 = vmatpush3.bf16.msra.mxu1 %v2238_v41 }
 0x158   :  { %2114 = vmatpush3.bf16.msra.mxu0 %v2239_v42  ;;  %2119 = vmatprep.subr.bf16.mxu1 %v2244_v44 }
 0x15a   :  { %2096 = vmatmul.mubr.bf16.vlgmr.msra.gmra.mxu1 %v1180_v49 }
 0x15b   :  { %2116 = vmatmul.mubr.bf16.vlgmr.msra.gmra.mxu0 %v1324_v52  ;;  %2120 = vmatpush3.bf16.msra.mxu1 %v2244_v44 }
 0x15c   :  { %2135 = vmatprep.mubr.bf16.mxu1 %v1467_v53  ;;  %2121 = vmatprep.subr.bf16.mxu1 %v2247_v51 }
 0x15f   :  { %2122 = vmatpush3.bf16.msra.mxu1 %v2247_v51 }
 0x160   :  { %2123 = vmatprep.subr.bf16.mxu1 %v2248_v54 }
 0x163   :  { %2124 = vmatpush3.bf16.msra.mxu1 %v2248_v54 }
 0x164   :  { %2125 = vmatprep.subr.bf16.mxu1 %v2249_v55 }
 0x167   :  { %2126 = vmatpush3.bf16.msra.mxu1 %v2249_v55 }
 0x168   :  { %2127 = vmatprep.subr.bf16.mxu1 %v2250_v56 }
 0x16b   :  { %2128 = vmatpush3.bf16.msra.mxu1 %v2250_v56 }
 0x16c   :  { %2129 = vmatprep.subr.bf16.mxu1 %v2251_v57 }
 0x16f   :  { %2130 = vmatpush3.bf16.msra.mxu1 %v2251_v57 }
 0x170   :  { %2131 = vmatprep.subr.bf16.mxu1 %v2252_v58 }
 0x173   :  { %2132 = vmatpush3.bf16.msra.mxu1 %v2252_v58 }
 0x174   :  { %2133 = vmatprep.subr.bf16.mxu1 %v2253_v59 }
 0x177   :  { %2134 = vmatpush3.bf16.msra.mxu1 %v2253_v59 }
 0x17a   :  { %2136 = vmatmul.mubr.bf16.vlgmr.msra.gmra.mxu1 %v1468_v62 }
 0x1ba   :  { %v1977_v63 = vpop.f32.mrf.mxu1 }
 0x1bb   :  { %v1997_v1 = vpop.f32.mrf.mxu0 }
 0x1bc   :  { %v466_v0 = vpop.f32.mrf.mxu1  ;;  %v572_v35 = vadd.f32 %v1997_v1, %v1977_v63 }
 0x1bd   :  { %v563_v3 = vpop.f32.mrf.mxu0 }
 0x1be   :  { %v1978_v2 = vpop.f32.mrf.mxu1  ;;  %v564_v37 = vadd.f32 %v563_v3, %v466_v0 }
 0x1bf   :  { %v1998_v12 = vpop.f32.mrf.mxu0 }
 0x1c0   :  { %v469_v11 = vpop.f32.mrf.mxu1  ;;  %v575_v43 = vadd.f32 %v1998_v12, %v1978_v2 }
 0x1c1   :  { %v566_v15 = vpop.f32.mrf.mxu0 }
 0x1c2   :  { %v567_v44 = vadd.f32 %v566_v15, %v469_v11 }
 0x1da   :  { %v2017_v13 = vpop.f32.mrf.mxu1 }
 0x1db   :  { %v2037_v20 = vpop.f32.mrf.mxu0  ;;  %v720_v38 = vadd.f32 %v2017_v13, %v572_v35 }
 0x1dc   :  { %v703_v16 = vpop.f32.mrf.mxu1 }
 0x1dd   :  { %v847_v25 = vpop.f32.mrf.mxu0  ;;  %v718_v40 = vadd.f32 %v703_v16, %v564_v37  ;;  %v864_v45 = vadd.f32 %v2037_v20, %v720_v38 }
 0x1de   :  { %v2018_v21 = vpop.f32.mrf.mxu1 }
 0x1df   :  { %v2038_v29 = vpop.f32.mrf.mxu0  ;;  %v721_v46 = vadd.f32 %v2018_v21, %v575_v43  ;;  %v862_v48 = vadd.f32 %v847_v25, %v718_v40 }
 0x1e0   :  { %v706_v26 = vpop.f32.mrf.mxu1 }
 0x1e1   :  { %v850_v31 = vpop.f32.mrf.mxu0  ;;  %v719_v47 = vadd.f32 %v706_v26, %v567_v44  ;;  %v865_v54 = vadd.f32 %v2038_v29, %v721_v46 }
 0x1e3   :  { %v863_v55 = vadd.f32 %v850_v31, %v719_v47 }
 0x1fa   :  { %v2057_v30 = vpop.f32.mrf.mxu1 }
 0x1fb   :  { %v2077_v33 = vpop.f32.mrf.mxu0  ;;  %v1008_v49 = vadd.f32 %v2057_v30, %v864_v45 }
 0x1fc   :  { %v991_v32 = vpop.f32.mrf.mxu1 }
 0x1fd   :  { %v1135_v36 = vpop.f32.mrf.mxu0  ;;  %v1006_v52 = vadd.f32 %v991_v32, %v862_v48  ;;  %v1152_v56 = vadd.f32 %v2077_v33, %v1008_v49 }
 0x1fe   :  { %v2058_v34 = vpop.f32.mrf.mxu1 }
 0x1ff   :  { %v2078_v41 = vpop.f32.mrf.mxu0  ;;  %v1009_v58 = vadd.f32 %v2058_v34, %v865_v54  ;;  %v1150_v60 = vadd.f32 %v1135_v36, %v1006_v52 }
 0x200   :  { %v994_v39 = vpop.f32.mrf.mxu1 }
 0x201   :  { %v1138_v50 = vpop.f32.mrf.mxu0  ;;  %v1007_v59 = vadd.f32 %v994_v39, %v863_v55  ;;  %v1153_v1 = vadd.f32 %v2078_v41, %v1009_v58 }
 0x203   :  { %v1151_v2 = vadd.f32 %v1138_v50, %v1007_v59 }
 0x21a   :  { %v2097_v42 = vpop.f32.mrf.mxu1 }
 0x21b   :  { %v2117_v53 = vpop.f32.mrf.mxu0  ;;  %v1297_v61 = vadd.f32 %v2097_v42, %v1152_v56 }
 0x21c   :  { %v1280_v51 = vpop.f32.mrf.mxu1 }
 0x21d   :  { %v1424_v62 = vpop.f32.mrf.mxu0  ;;  %v1295_v63 = vadd.f32 %v1280_v51, %v1150_v60  ;;  %v1441_v3 = vadd.f32 %v2117_v53, %v1297_v61 }
 0x21e   :  { %v2098_v57 = vpop.f32.mrf.mxu1 }
 0x21f   :  { %v2118_v11 = vpop.f32.mrf.mxu0  ;;  %v1298_v12 = vadd.f32 %v2098_v57, %v1153_v1  ;;  %v1439_v16 = vadd.f32 %v1424_v62, %v1295_v63 }
 0x220   :  { %v1283_v0 = vpop.f32.mrf.mxu1 }
 0x221   :  { %v1296_v13 = vadd.f32 %v1283_v0, %v1151_v2  ;;  %v1427_v25 = vpop.f32.mrf.mxu0  ;;  %v1442_v31 = vadd.f32 %v2118_v11, %v1298_v12 }
 0x223   :  { %v1440_v32 = vadd.f32 %v1427_v25, %v1296_v13 }
 0x23a   :  { %v2137_v15 = vpop.f32.mrf.mxu1 }
 0x23b   :  { %v1585_v20 = vadd.f32 %v2137_v15, %v1441_v3 }
 0x23c   :  { %v1568_v21 = vpop.f32.mrf.mxu1 }
 0x23d   :  { %v1593_v26 = vcombine.high %v1585_v20, %v1585_v20  ;;  %v1603_v29 = vadd.f32 %v1585_v20, %v39_v23  ;;  %v1583_v30 = vadd.f32 %v1568_v21, %v1439_v16 }
 0x23e   :  { %v2138_v33 = vpop.f32.mrf.mxu1 }
 0x23f   :  { %v1604_v34 = vadd.f32 %v1593_v26, %v40_v24  ;;  %v1611_v35 = vpack.c.bf16 %v1603_v29, %v1603_v29  ;;  %v1591_v36 = vcombine.high %v1583_v30, %v1583_v30  ;;  %v1599_v37 = vadd.f32 %v1583_v30, %v35_v8 }
 0x240   :  { %v1586_v38 = vadd.f32 %v2138_v33, %v1442_v31  ;;  %v1571_v39 = vpop.f32.mrf.mxu1 }
 0x241   :  { %v1612_v40 = vpack.c.bf16 %v1604_v34, %v1604_v34  ;;  %1619 = vst [vmem:[%s2660_s7 + $0x8] sm:$0x3] %v1611_v35  ;;  %v1600_v17 = vadd.f32 %v1591_v36, %v36_v9  ;;  %v1607_v23 = vpack.c.bf16 %v1599_v37, %v1599_v37  ;;  %v1584_v41 = vadd.f32 %v1571_v39, %v1440_v32 }
 0x242   :  { %v1594_v42 = vcombine.high %v1586_v38, %v1586_v38  ;;  %v1605_v18 = vadd.f32 %v1586_v38, %v41_v27 }
 0x243   :  { %1620 = vst [vmem:[%s2660_s7 + $0xa] sm:$0x3] %v1612_v40  ;;  %v1608_v4 = vpack.c.bf16 %v1600_v17, %v1600_v17  ;;  %1615 = vst [vmem:[%s2660_s7] sm:$0x3] %v1607_v23  ;;  %v1592_v8 = vcombine.high %v1584_v41, %v1584_v41  ;;  %v1601_v5 = vadd.f32 %v1584_v41, %v37_v10 }
 0x244   :  { %v1606_v9 = vadd.f32 %v1594_v42, %v42_v28  ;;  %v1613_v24 = vpack.c.bf16 %v1605_v18, %v1605_v18 }
 0x245   :  { %1616 = vst [vmem:[%s2660_s7 + $0x2] sm:$0x3] %v1608_v4  ;;  %v1602_v19 = vadd.f32 %v1592_v8, %v38_v14  ;;  %v1609_v27 = vpack.c.bf16 %v1601_v5, %v1601_v5 }
 0x246   :  { %v1614_v43 = vpack.c.bf16 %v1606_v9, %v1606_v9  ;;  %1621 = vst [vmem:[%s2660_s7 + $0xc] sm:$0x3] %v1613_v24 }
 0x247   :  { %v1610_v44 = vpack.c.bf16 %v1602_v19, %v1602_v19  ;;  %1617 = vst [vmem:[%s2660_s7 + $0x4] sm:$0x3] %v1609_v27 }
 0x248   :  { %1622 = vst [vmem:[%s2660_s7 + $0xe] sm:$0x3] %v1614_v43 }
 0x249   :  { %1618 = vst [vmem:[%s2660_s7 + $0x6] sm:$0x3] %v1610_v44 }

</bundles_post_ra>
